<compile_context>
chip_gen: v7x
topology: tpu7x:2x2x1
jax: 0.10.0
libtpu: 0.0.40
codegen_flags: <defaults>
</compile_context>

<pallas_src>
import functools

import jax
import jax.numpy as jnp
from jax import lax
from jax.experimental import pallas as pl
from jax.experimental.pallas import tpu as pltpu


_WEIGHT_TILE_BUDGET = 8 * 1024 * 1024     # per-buffer weight-tile byte budget (padded)
_MAX_TILE = 65536                         # cap on any single tile dimension
_VMEM_LIMIT = 48 * 1024 * 1024            # scoped VMEM limit (safe on v5e/v6e/v7x)


def _round_up(x, m):
    return ((x + m - 1) // m) * m


def _pick_tile(n, cap, align=128):
    """Largest `align`-aligned tile <= cap dividing n, or n itself if n <= cap."""
    if n <= cap:
        return n
    t = (min(cap, n) // align) * align
    while t >= align:
        if n % t == 0:
            return t
        t -= align
    raise ValueError(f"no {align}-aligned tile <= {cap} divides {n}")


# ----------------------------------------------------------------------------
# Linear kernels
# ----------------------------------------------------------------------------

def linear_simple_kernel(x_ref, w_ref, b_ref, o_ref, *, act):
    """y = act(x @ W + b); single K tile, grid over N tiles only."""
    y = jnp.dot(x_ref[...].astype(w_ref.dtype), w_ref[...],
                preferred_element_type=jnp.float32) + b_ref[...]
    if act == "leaky":
        y = jnp.where(y > 0, y, 0.2 * y)
    elif act == "relu":
        y = jnp.maximum(y, 0.0)
    o_ref[...] = y.astype(o_ref.dtype)


def linear_partial_kernel(x_ref, w_ref, o_ref, acc_ref):
    """Partial sums of x @ W.  grid = (n_split, N_tiles, K_tiles_per_split).

    Bias + activation + the sum over the split axis are applied in the wrapper
    (tiny (B, N) epilogue), so the split axis can be fully parallel.
    """
    k = pl.program_id(2)

    @pl.when(k == 0)
    def _():
        acc_ref[...] = jnp.zeros_like(acc_ref)

    acc_ref[...] += jnp.dot(x_ref[...].astype(w_ref.dtype), w_ref[...],
                            preferred_element_type=jnp.float32)

    @pl.when(k == pl.num_programs(2) - 1)
    def _():
        o_ref[...] = acc_ref[...]


def linear(x, w_t, b, act):
    """x:(B,K) f32, w_t:(K,N) (f32 or bf16), b:(N,) f32 -> act(x @ W + b) f32."""
    B, K = x.shape
    Kw, N = w_t.shape
    assert Kw == K
    itemsize = w_t.dtype.itemsize
    sub = 8 * (4 // itemsize)                       # sublane packing (f32:8, bf16:16)

    # ---- single-K-tile path (fc_out, fc_in at small test size) ----
    if _round_up(K, sub) * 128 * itemsize <= _WEIGHT_TILE_BUDGET:
        tn_cap = _WEIGHT_TILE_BUDGET // (_round_up(K, sub) * itemsize)
        tn_cap = min(_MAX_TILE, max(128, (tn_cap // 128) * 128))
        TN = _pick_tile(N, tn_cap)
        return pl.pallas_call(
            functools.partial(linear_simple_kernel, act=act),
            out_shape=jax.ShapeDtypeStruct((B, N), jnp.float32),
            grid=(N // TN,),
            in_specs=[
                pl.BlockSpec((B, K), lambda j: (0, 0)),
                pl.BlockSpec((K, TN), lambda j: (0, j)),
                pl.BlockSpec((1, TN), lambda j: (0, j)),
            ],
            out_specs=pl.BlockSpec((B, TN), lambda j: (0, j)),
            compiler_params=pltpu.CompilerParams(
                dimension_semantics=("parallel",),
                vmem_limit_bytes=_VMEM_LIMIT),
        )(x, w_t, b.reshape(1, N))

    # ---- K-tiled path with split reduction (fc_in at real size) ----
    TN = _pick_tile(N, 4096)                        # N expected small on this path
    lane_pad = max(128, _round_up(TN, 128))         # lane-padding aware budget
    tk_cap = _WEIGHT_TILE_BUDGET // (lane_pad * itemsize)
    tk_cap = min(_MAX_TILE, max(128, (tk_cap // 128) * 128))
    TK = _pick_tile(K, tk_cap)
    kg = K // TK
    n_split = 2 if (kg >= 2 and kg % 2 == 0) else 1  # shard reduction across 2 cores
    kg_s = kg // n_split

    partial = pl.pallas_call(
        linear_partial_kernel,
        out_shape=jax.ShapeDtypeStruct((n_split, B, N), jnp.float32),
        grid=(n_split, N // TN, kg_s),
        in_specs=[
            pl.BlockSpec((B, TK), lambda s, j, k: (0, s * kg_s + k)),
            pl.BlockSpec((TK, TN), lambda s, j, k: (s * kg_s + k, j)),
        ],
        out_specs=pl.BlockSpec((pl.Squeezed(), B, TN), lambda s, j, k: (s, 0, j)),
        scratch_shapes=[pltpu.VMEM((B, TN), jnp.float32)],
        compiler_params=pltpu.CompilerParams(
            dimension_semantics=("parallel", "parallel", "arbitrary"),
            vmem_limit_bytes=_VMEM_LIMIT),
    )(x, w_t)

    y = jnp.sum(partial, axis=0) + b.reshape(1, N)
    if act == "leaky":
        y = jnp.where(y > 0, y, 0.2 * y)
    elif act == "relu":
        y = jnp.maximum(y, 0.0)
    return y


# ----------------------------------------------------------------------------
# Conv kernels: valid KxK conv, stride 1, per-image, (H, C, W) layout
# ----------------------------------------------------------------------------

def _conv_rows(src_ref, w_ref, b_ref, dst_ref, *, K, act):
    """src:(Hs,Cin,Ws)  w:(K, Cout, K*Cin)  b:(Cout,1)  dst:(OH,Cout,OW).

    Per output row: 5-way concat over kh builds a (K*Cin, Ws) stack, then K=5
    MXU dots over per-kw lane slices; the (Cout, OW) result is one dense store.
    """
    OH, Cout, OW = dst_ref.shape
    bias = jnp.broadcast_to(b_ref[...], (Cout, OW))      # hoisted out of the loop

    @pl.loop(0, OH)
    def _(oh):
        stack = jnp.concatenate([src_ref[oh + kh] for kh in range(K)], axis=0)
        acc = bias
        for kw in range(K):
            acc = acc + jnp.dot(w_ref[kw], stack[:, kw:kw + OW],
                                preferred_element_type=jnp.float32)
        if act == "relu":
            acc = jnp.maximum(acc, 0.0)
        elif act == "tanh":
            acc = jnp.tanh(acc)
        elif act == "leaky":
            acc = jnp.where(acc > 0, acc, 0.2 * acc)
        dst_ref[oh] = acc.astype(dst_ref.dtype)


def conv_pair_kernel(x_ref, w1_ref, b1_ref, w2_ref, b2_ref, o_ref, *scratch,
                     K, pad, act1, act2):
    """Two chained valid convs for one image; intermediate stays in VMEM.

    pad == 0  : encoder (Conv2d -> Conv2d)
    pad == K-1: decoder (ConvTranspose2d as pad + flipped valid conv); padding is
                done into VMEM scratch, whose zero borders are written only once.
    """
    if pad == 0:
        (mid_ref,) = scratch
        _conv_rows(x_ref, w1_ref, b1_ref, mid_ref, K=K, act=act1)
        _conv_rows(mid_ref, w2_ref, b2_ref, o_ref, K=K, act=act2)
    else:
        xpad_ref, mid_ref, midpad_ref = scratch
        H, _, W = x_ref.shape
        H1, _, W1 = mid_ref.shape

        @pl.when(pl.program_id(0) == 0)
        def _():
            xpad_ref[...] = jnp.zeros_like(xpad_ref)
            midpad_ref[...] = jnp.zeros_like(midpad_ref)

        xpad_ref[pl.ds(pad, H), :, pl.ds(pad, W)] = x_ref[...]
        _conv_rows(xpad_ref, w1_ref, b1_ref, mid_ref, K=K, act=act1)
        midpad_ref[pl.ds(pad, H1), :, pl.ds(pad, W1)] = mid_ref[...]
        _conv_rows(midpad_ref, w2_ref, b2_ref, o_ref, K=K, act=act2)


def conv_pair(x_bhcw, w1, b1, w2, b2, *, pad, act1, act2):
    """Two fused valid 5x5 convs (stride 1) in (B, H, C, W) layout, one image/step."""
    B, H, Cin, W = x_bhcw.shape
    K = w1.shape[0]
    C1 = w1.shape[1]
    C2 = w2.shape[1]
    assert w1.shape[2] == K * Cin and w2.shape[2] == K * C1

    if pad == 0:
        H1, W1 = H - K + 1, W - K + 1
        H2, W2 = H1 - K + 1, W1 - K + 1
        scratch = [pltpu.VMEM((H1, C1, W1), jnp.float32)]
        sem = ("parallel",)
    else:
        Hp, Wp = H + 2 * pad, W + 2 * pad
        H1, W1 = Hp - K + 1, Wp - K + 1
        H1p, W1p = H1 + 2 * pad, W1 + 2 * pad
        H2, W2 = H1p - K + 1, W1p - K + 1
        scratch = [
            pltpu.VMEM((Hp, Cin, Wp), jnp.float32),
            pltpu.VMEM((H1, C1, W1), jnp.float32),
            pltpu.VMEM((H1p, C1, W1p), jnp.float32),
        ]
        sem = ("arbitrary",)        # zero-once padding scratch must stay on one core

    return pl.pallas_call(
        functools.partial(conv_pair_kernel, K=K, pad=pad, act1=act1, act2=act2),
        out_shape=jax.ShapeDtypeStruct((B, H2, C2, W2), jnp.float32),
        grid=(B,),
        in_specs=[
            pl.BlockSpec((pl.Squeezed(), H, Cin, W), lambda b: (b, 0, 0, 0)),
            pl.BlockSpec(w1.shape, lambda b: (0, 0, 0)),
            pl.BlockSpec((C1, 1), lambda b: (0, 0)),
            pl.BlockSpec(w2.shape, lambda b: (0, 0, 0)),
            pl.BlockSpec((C2, 1), lambda b: (0, 0)),
        ],
        out_specs=pl.BlockSpec((pl.Squeezed(), H2, C2, W2),
                               lambda b: (b, 0, 0, 0)),
        scratch_shapes=scratch,
        compiler_params=pltpu.CompilerParams(
            dimension_semantics=sem, vmem_limit_bytes=_VMEM_LIMIT),
    )(x_bhcw, w1, b1.reshape(C1, 1), w2, b2.reshape(C2, 1))


# ----------------------------------------------------------------------------
# Fused latent head: FC_mean + FC_var + reparameterization + FC_hidden
# ----------------------------------------------------------------------------

def latent_head_kernel(h_ref, wmv_ref, bmv_ref, eps_ref, whid_ref, bhid_ref,
                       mean_ref, logvar_ref, z_ref, d_ref, *, L):
    y = jnp.dot(h_ref[...], wmv_ref[...],
                preferred_element_type=jnp.float32) + bmv_ref[...]
    mean = y[:, :L]
    log_var = y[:, L:]
    z = mean + jnp.exp(0.5 * log_var) * eps_ref[...]
    mean_ref[...] = mean
    logvar_ref[...] = log_var
    z_ref[...] = z
    d = jnp.dot(z, whid_ref[...], preferred_element_type=jnp.float32) + bhid_ref[...]
    d_ref[...] = jnp.where(d > 0, d, 0.2 * d)          # LeakyReLU(0.2)


def latent_head(h, w_mv, b_mv, eps, w_hid, b_hid):
    B = h.shape[0]
    L = eps.shape[1]
    Hd = w_hid.shape[1]
    out_shape = (jax.ShapeDtypeStruct((B, L), jnp.float32),
                 jax.ShapeDtypeStruct((B, L), jnp.float32),
                 jax.ShapeDtypeStruct((B, L), jnp.float32),
                 jax.ShapeDtypeStruct((B, Hd), jnp.float32))
    return pl.pallas_call(
        functools.partial(latent_head_kernel, L=L),
        out_shape=out_shape,
    )(h, w_mv, b_mv, eps, w_hid, b_hid)


# ----------------------------------------------------------------------------
# VAE forward
# ----------------------------------------------------------------------------

def vae_forward(params, x_nchw, eps):
    B, C, H, W = x_nchw.shape
    K = params["conv1_w"].shape[0]
    c1_in = params["conv1_w"].shape[2] // K            # padded Cin of conv1 (8)

    # ----- Encoder -----  (N,C,H,W) -> (N,H,C,W) with channels padded to 8
    xe = jnp.transpose(x_nchw, (0, 2, 1, 3))
    if c1_in > C:
        xe = jnp.pad(xe, ((0, 0), (0, 0), (0, c1_in - C), (0, 0)))
    h = conv_pair(xe, params["conv1_w"], params["conv1_b"],
                  params["conv2_w"], params["conv2_b"],
                  pad=0, act1="relu", act2="relu")
    S = h.shape[1]
    h_flat = h.reshape(B, -1)          # (h, c, w) order; fc_in_w columns are permuted
    h2 = linear(h_flat, params["fc_in_w"], params["fc_in_b"], act="leaky")
    mean, log_var, z, d1 = latent_head(h2, params["fc_mv_w"], params["fc_mv_b"],
                                       eps, params["fc_hid_w"], params["fc_hid_b"])

    # ----- Decoder -----
    d2 = linear(d1, params["fc_out_w"], params["fc_out_b"], act="leaky")
    Cd = params["deconv1_w"].shape[2] // K
    d = d2.reshape(B, S, Cd, S)        # fc_out rows permuted -> already (H, C, W)
    y = conv_pair(d, params["deconv1_w"], params["deconv1_b"],
                  params["deconv2_w"], params["deconv2_b"],
                  pad=K - 1, act1="relu", act2="tanh")
    x_hat = jnp.transpose(y[:, :, :C, :], (0, 2, 1, 3))   # drop padded channels
    return x_hat, mean, log_var, z


# ----------------------------------------------------------------------------
# Parameters: raw (torch layout) + kernel-layout preparation
# ----------------------------------------------------------------------------

def init_raw_params(key, hidden_dim, latent_dim, S):
    flat = 32 * S * S
    ks = jax.random.split(key, 18)

    def rnd(k, shape, scale=0.05):
        return (scale * jax.random.normal(k, shape)).astype(jnp.float32)

    return {
        "conv1_w": rnd(ks[0], (16, 4, 5, 5)), "conv1_b": rnd(ks[1], (16,)),
        "conv2_w": rnd(ks[2], (32, 16, 5, 5)), "conv2_b": rnd(ks[3], (32,)),
        "fc_in_w": rnd(ks[4], (hidden_dim, flat)), "fc_in_b": rnd(ks[5], (hidden_dim,)),
        "fc_mean_w": rnd(ks[6], (latent_dim, hidden_dim)), "fc_mean_b": rnd(ks[7], (latent_dim,)),
        "fc_var_w": rnd(ks[8], (latent_dim, hidden_dim)), "fc_var_b": rnd(ks[9], (latent_dim,)),
        "fc_hid_w": rnd(ks[10], (hidden_dim, latent_dim)), "fc_hid_b": rnd(ks[11], (hidden_dim,)),
        "fc_out_w": rnd(ks[12], (flat, hidden_dim)), "fc_out_b": rnd(ks[13], (flat,)),
        "deconv1_w": rnd(ks[14], (32, 16, 5, 5)), "deconv1_b": rnd(ks[15], (16,)),
        "deconv2_w": rnd(ks[16], (16, 4, 5, 5)), "deconv2_b": rnd(ks[17], (4,)),
    }


def prepare_params(raw, S):
    """Convert torch-layout parameters to kernel layouts (done once at init)."""
    hidden = raw["fc_in_b"].shape[0]
    L = raw["fc_mean_b"].shape[0]

    def conv_w(w, cin_pad=None, cout_pad=None):
        # Conv2d (Cout,Cin,Kh,Kw) -> (Kw, Cout, Kh*Cin) per-kw weight slices
        Co, Ci, Kh, Kw = w.shape
        if cin_pad is not None and cin_pad > Ci:
            w = jnp.pad(w, ((0, 0), (0, cin_pad - Ci), (0, 0), (0, 0)))
        Cip = w.shape[1]
        wp = jnp.transpose(w, (3, 0, 2, 1)).reshape(Kw, Co, Kh * Cip)
        if cout_pad is not None and cout_pad > Co:
            wp = jnp.pad(wp, ((0, 0), (0, cout_pad - Co), (0, 0)))
        return wp

    def deconv_w(w, cin_pad=None, cout_pad=None):
        # ConvTranspose2d (Cin,Cout,K,K) == flipped valid conv
        wf = jnp.transpose(jnp.flip(w, axis=(2, 3)), (1, 0, 2, 3))
        return conv_w(wf, cin_pad, cout_pad)

    def pad_bias(b, n):
        return jnp.pad(b, (0, n - b.shape[0])) if n > b.shape[0] else b

    # fc_in: columns reordered (c,h,w) -> (h,c,w) to match the conv output layout.
    fi = raw["fc_in_w"].reshape(hidden, 32, S, S).transpose(0, 2, 1, 3).reshape(hidden, -1)
    # fc_out: rows reordered so its output reshapes directly into (H, C, W) layout.
    fo = raw["fc_out_w"].reshape(32, S, S, hidden).transpose(1, 0, 2, 3).reshape(-1, hidden)
    fo_b = raw["fc_out_b"].reshape(32, S, S).transpose(1, 0, 2).reshape(-1)

    return {
        "conv1_w": conv_w(raw["conv1_w"], cin_pad=8), "conv1_b": raw["conv1_b"],
        "conv2_w": conv_w(raw["conv2_w"]), "conv2_b": raw["conv2_b"],
        "fc_in_w": fi.T.astype(jnp.bfloat16), "fc_in_b": raw["fc_in_b"],
        "fc_mv_w": jnp.concatenate([raw["fc_mean_w"].T, raw["fc_var_w"].T], axis=1),
        "fc_mv_b": jnp.concatenate([raw["fc_mean_b"], raw["fc_var_b"]]).reshape(1, 2 * L),
        "fc_hid_w": raw["fc_hid_w"].T, "fc_hid_b": raw["fc_hid_b"].reshape(1, hidden),
        "fc_out_w": fo.T.astype(jnp.bfloat16), "fc_out_b": fo_b,
        "deconv1_w": deconv_w(raw["deconv1_w"]), "deconv1_b": raw["deconv1_b"],
        "deconv2_w": deconv_w(raw["deconv2_w"], cout_pad=8),
        "deconv2_b": pad_bias(raw["deconv2_b"], 8),
    }


# ----------------------------------------------------------------------------
# Pure-JAX reference (torch semantics) for the correctness check
# ----------------------------------------------------------------------------

def reference_forward(raw, x, eps):
    P = lax.Precision.HIGHEST

    def lin(v, w, b, leaky=False):
        y = jnp.dot(v, w.T, precision=P) + b
        return jnp.where(y > 0, y, 0.2 * y) if leaky else y

    def conv(v, w, b):                 # Conv2d, valid, stride 1
        y = lax.conv_general_dilated(v, w, (1, 1), "VALID",
                                     dimension_numbers=("NCHW", "OIHW", "NCHW"),
                                     precision=P)
        return y + b.reshape(1, -1, 1, 1)

    def convT(v, w, b):                # ConvTranspose2d, stride 1 == pad-4 + flipped conv
        wf = jnp.transpose(jnp.flip(w, axis=(2, 3)), (1, 0, 2, 3))
        y = lax.conv_general_dilated(v, wf, (1, 1), [(4, 4), (4, 4)],
                                     dimension_numbers=("NCHW", "OIHW", "NCHW"),
                                     precision=P)
        return y + b.reshape(1, -1, 1, 1)

    h = jax.nn.relu(conv(x, raw["conv1_w"], raw["conv1_b"]))
    h = jax.nn.relu(conv(h, raw["conv2_w"], raw["conv2_b"]))
    h = h.reshape(h.shape[0], -1)
    h = lin(h, raw["fc_in_w"], raw["fc_in_b"], leaky=True)
    mean = lin(h, raw["fc_mean_w"], raw["fc_mean_b"])
    log_var = lin(h, raw["fc_var_w"], raw["fc_var_b"])
    z = mean + jnp.exp(0.5 * log_var) * eps
    d = lin(z, raw["fc_hid_w"], raw["fc_hid_b"], leaky=True)
    d = lin(d, raw["fc_out_w"], raw["fc_out_b"], leaky=True)
    S = int(round((d.shape[1] // 32) ** 0.5))
    d = d.reshape(-1, 32, S, S)
    d = jax.nn.relu(convT(d, raw["deconv1_w"], raw["deconv1_b"]))
    x_hat = jnp.tanh(convT(d, raw["deconv2_w"], raw["deconv2_b"]))
    return x_hat, mean, log_var, z


# ----------------------------------------------------------------------------
# Main
# ----------------------------------------------------------------------------

if __name__ == "__main__":
    B, C, H, W = 2, 4, 16, 16        # small analog of the 200x200x4 input
    hidden_dim, latent_dim = 32, 8
    S = H - 8                        # post-encoder spatial size (192 in the original)

    key = jax.random.PRNGKey(0)
    k_param, k_x, k_eps, k_lin = jax.random.split(key, 4)

    raw = init_raw_params(k_param, hidden_dim, latent_dim, S)
    params = prepare_params(raw, S)
    x = jax.random.normal(k_x, (B, C, H, W), dtype=jnp.float32)
    # torch.randn_like(var) replaced by a deterministic host-side normal draw:
    eps = jax.random.normal(k_eps, (B, latent_dim), dtype=jnp.float32)

    fwd = jax.jit(vae_forward)
    x_hat, mean, log_var, z = fwd(params, x, eps)
    jax.block_until_ready((x_hat, mean, log_var, z))

    assert x_hat.shape == (B, C, H, W)
    assert mean.shape == (B, latent_dim)
    assert log_var.shape == (B, latent_dim)
    assert z.shape == (B, latent_dim)
    assert bool(jnp.all(jnp.isfinite(x_hat)))
    assert bool(jnp.all(jnp.abs(x_hat) <= 1.0))      # tanh output range

    # Correctness vs. a pure-JAX f32 reference of the torch module (bf16 weight
    # streaming of the two big FCs introduces only ~1e-2 worst-case deviation).
    ref = reference_forward(raw, x, eps)
    for name, got, want in zip(("x_hat", "mean", "log_var", "z"),
                               (x_hat, mean, log_var, z), ref):
        err = float(jnp.max(jnp.abs(got - want)))
        assert err < 5e-2, f"{name} mismatch vs reference: {err}"

    # Also exercise the K-tiled / split-reduction linear path (used by fc_in at the
    # real 192x192 size, but not reached at this small test size).
    kK, kN = 65536, 256
    ka, kb, kc = jax.random.split(k_lin, 3)
    lx = jax.random.normal(ka, (B, kK), dtype=jnp.float32)
    lw = (0.01 * jax.random.normal(kb, (kK, kN))).astype(jnp.bfloat16)
    lb = (0.05 * jax.random.normal(kc, (kN,))).astype(jnp.float32)
    ly = jax.jit(functools.partial(linear, act="leaky"))(lx, lw, lb)
    jax.block_until_ready(ly)
    lxq = lx.astype(jnp.bfloat16).astype(jnp.float32)
    lref = jnp.dot(lxq, lw.astype(jnp.float32), precision=lax.Precision.HIGHEST) + lb
    lref = jnp.where(lref > 0, lref, 0.2 * lref)
    lerr = float(jnp.max(jnp.abs(ly - lref)))
    assert lerr < 1e-2, f"tiled linear mismatch vs reference: {lerr}"

    print("KERNEL_OK")
</pallas_src>

<mosaic_0001>
module attributes {stable_mosaic.version = 11 : i64} {
  func.func @linear_simple_kernel(%arg0: i32, %arg1: memref<2x2048xf32, #tpu.memory_space<vmem>>, %arg2: memref<2048x32xbf16, #tpu.memory_space<vmem>>, %arg3: memref<1x32xf32, #tpu.memory_space<vmem>>, %arg4: memref<2x32xf32, #tpu.memory_space<vmem>>) attributes {dimension_semantics = [#tpu.dimension_semantics<parallel>], iteration_bounds = array<i64: 1>, scalar_prefetch = 0 : i64, scratch_operands = 0 : i64, tpu.core_type = #tpu.core_type<tc>, window_params = [{pipeline_mode = #tpu.pipeline_mode<synchronous>, transform_indices = @transform_0, window_bounds = array<i64: 2, 2048>}, {transform_indices = @transform_1, window_bounds = array<i64: 2048, 32>}, {transform_indices = @transform_2, window_bounds = array<i64: 1, 32>}, {transform_indices = @transform_3, window_bounds = array<i64: 2, 32>}]} {
    %c0 = arith.constant 0 : index
    %c0_0 = arith.constant 0 : index
    %0 = vector.load %arg1[%c0, %c0_0] : memref<2x2048xf32, #tpu.memory_space<vmem>>, vector<2x2048xf32>
    %1 = arith.truncf %0 : vector<2x2048xf32> to vector<2x2048xbf16>
    %c0_1 = arith.constant 0 : index
    %c0_2 = arith.constant 0 : index
    %2 = vector.load %arg2[%c0_1, %c0_2] : memref<2048x32xbf16, #tpu.memory_space<vmem>>, vector<2048x32xbf16>
    %cst = arith.constant dense<0.000000e+00> : vector<2x32xf32>
    %3 = tpu.matmul %1, %2, %cst {dimension_numbers = #tpu.dot_dimension_numbers<[1], [0], [0], [1], [0, 0, 1, 1], [], []>} : vector<2x2048xbf16>, vector<2048x32xbf16>, vector<2x32xf32> -> vector<2x32xf32>
    %c0_3 = arith.constant 0 : index
    %c0_4 = arith.constant 0 : index
    %4 = vector.load %arg3[%c0_3, %c0_4] : memref<1x32xf32, #tpu.memory_space<vmem>>, vector<1x32xf32>
    %5 = vector.broadcast %4 : vector<1x32xf32> to vector<2x32xf32>
    %6 = arith.addf %3, %5 : vector<2x32xf32>
    %cst_5 = arith.constant 0.000000e+00 : f32
    %7 = vector.broadcast %cst_5 : f32 to vector<2x32xf32>
    %8 = arith.cmpf ogt, %6, %7 : vector<2x32xf32>
    %cst_6 = arith.constant 2.000000e-01 : f32
    %9 = vector.broadcast %cst_6 : f32 to vector<2x32xf32>
    %10 = arith.mulf %9, %6 : vector<2x32xf32>
    %11 = arith.select %8, %6, %10 : vector<2x32xi1>, vector<2x32xf32>
    %c0_7 = arith.constant 0 : index
    %c0_8 = arith.constant 0 : index
    %12 = vector.load %arg4[%c0_7, %c0_8] : memref<2x32xf32, #tpu.memory_space<vmem>>, vector<2x32xf32>
    tpu.vector_store %arg4[%c0_7, %c0_8], %11 {strides = array<i32>} : memref<2x32xf32, #tpu.memory_space<vmem>>, vector<2x32xf32>,
    return
  }
  func.func @transform_0(%arg0: i32) -> (i32, i32) {
    %c0_i32 = arith.constant 0 : i32
    %c0_i32_0 = arith.constant 0 : i32
    %c0_i32_1 = arith.constant 0 : i32
    return %c0_i32, %c0_i32_0 : i32, i32
  }
  func.func @transform_1(%arg0: i32) -> (i32, i32) {
    %c0_i32 = arith.constant 0 : i32
    %c0_i32_0 = arith.constant 0 : i32
    return %c0_i32, %arg0 : i32, i32
  }
  func.func @transform_2(%arg0: i32) -> (i32, i32) {
    %c0_i32 = arith.constant 0 : i32
    %c0_i32_0 = arith.constant 0 : i32
    return %c0_i32, %arg0 : i32, i32
  }
  func.func @transform_3(%arg0: i32) -> (i32, i32) {
    %c0_i32 = arith.constant 0 : i32
    %c0_i32_0 = arith.constant 0 : i32
    return %c0_i32, %arg0 : i32, i32
  }
}

module attributes {stable_mosaic.version = 11 : i64} {
  func.func @conv_pair_kernel(%arg0: i32, %arg1: memref<1x16x8x16xf32, #tpu.memory_space<vmem>>, %arg2: memref<5x16x40xf32, #tpu.memory_space<vmem>>, %arg3: memref<16x1xf32, #tpu.memory_space<vmem>>, %arg4: memref<5x32x80xf32, #tpu.memory_space<vmem>>, %arg5: memref<32x1xf32, #tpu.memory_space<vmem>>, %arg6: memref<1x8x32x8xf32, #tpu.memory_space<vmem>>, %arg7: memref<12x16x12xf32, #tpu.memory_space<vmem>>) attributes {dimension_semantics = [#tpu.dimension_semantics<parallel>], iteration_bounds = array<i64: 2>, scalar_prefetch = 0 : i64, scratch_operands = 1 : i64, tpu.core_type = #tpu.core_type<tc>, window_params = [{transform_indices = @transform_0, window_bounds = array<i64: 1, 16, 8, 16>}, {pipeline_mode = #tpu.pipeline_mode<synchronous>, transform_indices = @transform_1, window_bounds = array<i64: 5, 16, 40>}, {pipeline_mode = #tpu.pipeline_mode<synchronous>, transform_indices = @transform_2, window_bounds = array<i64: 16, 1>}, {pipeline_mode = #tpu.pipeline_mode<synchronous>, transform_indices = @transform_3, window_bounds = array<i64: 5, 32, 80>}, {pipeline_mode = #tpu.pipeline_mode<synchronous>, transform_indices = @transform_4, window_bounds = array<i64: 32, 1>}, {transform_indices = @transform_5, window_bounds = array<i64: 1, 8, 32, 8>}]} {
    %c0 = arith.constant 0 : index
    %c0_0 = arith.constant 0 : index
    %0 = vector.load %arg3[%c0, %c0_0] : memref<16x1xf32, #tpu.memory_space<vmem>>, vector<16x1xf32>
    %1 = vector.shape_cast %0 : vector<16x1xf32> to vector<16x1xf32>
    %2 = vector.broadcast %1 : vector<16x1xf32> to vector<16x12xf32>
    %c0_i32 = arith.constant 0 : i32
    %c12_i32 = arith.constant 12 : i32
    %3 = arith.addi %c0_i32, %c12_i32 : i32
    %c1_i32 = arith.constant 1 : i32
    scf.for %arg8 = %c0_i32 to %3 step %c1_i32  : i32 {
      %c1_i32_7 = arith.constant 1 : i32
      %8 = arith.muli %arg8, %c1_i32_7 : i32
      %c0_i32_8 = arith.constant 0 : i32
      %9 = arith.addi %c0_i32_8, %8 : i32
      %c0_i32_9 = arith.constant 0 : i32
      %10 = arith.addi %9, %c0_i32_9 : i32
      %c0_10 = arith.constant 0 : index
      %11 = arith.index_cast %10 : i32 to index
      %c0_11 = arith.constant 0 : index
      %c0_12 = arith.constant 0 : index
      %12 = vector.load %arg1[%c0_10, %11, %c0_11, %c0_12] : memref<1x16x8x16xf32, #tpu.memory_space<vmem>>, vector<1x1x8x16xf32>
      %13 = vector.shape_cast %12 : vector<1x1x8x16xf32> to vector<8x16xf32>
      %c1_i32_13 = arith.constant 1 : i32
      %14 = arith.addi %9, %c1_i32_13 : i32
      %c0_14 = arith.constant 0 : index
      %15 = arith.index_cast %14 : i32 to index
      %c0_15 = arith.constant 0 : index
      %c0_16 = arith.constant 0 : index
      %16 = vector.load %arg1[%c0_14, %15, %c0_15, %c0_16] : memref<1x16x8x16xf32, #tpu.memory_space<vmem>>, vector<1x1x8x16xf32>
      %17 = vector.shape_cast %16 : vector<1x1x8x16xf32> to vector<8x16xf32>
      %c2_i32 = arith.constant 2 : i32
      %18 = arith.addi %9, %c2_i32 : i32
      %c0_17 = arith.constant 0 : index
      %19 = arith.index_cast %18 : i32 to index
      %c0_18 = arith.constant 0 : index
      %c0_19 = arith.constant 0 : index
      %20 = vector.load %arg1[%c0_17, %19, %c0_18, %c0_19] : memref<1x16x8x16xf32, #tpu.memory_space<vmem>>, vector<1x1x8x16xf32>
      %21 = vector.shape_cast %20 : vector<1x1x8x16xf32> to vector<8x16xf32>
      %c3_i32 = arith.constant 3 : i32
      %22 = arith.addi %9, %c3_i32 : i32
      %c0_20 = arith.constant 0 : index
      %23 = arith.index_cast %22 : i32 to index
      %c0_21 = arith.constant 0 : index
      %c0_22 = arith.constant 0 : index
      %24 = vector.load %arg1[%c0_20, %23, %c0_21, %c0_22] : memref<1x16x8x16xf32, #tpu.memory_space<vmem>>, vector<1x1x8x16xf32>
      %25 = vector.shape_cast %24 : vector<1x1x8x16xf32> to vector<8x16xf32>
      %c4_i32 = arith.constant 4 : i32
      %26 = arith.addi %9, %c4_i32 : i32
      %c0_23 = arith.constant 0 : index
      %27 = arith.index_cast %26 : i32 to index
      %c0_24 = arith.constant 0 : index
      %c0_25 = arith.constant 0 : index
      %28 = vector.load %arg1[%c0_23, %27, %c0_24, %c0_25] : memref<1x16x8x16xf32, #tpu.memory_space<vmem>>, vector<1x1x8x16xf32>
      %29 = vector.shape_cast %28 : vector<1x1x8x16xf32> to vector<8x16xf32>
      %30 = tpu.concatenate %13, %17, %21, %25, %29 in 0 : vector<8x16xf32>, vector<8x16xf32>, vector<8x16xf32>, vector<8x16xf32>, vector<8x16xf32> -> vector<40x16xf32>
      %c0_26 = arith.constant 0 : index
      %c0_27 = arith.constant 0 : index
      %c0_28 = arith.constant 0 : index
      %31 = vector.load %arg2[%c0_26, %c0_27, %c0_28] : memref<5x16x40xf32, #tpu.memory_space<vmem>>, vector<1x16x40xf32>
      %32 = vector.shape_cast %31 : vector<1x16x40xf32> to vector<16x40xf32>
      %33 = vector.extract_strided_slice %30 {offsets = [0, 0], sizes = [40, 12], strides = [1, 1]} : vector<40x16xf32> to vector<40x12xf32>
      %cst = arith.constant dense<0.000000e+00> : vector<16x12xf32>
      %34 = tpu.matmul %32, %33, %cst {dimension_numbers = #tpu.dot_dimension_numbers<[1], [0], [0], [1], [0, 0, 1, 1], [], []>} : vector<16x40xf32>, vector<40x12xf32>, vector<16x12xf32> -> vector<16x12xf32>
      %35 = arith.addf %2, %34 : vector<16x12xf32>
      %c1 = arith.constant 1 : index
      %c0_29 = arith.constant 0 : index
      %c0_30 = arith.constant 0 : index
      %36 = vector.load %arg2[%c1, %c0_29, %c0_30] : memref<5x16x40xf32, #tpu.memory_space<vmem>>, vector<1x16x40xf32>
      %37 = vector.shape_cast %36 : vector<1x16x40xf32> to vector<16x40xf32>
      %38 = vector.extract_strided_slice %30 {offsets = [0, 1], sizes = [40, 12], strides = [1, 1]} : vector<40x16xf32> to vector<40x12xf32>
      %cst_31 = arith.constant dense<0.000000e+00> : vector<16x12xf32>
      %39 = tpu.matmul %37, %38, %cst_31 {dimension_numbers = #tpu.dot_dimension_numbers<[1], [0], [0], [1], [0, 0, 1, 1], [], []>} : vector<16x40xf32>, vector<40x12xf32>, vector<16x12xf32> -> vector<16x12xf32>
      %40 = arith.addf %35, %39 : vector<16x12xf32>
      %c2 = arith.constant 2 : index
      %c0_32 = arith.constant 0 : index
      %c0_33 = arith.constant 0 : index
      %41 = vector.load %arg2[%c2, %c0_32, %c0_33] : memref<5x16x40xf32, #tpu.memory_space<vmem>>, vector<1x16x40xf32>
      %42 = vector.shape_cast %41 : vector<1x16x40xf32> to vector<16x40xf32>
      %43 = vector.extract_strided_slice %30 {offsets = [0, 2], sizes = [40, 12], strides = [1, 1]} : vector<40x16xf32> to vector<40x12xf32>
      %cst_34 = arith.constant dense<0.000000e+00> : vector<16x12xf32>
      %44 = tpu.matmul %42, %43, %cst_34 {dimension_numbers = #tpu.dot_dimension_numbers<[1], [0], [0], [1], [0, 0, 1, 1], [], []>} : vector<16x40xf32>, vector<40x12xf32>, vector<16x12xf32> -> vector<16x12xf32>
      %45 = arith.addf %40, %44 : vector<16x12xf32>
      %c3 = arith.constant 3 : index
      %c0_35 = arith.constant 0 : index
      %c0_36 = arith.constant 0 : index
      %46 = vector.load %arg2[%c3, %c0_35, %c0_36] : memref<5x16x40xf32, #tpu.memory_space<vmem>>, vector<1x16x40xf32>
      %47 = vector.shape_cast %46 : vector<1x16x40xf32> to vector<16x40xf32>
      %48 = vector.extract_strided_slice %30 {offsets = [0, 3], sizes = [40, 12], strides = [1, 1]} : vector<40x16xf32> to vector<40x12xf32>
      %cst_37 = arith.constant dense<0.000000e+00> : vector<16x12xf32>
      %49 = tpu.matmul %47, %48, %cst_37 {dimension_numbers = #tpu.dot_dimension_numbers<[1], [0], [0], [1], [0, 0, 1, 1], [], []>} : vector<16x40xf32>, vector<40x12xf32>, vector<16x12xf32> -> vector<16x12xf32>
      %50 = arith.addf %45, %49 : vector<16x12xf32>
      %c4 = arith.constant 4 : index
      %c0_38 = arith.constant 0 : index
      %c0_39 = arith.constant 0 : index
      %51 = vector.load %arg2[%c4, %c0_38, %c0_39] : memref<5x16x40xf32, #tpu.memory_space<vmem>>, vector<1x16x40xf32>
      %52 = vector.shape_cast %51 : vector<1x16x40xf32> to vector<16x40xf32>
      %53 = vector.extract_strided_slice %30 {offsets = [0, 4], sizes = [40, 12], strides = [1, 1]} : vector<40x16xf32> to vector<40x12xf32>
      %cst_40 = arith.constant dense<0.000000e+00> : vector<16x12xf32>
      %54 = tpu.matmul %52, %53, %cst_40 {dimension_numbers = #tpu.dot_dimension_numbers<[1], [0], [0], [1], [0, 0, 1, 1], [], []>} : vector<16x40xf32>, vector<40x12xf32>, vector<16x12xf32> -> vector<16x12xf32>
      %55 = arith.addf %50, %54 : vector<16x12xf32>
      %cst_41 = arith.constant 0.000000e+00 : f32
      %56 = vector.broadcast %cst_41 : f32 to vector<16x12xf32>
      %57 = arith.maximumf %55, %56 : vector<16x12xf32>
      %58 = arith.index_cast %9 : i32 to index
      %c0_42 = arith.constant 0 : index
      %c0_43 = arith.constant 0 : index
      %59 = vector.load %arg7[%58, %c0_42, %c0_43] : memref<12x16x12xf32, #tpu.memory_space<vmem>>, vector<1x16x12xf32>
      %60 = vector.shape_cast %59 : vector<1x16x12xf32> to vector<16x12xf32>
      %61 = vector.shape_cast %57 : vector<16x12xf32> to vector<1x16x12xf32>
      tpu.vector_store %arg7[%58, %c0_42, %c0_43], %61 {strides = array<i32>} : memref<12x16x12xf32, #tpu.memory_space<vmem>>, vector<1x16x12xf32>,
    }
    %c12_i32_1 = arith.constant 12 : i32
    %c0_2 = arith.constant 0 : index
    %c0_3 = arith.constant 0 : index
    %4 = vector.load %arg5[%c0_2, %c0_3] : memref<32x1xf32, #tpu.memory_space<vmem>>, vector<32x1xf32>
    %5 = vector.shape_cast %4 : vector<32x1xf32> to vector<32x1xf32>
    %6 = vector.broadcast %5 : vector<32x1xf32> to vector<32x8xf32>
    %c0_i32_4 = arith.constant 0 : i32
    %c8_i32 = arith.constant 8 : i32
    %7 = arith.addi %c0_i32_4, %c8_i32 : i32
    %c1_i32_5 = arith.constant 1 : i32
    scf.for %arg8 = %c0_i32_4 to %7 step %c1_i32_5  : i32 {
      %c1_i32_7 = arith.constant 1 : i32
      %8 = arith.muli %arg8, %c1_i32_7 : i32
      %c0_i32_8 = arith.constant 0 : i32
      %9 = arith.addi %c0_i32_8, %8 : i32
      %c0_i32_9 = arith.constant 0 : i32
      %10 = arith.addi %9, %c0_i32_9 : i32
      %11 = arith.index_cast %10 : i32 to index
      %c0_10 = arith.constant 0 : index
      %c0_11 = arith.constant 0 : index
      %12 = vector.load %arg7[%11, %c0_10, %c0_11] : memref<12x16x12xf32, #tpu.memory_space<vmem>>, vector<1x16x12xf32>
      %13 = vector.shape_cast %12 : vector<1x16x12xf32> to vector<16x12xf32>
      %c1_i32_12 = arith.constant 1 : i32
      %14 = arith.addi %9, %c1_i32_12 : i32
      %15 = arith.index_cast %14 : i32 to index
      %c0_13 = arith.constant 0 : index
      %c0_14 = arith.constant 0 : index
      %16 = vector.load %arg7[%15, %c0_13, %c0_14] : memref<12x16x12xf32, #tpu.memory_space<vmem>>, vector<1x16x12xf32>
      %17 = vector.shape_cast %16 : vector<1x16x12xf32> to vector<16x12xf32>
      %c2_i32 = arith.constant 2 : i32
      %18 = arith.addi %9, %c2_i32 : i32
      %19 = arith.index_cast %18 : i32 to index
      %c0_15 = arith.constant 0 : index
      %c0_16 = arith.constant 0 : index
      %20 = vector.load %arg7[%19, %c0_15, %c0_16] : memref<12x16x12xf32, #tpu.memory_space<vmem>>, vector<1x16x12xf32>
      %21 = vector.shape_cast %20 : vector<1x16x12xf32> to vector<16x12xf32>
      %c3_i32 = arith.constant 3 : i32
      %22 = arith.addi %9, %c3_i32 : i32
      %23 = arith.index_cast %22 : i32 to index
      %c0_17 = arith.constant 0 : index
      %c0_18 = arith.constant 0 : index
      %24 = vector.load %arg7[%23, %c0_17, %c0_18] : memref<12x16x12xf32, #tpu.memory_space<vmem>>, vector<1x16x12xf32>
      %25 = vector.shape_cast %24 : vector<1x16x12xf32> to vector<16x12xf32>
      %c4_i32 = arith.constant 4 : i32
      %26 = arith.addi %9, %c4_i32 : i32
      %27 = arith.index_cast %26 : i32 to index
      %c0_19 = arith.constant 0 : index
      %c0_20 = arith.constant 0 : index
      %28 = vector.load %arg7[%27, %c0_19, %c0_20] : memref<12x16x12xf32, #tpu.memory_space<vmem>>, vector<1x16x12xf32>
      %29 = vector.shape_cast %28 : vector<1x16x12xf32> to vector<16x12xf32>
      %30 = tpu.concatenate %13, %17, %21, %25, %29 in 0 : vector<16x12xf32>, vector<16x12xf32>, vector<16x12xf32>, vector<16x12xf32>, vector<16x12xf32> -> vector<80x12xf32>
      %c0_21 = arith.constant 0 : index
      %c0_22 = arith.constant 0 : index
      %c0_23 = arith.constant 0 : index
      %31 = vector.load %arg4[%c0_21, %c0_22, %c0_23] : memref<5x32x80xf32, #tpu.memory_space<vmem>>, vector<1x32x80xf32>
      %32 = vector.shape_cast %31 : vector<1x32x80xf32> to vector<32x80xf32>
      %33 = vector.extract_strided_slice %30 {offsets = [0, 0], sizes = [80, 8], strides = [1, 1]} : vector<80x12xf32> to vector<80x8xf32>
      %cst = arith.constant dense<0.000000e+00> : vector<32x8xf32>
      %34 = tpu.matmul %32, %33, %cst {dimension_numbers = #tpu.dot_dimension_numbers<[1], [0], [0], [1], [0, 0, 1, 1], [], []>} : vector<32x80xf32>, vector<80x8xf32>, vector<32x8xf32> -> vector<32x8xf32>
      %35 = arith.addf %6, %34 : vector<32x8xf32>
      %c1 = arith.constant 1 : index
      %c0_24 = arith.constant 0 : index
      %c0_25 = arith.constant 0 : index
      %36 = vector.load %arg4[%c1, %c0_24, %c0_25] : memref<5x32x80xf32, #tpu.memory_space<vmem>>, vector<1x32x80xf32>
      %37 = vector.shape_cast %36 : vector<1x32x80xf32> to vector<32x80xf32>
      %38 = vector.extract_strided_slice %30 {offsets = [0, 1], sizes = [80, 8], strides = [1, 1]} : vector<80x12xf32> to vector<80x8xf32>
      %cst_26 = arith.constant dense<0.000000e+00> : vector<32x8xf32>
      %39 = tpu.matmul %37, %38, %cst_26 {dimension_numbers = #tpu.dot_dimension_numbers<[1], [0], [0], [1], [0, 0, 1, 1], [], []>} : vector<32x80xf32>, vector<80x8xf32>, vector<32x8xf32> -> vector<32x8xf32>
      %40 = arith.addf %35, %39 : vector<32x8xf32>
      %c2 = arith.constant 2 : index
      %c0_27 = arith.constant 0 : index
      %c0_28 = arith.constant 0 : index
      %41 = vector.load %arg4[%c2, %c0_27, %c0_28] : memref<5x32x80xf32, #tpu.memory_space<vmem>>, vector<1x32x80xf32>
      %42 = vector.shape_cast %41 : vector<1x32x80xf32> to vector<32x80xf32>
      %43 = vector.extract_strided_slice %30 {offsets = [0, 2], sizes = [80, 8], strides = [1, 1]} : vector<80x12xf32> to vector<80x8xf32>
      %cst_29 = arith.constant dense<0.000000e+00> : vector<32x8xf32>
      %44 = tpu.matmul %42, %43, %cst_29 {dimension_numbers = #tpu.dot_dimension_numbers<[1], [0], [0], [1], [0, 0, 1, 1], [], []>} : vector<32x80xf32>, vector<80x8xf32>, vector<32x8xf32> -> vector<32x8xf32>
      %45 = arith.addf %40, %44 : vector<32x8xf32>
      %c3 = arith.constant 3 : index
      %c0_30 = arith.constant 0 : index
      %c0_31 = arith.constant 0 : index
      %46 = vector.load %arg4[%c3, %c0_30, %c0_31] : memref<5x32x80xf32, #tpu.memory_space<vmem>>, vector<1x32x80xf32>
      %47 = vector.shape_cast %46 : vector<1x32x80xf32> to vector<32x80xf32>
      %48 = vector.extract_strided_slice %30 {offsets = [0, 3], sizes = [80, 8], strides = [1, 1]} : vector<80x12xf32> to vector<80x8xf32>
      %cst_32 = arith.constant dense<0.000000e+00> : vector<32x8xf32>
      %49 = tpu.matmul %47, %48, %cst_32 {dimension_numbers = #tpu.dot_dimension_numbers<[1], [0], [0], [1], [0, 0, 1, 1], [], []>} : vector<32x80xf32>, vector<80x8xf32>, vector<32x8xf32> -> vector<32x8xf32>
      %50 = arith.addf %45, %49 : vector<32x8xf32>
      %c4 = arith.constant 4 : index
      %c0_33 = arith.constant 0 : index
      %c0_34 = arith.constant 0 : index
      %51 = vector.load %arg4[%c4, %c0_33, %c0_34] : memref<5x32x80xf32, #tpu.memory_space<vmem>>, vector<1x32x80xf32>
      %52 = vector.shape_cast %51 : vector<1x32x80xf32> to vector<32x80xf32>
      %53 = vector.extract_strided_slice %30 {offsets = [0, 4], sizes = [80, 8], strides = [1, 1]} : vector<80x12xf32> to vector<80x8xf32>
      %cst_35 = arith.constant dense<0.000000e+00> : vector<32x8xf32>
      %54 = tpu.matmul %52, %53, %cst_35 {dimension_numbers = #tpu.dot_dimension_numbers<[1], [0], [0], [1], [0, 0, 1, 1], [], []>} : vector<32x80xf32>, vector<80x8xf32>, vector<32x8xf32> -> vector<32x8xf32>
      %55 = arith.addf %50, %54 : vector<32x8xf32>
      %cst_36 = arith.constant 0.000000e+00 : f32
      %56 = vector.broadcast %cst_36 : f32 to vector<32x8xf32>
      %57 = arith.maximumf %55, %56 : vector<32x8xf32>
      %c0_37 = arith.constant 0 : index
      %58 = arith.index_cast %9 : i32 to index
      %c0_38 = arith.constant 0 : index
      %c0_39 = arith.constant 0 : index
      %59 = vector.load %arg6[%c0_37, %58, %c0_38, %c0_39] : memref<1x8x32x8xf32, #tpu.memory_space<vmem>>, vector<1x1x32x8xf32>
      %60 = vector.shape_cast %59 : vector<1x1x32x8xf32> to vector<32x8xf32>
      %61 = vector.shape_cast %57 : vector<32x8xf32> to vector<1x1x32x8xf32>
      tpu.vector_store %arg6[%c0_37, %58, %c0_38, %c0_39], %61 {strides = array<i32>} : memref<1x8x32x8xf32, #tpu.memory_space<vmem>>, vector<1x1x32x8xf32>,
    }
    %c8_i32_6 = arith.constant 8 : i32
    return
  }
  func.func @transform_0(%arg0: i32) -> (i32, i32, i32, i32) {
    %c0_i32 = arith.constant 0 : i32
    %c0_i32_0 = arith.constant 0 : i32
    %c0_i32_1 = arith.constant 0 : i32
    %c0_i32_2 = arith.constant 0 : i32
    return %arg0, %c0_i32, %c0_i32_0, %c0_i32_1 : i32, i32, i32, i32
  }
  func.func @transform_1(%arg0: i32) -> (i32, i32, i32) {
    %c0_i32 = arith.constant 0 : i32
    %c0_i32_0 = arith.constant 0 : i32
    %c0_i32_1 = arith.constant 0 : i32
    %c0_i32_2 = arith.constant 0 : i32
    return %c0_i32, %c0_i32_0, %c0_i32_1 : i32, i32, i32
  }
  func.func @transform_2(%arg0: i32) -> (i32, i32) {
    %c0_i32 = arith.constant 0 : i32
    %c0_i32_0 = arith.constant 0 : i32
    %c0_i32_1 = arith.constant 0 : i32
    return %c0_i32, %c0_i32_0 : i32, i32
  }
  func.func @transform_3(%arg0: i32) -> (i32, i32, i32) {
    %c0_i32 = arith.constant 0 : i32
    %c0_i32_0 = arith.constant 0 : i32
    %c0_i32_1 = arith.constant 0 : i32
    %c0_i32_2 = arith.constant 0 : i32
    return %c0_i32, %c0_i32_0, %c0_i32_1 : i32, i32, i32
  }
  func.func @transform_4(%arg0: i32) -> (i32, i32) {
    %c0_i32 = arith.constant 0 : i32
    %c0_i32_0 = arith.constant 0 : i32
    %c0_i32_1 = arith.constant 0 : i32
    return %c0_i32, %c0_i32_0 : i32, i32
  }
  func.func @transform_5(%arg0: i32) -> (i32, i32, i32, i32) {
    %c0_i32 = arith.constant 0 : i32
    %c0_i32_0 = arith.constant 0 : i32
    %c0_i32_1 = arith.constant 0 : i32
    %c0_i32_2 = arith.constant 0 : i32
    return %arg0, %c0_i32, %c0_i32_0, %c0_i32_1 : i32, i32, i32, i32
  }
}

module attributes {stable_mosaic.version = 11 : i64} {
  func.func @latent_head_kernel(%arg0: memref<2x32xf32, #tpu.memory_space<vmem>>, %arg1: memref<32x16xf32, #tpu.memory_space<vmem>>, %arg2: memref<1x16xf32, #tpu.memory_space<vmem>>, %arg3: memref<2x8xf32, #tpu.memory_space<vmem>>, %arg4: memref<8x32xf32, #tpu.memory_space<vmem>>, %arg5: memref<1x32xf32, #tpu.memory_space<vmem>>, %arg6: memref<2x8xf32, #tpu.memory_space<vmem>>, %arg7: memref<2x8xf32, #tpu.memory_space<vmem>>, %arg8: memref<2x8xf32, #tpu.memory_space<vmem>>, %arg9: memref<2x32xf32, #tpu.memory_space<vmem>>) attributes {dimension_semantics = [], scalar_prefetch = 0 : i64, scratch_operands = 0 : i64, tpu.core_type = #tpu.core_type<tc>} {
    %c0 = arith.constant 0 : index
    %c0_0 = arith.constant 0 : index
    %0 = vector.load %arg0[%c0, %c0_0] : memref<2x32xf32, #tpu.memory_space<vmem>>, vector<2x32xf32>
    %c0_1 = arith.constant 0 : index
    %c0_2 = arith.constant 0 : index
    %1 = vector.load %arg1[%c0_1, %c0_2] : memref<32x16xf32, #tpu.memory_space<vmem>>, vector<32x16xf32>
    %cst = arith.constant dense<0.000000e+00> : vector<2x16xf32>
    %2 = tpu.matmul %0, %1, %cst {dimension_numbers = #tpu.dot_dimension_numbers<[1], [0], [0], [1], [0, 0, 1, 1], [], []>} : vector<2x32xf32>, vector<32x16xf32>, vector<2x16xf32> -> vector<2x16xf32>
    %c0_3 = arith.constant 0 : index
    %c0_4 = arith.constant 0 : index
    %3 = vector.load %arg2[%c0_3, %c0_4] : memref<1x16xf32, #tpu.memory_space<vmem>>, vector<1x16xf32>
    %4 = vector.broadcast %3 : vector<1x16xf32> to vector<2x16xf32>
    %5 = arith.addf %2, %4 : vector<2x16xf32>
    %6 = vector.extract_strided_slice %5 {offsets = [0, 0], sizes = [2, 8], strides = [1, 1]} : vector<2x16xf32> to vector<2x8xf32>
    %7 = vector.extract_strided_slice %5 {offsets = [0, 8], sizes = [2, 8], strides = [1, 1]} : vector<2x16xf32> to vector<2x8xf32>
    %cst_5 = arith.constant 5.000000e-01 : f32
    %8 = vector.broadcast %cst_5 : f32 to vector<2x8xf32>
    %9 = arith.mulf %8, %7 : vector<2x8xf32>
    %10 = math.exp %9 : vector<2x8xf32>
    %c0_6 = arith.constant 0 : index
    %c0_7 = arith.constant 0 : index
    %11 = vector.load %arg3[%c0_6, %c0_7] : memref<2x8xf32, #tpu.memory_space<vmem>>, vector<2x8xf32>
    %12 = arith.mulf %10, %11 : vector<2x8xf32>
    %13 = arith.addf %6, %12 : vector<2x8xf32>
    %c0_8 = arith.constant 0 : index
    %c0_9 = arith.constant 0 : index
    %14 = vector.load %arg6[%c0_8, %c0_9] : memref<2x8xf32, #tpu.memory_space<vmem>>, vector<2x8xf32>
    tpu.vector_store %arg6[%c0_8, %c0_9], %6 {strides = array<i32>} : memref<2x8xf32, #tpu.memory_space<vmem>>, vector<2x8xf32>,
    %c0_10 = arith.constant 0 : index
    %c0_11 = arith.constant 0 : index
    %15 = vector.load %arg7[%c0_10, %c0_11] : memref<2x8xf32, #tpu.memory_space<vmem>>, vector<2x8xf32>
    tpu.vector_store %arg7[%c0_10, %c0_11], %7 {strides = array<i32>} : memref<2x8xf32, #tpu.memory_space<vmem>>, vector<2x8xf32>,
    %c0_12 = arith.constant 0 : index
    %c0_13 = arith.constant 0 : index
    %16 = vector.load %arg8[%c0_12, %c0_13] : memref<2x8xf32, #tpu.memory_space<vmem>>, vector<2x8xf32>
    tpu.vector_store %arg8[%c0_12, %c0_13], %13 {strides = array<i32>} : memref<2x8xf32, #tpu.memory_space<vmem>>, vector<2x8xf32>,
    %c0_14 = arith.constant 0 : index
    %c0_15 = arith.constant 0 : index
    %17 = vector.load %arg4[%c0_14, %c0_15] : memref<8x32xf32, #tpu.memory_space<vmem>>, vector<8x32xf32>
    %cst_16 = arith.constant dense<0.000000e+00> : vector<2x32xf32>
    %18 = tpu.matmul %13, %17, %cst_16 {dimension_numbers = #tpu.dot_dimension_numbers<[1], [0], [0], [1], [0, 0, 1, 1], [], []>} : vector<2x8xf32>, vector<8x32xf32>, vector<2x32xf32> -> vector<2x32xf32>
    %c0_17 = arith.constant 0 : index
    %c0_18 = arith.constant 0 : index
    %19 = vector.load %arg5[%c0_17, %c0_18] : memref<1x32xf32, #tpu.memory_space<vmem>>, vector<1x32xf32>
    %20 = vector.broadcast %19 : vector<1x32xf32> to vector<2x32xf32>
    %21 = arith.addf %18, %20 : vector<2x32xf32>
    %cst_19 = arith.constant 0.000000e+00 : f32
    %22 = vector.broadcast %cst_19 : f32 to vector<2x32xf32>
    %23 = arith.cmpf ogt, %21, %22 : vector<2x32xf32>
    %cst_20 = arith.constant 2.000000e-01 : f32
    %24 = vector.broadcast %cst_20 : f32 to vector<2x32xf32>
    %25 = arith.mulf %24, %21 : vector<2x32xf32>
    %26 = arith.select %23, %21, %25 : vector<2x32xi1>, vector<2x32xf32>
    %c0_21 = arith.constant 0 : index
    %c0_22 = arith.constant 0 : index
    %27 = vector.load %arg9[%c0_21, %c0_22] : memref<2x32xf32, #tpu.memory_space<vmem>>, vector<2x32xf32>
    tpu.vector_store %arg9[%c0_21, %c0_22], %26 {strides = array<i32>} : memref<2x32xf32, #tpu.memory_space<vmem>>, vector<2x32xf32>,
    return
  }
}

module attributes {stable_mosaic.version = 11 : i64} {
  func.func @linear_simple_kernel(%arg0: i32, %arg1: memref<2x32xf32, #tpu.memory_space<vmem>>, %arg2: memref<32x2048xbf16, #tpu.memory_space<vmem>>, %arg3: memref<1x2048xf32, #tpu.memory_space<vmem>>, %arg4: memref<2x2048xf32, #tpu.memory_space<vmem>>) attributes {dimension_semantics = [#tpu.dimension_semantics<parallel>], iteration_bounds = array<i64: 1>, scalar_prefetch = 0 : i64, scratch_operands = 0 : i64, tpu.core_type = #tpu.core_type<tc>, window_params = [{pipeline_mode = #tpu.pipeline_mode<synchronous>, transform_indices = @transform_0, window_bounds = array<i64: 2, 32>}, {transform_indices = @transform_1, window_bounds = array<i64: 32, 2048>}, {transform_indices = @transform_2, window_bounds = array<i64: 1, 2048>}, {transform_indices = @transform_3, window_bounds = array<i64: 2, 2048>}]} {
    %c0 = arith.constant 0 : index
    %c0_0 = arith.constant 0 : index
    %0 = vector.load %arg1[%c0, %c0_0] : memref<2x32xf32, #tpu.memory_space<vmem>>, vector<2x32xf32>
    %1 = arith.truncf %0 : vector<2x32xf32> to vector<2x32xbf16>
    %c0_1 = arith.constant 0 : index
    %c0_2 = arith.constant 0 : index
    %2 = vector.load %arg2[%c0_1, %c0_2] : memref<32x2048xbf16, #tpu.memory_space<vmem>>, vector<32x2048xbf16>
    %cst = arith.constant dense<0.000000e+00> : vector<2x2048xf32>
    %3 = tpu.matmul %1, %2, %cst {dimension_numbers = #tpu.dot_dimension_numbers<[1], [0], [0], [1], [0, 0, 1, 1], [], []>} : vector<2x32xbf16>, vector<32x2048xbf16>, vector<2x2048xf32> -> vector<2x2048xf32>
    %c0_3 = arith.constant 0 : index
    %c0_4 = arith.constant 0 : index
    %4 = vector.load %arg3[%c0_3, %c0_4] : memref<1x2048xf32, #tpu.memory_space<vmem>>, vector<1x2048xf32>
    %5 = vector.broadcast %4 : vector<1x2048xf32> to vector<2x2048xf32>
    %6 = arith.addf %3, %5 : vector<2x2048xf32>
    %cst_5 = arith.constant 0.000000e+00 : f32
    %7 = vector.broadcast %cst_5 : f32 to vector<2x2048xf32>
    %8 = arith.cmpf ogt, %6, %7 : vector<2x2048xf32>
    %cst_6 = arith.constant 2.000000e-01 : f32
    %9 = vector.broadcast %cst_6 : f32 to vector<2x2048xf32>
    %10 = arith.mulf %9, %6 : vector<2x2048xf32>
    %11 = arith.select %8, %6, %10 : vector<2x2048xi1>, vector<2x2048xf32>
    %c0_7 = arith.constant 0 : index
    %c0_8 = arith.constant 0 : index
    %12 = vector.load %arg4[%c0_7, %c0_8] : memref<2x2048xf32, #tpu.memory_space<vmem>>, vector<2x2048xf32>
    tpu.vector_store %arg4[%c0_7, %c0_8], %11 {strides = array<i32>} : memref<2x2048xf32, #tpu.memory_space<vmem>>, vector<2x2048xf32>,
    return
  }
  func.func @transform_0(%arg0: i32) -> (i32, i32) {
    %c0_i32 = arith.constant 0 : i32
    %c0_i32_0 = arith.constant 0 : i32
    %c0_i32_1 = arith.constant 0 : i32
    return %c0_i32, %c0_i32_0 : i32, i32
  }
  func.func @transform_1(%arg0: i32) -> (i32, i32) {
    %c0_i32 = arith.constant 0 : i32
    %c0_i32_0 = arith.constant 0 : i32
    return %c0_i32, %arg0 : i32, i32
  }
  func.func @transform_2(%arg0: i32) -> (i32, i32) {
    %c0_i32 = arith.constant 0 : i32
    %c0_i32_0 = arith.constant 0 : i32
    return %c0_i32, %arg0 : i32, i32
  }
  func.func @transform_3(%arg0: i32) -> (i32, i32) {
    %c0_i32 = arith.constant 0 : i32
    %c0_i32_0 = arith.constant 0 : i32
    return %c0_i32, %arg0 : i32, i32
  }
}

module attributes {stable_mosaic.version = 11 : i64} {
  func.func @conv_pair_kernel(%arg0: i32, %arg1: memref<1x8x32x8xf32, #tpu.memory_space<vmem>>, %arg2: memref<5x16x160xf32, #tpu.memory_space<vmem>>, %arg3: memref<16x1xf32, #tpu.memory_space<vmem>>, %arg4: memref<5x8x80xf32, #tpu.memory_space<vmem>>, %arg5: memref<8x1xf32, #tpu.memory_space<vmem>>, %arg6: memref<1x16x8x16xf32, #tpu.memory_space<vmem>>, %arg7: memref<16x32x16xf32, #tpu.memory_space<vmem>>, %arg8: memref<12x16x12xf32, #tpu.memory_space<vmem>>, %arg9: memref<20x16x20xf32, #tpu.memory_space<vmem>>) attributes {dimension_semantics = [#tpu.dimension_semantics<arbitrary>], iteration_bounds = array<i64: 2>, scalar_prefetch = 0 : i64, scratch_operands = 3 : i64, tpu.core_type = #tpu.core_type<tc>, window_params = [{transform_indices = @transform_0, window_bounds = array<i64: 1, 8, 32, 8>}, {pipeline_mode = #tpu.pipeline_mode<synchronous>, transform_indices = @transform_1, window_bounds = array<i64: 5, 16, 160>}, {pipeline_mode = #tpu.pipeline_mode<synchronous>, transform_indices = @transform_2, window_bounds = array<i64: 16, 1>}, {pipeline_mode = #tpu.pipeline_mode<synchronous>, transform_indices = @transform_3, window_bounds = array<i64: 5, 8, 80>}, {pipeline_mode = #tpu.pipeline_mode<synchronous>, transform_indices = @transform_4, window_bounds = array<i64: 8, 1>}, {transform_indices = @transform_5, window_bounds = array<i64: 1, 16, 8, 16>}]} {
    %c0_i32 = arith.constant 0 : i32
    %0 = arith.cmpi eq, %arg0, %c0_i32 : i32
    %1 = arith.extui %0 : i1 to i32
    %c0_i32_0 = arith.constant 0 : i32
    %2 = arith.cmpi ne, %1, %c0_i32_0 : i32
    scf.if %2 {
      %cst = arith.constant 0.000000e+00 : f32
      %16 = vector.broadcast %cst : f32 to vector<16x32x16xf32>
      %c0_21 = arith.constant 0 : index
      %c0_22 = arith.constant 0 : index
      %c0_23 = arith.constant 0 : index
      %17 = vector.load %arg7[%c0_21, %c0_22, %c0_23] : memref<16x32x16xf32, #tpu.memory_space<vmem>>, vector<16x32x16xf32>
      tpu.vector_store %arg7[%c0_21, %c0_22, %c0_23], %16 {strides = array<i32>} : memref<16x32x16xf32, #tpu.memory_space<vmem>>, vector<16x32x16xf32>,
      %cst_24 = arith.constant 0.000000e+00 : f32
      %18 = vector.broadcast %cst_24 : f32 to vector<20x16x20xf32>
      %c0_25 = arith.constant 0 : index
      %c0_26 = arith.constant 0 : index
      %c0_27 = arith.constant 0 : index
      %19 = vector.load %arg9[%c0_25, %c0_26, %c0_27] : memref<20x16x20xf32, #tpu.memory_space<vmem>>, vector<20x16x20xf32>
      tpu.vector_store %arg9[%c0_25, %c0_26, %c0_27], %18 {strides = array<i32>} : memref<20x16x20xf32, #tpu.memory_space<vmem>>, vector<20x16x20xf32>,
    } else {
    }
    %c0 = arith.constant 0 : index
    %c0_1 = arith.constant 0 : index
    %c0_2 = arith.constant 0 : index
    %c0_3 = arith.constant 0 : index
    %3 = vector.load %arg1[%c0, %c0_1, %c0_2, %c0_3] : memref<1x8x32x8xf32, #tpu.memory_space<vmem>>, vector<1x8x32x8xf32>
    %4 = vector.shape_cast %3 : vector<1x8x32x8xf32> to vector<8x32x8xf32>
    %c4 = arith.constant 4 : index
    %c0_4 = arith.constant 0 : index
    %c4_5 = arith.constant 4 : index
    %5 = vector.load %arg7[%c4, %c0_4, %c4_5] : memref<16x32x16xf32, #tpu.memory_space<vmem>>, vector<8x32x8xf32>
    tpu.vector_store %arg7[%c4, %c0_4, %c4_5], %4 {strides = array<i32>} : memref<16x32x16xf32, #tpu.memory_space<vmem>>, vector<8x32x8xf32>,
    %c0_6 = arith.constant 0 : index
    %c0_7 = arith.constant 0 : index
    %6 = vector.load %arg3[%c0_6, %c0_7] : memref<16x1xf32, #tpu.memory_space<vmem>>, vector<16x1xf32>
    %7 = vector.shape_cast %6 : vector<16x1xf32> to vector<16x1xf32>
    %8 = vector.broadcast %7 : vector<16x1xf32> to vector<16x12xf32>
    %c0_i32_8 = arith.constant 0 : i32
    %c12_i32 = arith.constant 12 : i32
    %9 = arith.addi %c0_i32_8, %c12_i32 : i32
    %c1_i32 = arith.constant 1 : i32
    scf.for %arg10 = %c0_i32_8 to %9 step %c1_i32  : i32 {
      %c1_i32_21 = arith.constant 1 : i32
      %16 = arith.muli %arg10, %c1_i32_21 : i32
      %c0_i32_22 = arith.constant 0 : i32
      %17 = arith.addi %c0_i32_22, %16 : i32
      %c0_i32_23 = arith.constant 0 : i32
      %18 = arith.addi %17, %c0_i32_23 : i32
      %19 = arith.index_cast %18 : i32 to index
      %c0_24 = arith.constant 0 : index
      %c0_25 = arith.constant 0 : index
      %20 = vector.load %arg7[%19, %c0_24, %c0_25] : memref<16x32x16xf32, #tpu.memory_space<vmem>>, vector<1x32x16xf32>
      %21 = vector.shape_cast %20 : vector<1x32x16xf32> to vector<32x16xf32>
      %c1_i32_26 = arith.constant 1 : i32
      %22 = arith.addi %17, %c1_i32_26 : i32
      %23 = arith.index_cast %22 : i32 to index
      %c0_27 = arith.constant 0 : index
      %c0_28 = arith.constant 0 : index
      %24 = vector.load %arg7[%23, %c0_27, %c0_28] : memref<16x32x16xf32, #tpu.memory_space<vmem>>, vector<1x32x16xf32>
      %25 = vector.shape_cast %24 : vector<1x32x16xf32> to vector<32x16xf32>
      %c2_i32 = arith.constant 2 : i32
      %26 = arith.addi %17, %c2_i32 : i32
      %27 = arith.index_cast %26 : i32 to index
      %c0_29 = arith.constant 0 : index
      %c0_30 = arith.constant 0 : index
      %28 = vector.load %arg7[%27, %c0_29, %c0_30] : memref<16x32x16xf32, #tpu.memory_space<vmem>>, vector<1x32x16xf32>
      %29 = vector.shape_cast %28 : vector<1x32x16xf32> to vector<32x16xf32>
      %c3_i32 = arith.constant 3 : i32
      %30 = arith.addi %17, %c3_i32 : i32
      %31 = arith.index_cast %30 : i32 to index
      %c0_31 = arith.constant 0 : index
      %c0_32 = arith.constant 0 : index
      %32 = vector.load %arg7[%31, %c0_31, %c0_32] : memref<16x32x16xf32, #tpu.memory_space<vmem>>, vector<1x32x16xf32>
      %33 = vector.shape_cast %32 : vector<1x32x16xf32> to vector<32x16xf32>
      %c4_i32 = arith.constant 4 : i32
      %34 = arith.addi %17, %c4_i32 : i32
      %35 = arith.index_cast %34 : i32 to index
      %c0_33 = arith.constant 0 : index
      %c0_34 = arith.constant 0 : index
      %36 = vector.load %arg7[%35, %c0_33, %c0_34] : memref<16x32x16xf32, #tpu.memory_space<vmem>>, vector<1x32x16xf32>
      %37 = vector.shape_cast %36 : vector<1x32x16xf32> to vector<32x16xf32>
      %38 = tpu.concatenate %21, %25, %29, %33, %37 in 0 : vector<32x16xf32>, vector<32x16xf32>, vector<32x16xf32>, vector<32x16xf32>, vector<32x16xf32> -> vector<160x16xf32>
      %c0_35 = arith.constant 0 : index
      %c0_36 = arith.constant 0 : index
      %c0_37 = arith.constant 0 : index
      %39 = vector.load %arg2[%c0_35, %c0_36, %c0_37] : memref<5x16x160xf32, #tpu.memory_space<vmem>>, vector<1x16x160xf32>
      %40 = vector.shape_cast %39 : vector<1x16x160xf32> to vector<16x160xf32>
      %41 = vector.extract_strided_slice %38 {offsets = [0, 0], sizes = [160, 12], strides = [1, 1]} : vector<160x16xf32> to vector<160x12xf32>
      %cst = arith.constant dense<0.000000e+00> : vector<16x12xf32>
      %42 = tpu.matmul %40, %41, %cst {dimension_numbers = #tpu.dot_dimension_numbers<[1], [0], [0], [1], [0, 0, 1, 1], [], []>} : vector<16x160xf32>, vector<160x12xf32>, vector<16x12xf32> -> vector<16x12xf32>
      %43 = arith.addf %8, %42 : vector<16x12xf32>
      %c1 = arith.constant 1 : index
      %c0_38 = arith.constant 0 : index
      %c0_39 = arith.constant 0 : index
      %44 = vector.load %arg2[%c1, %c0_38, %c0_39] : memref<5x16x160xf32, #tpu.memory_space<vmem>>, vector<1x16x160xf32>
      %45 = vector.shape_cast %44 : vector<1x16x160xf32> to vector<16x160xf32>
      %46 = vector.extract_strided_slice %38 {offsets = [0, 1], sizes = [160, 12], strides = [1, 1]} : vector<160x16xf32> to vector<160x12xf32>
      %cst_40 = arith.constant dense<0.000000e+00> : vector<16x12xf32>
      %47 = tpu.matmul %45, %46, %cst_40 {dimension_numbers = #tpu.dot_dimension_numbers<[1], [0], [0], [1], [0, 0, 1, 1], [], []>} : vector<16x160xf32>, vector<160x12xf32>, vector<16x12xf32> -> vector<16x12xf32>
      %48 = arith.addf %43, %47 : vector<16x12xf32>
      %c2 = arith.constant 2 : index
      %c0_41 = arith.constant 0 : index
      %c0_42 = arith.constant 0 : index
      %49 = vector.load %arg2[%c2, %c0_41, %c0_42] : memref<5x16x160xf32, #tpu.memory_space<vmem>>, vector<1x16x160xf32>
      %50 = vector.shape_cast %49 : vector<1x16x160xf32> to vector<16x160xf32>
      %51 = vector.extract_strided_slice %38 {offsets = [0, 2], sizes = [160, 12], strides = [1, 1]} : vector<160x16xf32> to vector<160x12xf32>
      %cst_43 = arith.constant dense<0.000000e+00> : vector<16x12xf32>
      %52 = tpu.matmul %50, %51, %cst_43 {dimension_numbers = #tpu.dot_dimension_numbers<[1], [0], [0], [1], [0, 0, 1, 1], [], []>} : vector<16x160xf32>, vector<160x12xf32>, vector<16x12xf32> -> vector<16x12xf32>
      %53 = arith.addf %48, %52 : vector<16x12xf32>
      %c3 = arith.constant 3 : index
      %c0_44 = arith.constant 0 : index
      %c0_45 = arith.constant 0 : index
      %54 = vector.load %arg2[%c3, %c0_44, %c0_45] : memref<5x16x160xf32, #tpu.memory_space<vmem>>, vector<1x16x160xf32>
      %55 = vector.shape_cast %54 : vector<1x16x160xf32> to vector<16x160xf32>
      %56 = vector.extract_strided_slice %38 {offsets = [0, 3], sizes = [160, 12], strides = [1, 1]} : vector<160x16xf32> to vector<160x12xf32>
      %cst_46 = arith.constant dense<0.000000e+00> : vector<16x12xf32>
      %57 = tpu.matmul %55, %56, %cst_46 {dimension_numbers = #tpu.dot_dimension_numbers<[1], [0], [0], [1], [0, 0, 1, 1], [], []>} : vector<16x160xf32>, vector<160x12xf32>, vector<16x12xf32> -> vector<16x12xf32>
      %58 = arith.addf %53, %57 : vector<16x12xf32>
      %c4_47 = arith.constant 4 : index
      %c0_48 = arith.constant 0 : index
      %c0_49 = arith.constant 0 : index
      %59 = vector.load %arg2[%c4_47, %c0_48, %c0_49] : memref<5x16x160xf32, #tpu.memory_space<vmem>>, vector<1x16x160xf32>
      %60 = vector.shape_cast %59 : vector<1x16x160xf32> to vector<16x160xf32>
      %61 = vector.extract_strided_slice %38 {offsets = [0, 4], sizes = [160, 12], strides = [1, 1]} : vector<160x16xf32> to vector<160x12xf32>
      %cst_50 = arith.constant dense<0.000000e+00> : vector<16x12xf32>
      %62 = tpu.matmul %60, %61, %cst_50 {dimension_numbers = #tpu.dot_dimension_numbers<[1], [0], [0], [1], [0, 0, 1, 1], [], []>} : vector<16x160xf32>, vector<160x12xf32>, vector<16x12xf32> -> vector<16x12xf32>
      %63 = arith.addf %58, %62 : vector<16x12xf32>
      %cst_51 = arith.constant 0.000000e+00 : f32
      %64 = vector.broadcast %cst_51 : f32 to vector<16x12xf32>
      %65 = arith.maximumf %63, %64 : vector<16x12xf32>
      %66 = arith.index_cast %17 : i32 to index
      %c0_52 = arith.constant 0 : index
      %c0_53 = arith.constant 0 : index
      %67 = vector.load %arg8[%66, %c0_52, %c0_53] : memref<12x16x12xf32, #tpu.memory_space<vmem>>, vector<1x16x12xf32>
      %68 = vector.shape_cast %67 : vector<1x16x12xf32> to vector<16x12xf32>
      %69 = vector.shape_cast %65 : vector<16x12xf32> to vector<1x16x12xf32>
      tpu.vector_store %arg8[%66, %c0_52, %c0_53], %69 {strides = array<i32>} : memref<12x16x12xf32, #tpu.memory_space<vmem>>, vector<1x16x12xf32>,
    }
    %c12_i32_9 = arith.constant 12 : i32
    %c0_10 = arith.constant 0 : index
    %c0_11 = arith.constant 0 : index
    %c0_12 = arith.constant 0 : index
    %10 = vector.load %arg8[%c0_10, %c0_11, %c0_12] : memref<12x16x12xf32, #tpu.memory_space<vmem>>, vector<12x16x12xf32>
    %c4_13 = arith.constant 4 : index
    %c0_14 = arith.constant 0 : index
    %c4_15 = arith.constant 4 : index
    %11 = vector.load %arg9[%c4_13, %c0_14, %c4_15] : memref<20x16x20xf32, #tpu.memory_space<vmem>>, vector<12x16x12xf32>
    tpu.vector_store %arg9[%c4_13, %c0_14, %c4_15], %10 {strides = array<i32>} : memref<20x16x20xf32, #tpu.memory_space<vmem>>, vector<12x16x12xf32>,
    %c0_16 = arith.constant 0 : index
    %c0_17 = arith.constant 0 : index
    %12 = vector.load %arg5[%c0_16, %c0_17] : memref<8x1xf32, #tpu.memory_space<vmem>>, vector<8x1xf32>
    %13 = vector.shape_cast %12 : vector<8x1xf32> to vector<8x1xf32>
    %14 = vector.broadcast %13 : vector<8x1xf32> to vector<8x16xf32>
    %c0_i32_18 = arith.constant 0 : i32
    %c16_i32 = arith.constant 16 : i32
    %15 = arith.addi %c0_i32_18, %c16_i32 : i32
    %c1_i32_19 = arith.constant 1 : i32
    scf.for %arg10 = %c0_i32_18 to %15 step %c1_i32_19  : i32 {
      %c1_i32_21 = arith.constant 1 : i32
      %16 = arith.muli %arg10, %c1_i32_21 : i32
      %c0_i32_22 = arith.constant 0 : i32
      %17 = arith.addi %c0_i32_22, %16 : i32
      %c0_i32_23 = arith.constant 0 : i32
      %18 = arith.addi %17, %c0_i32_23 : i32
      %19 = arith.index_cast %18 : i32 to index
      %c0_24 = arith.constant 0 : index
      %c0_25 = arith.constant 0 : index
      %20 = vector.load %arg9[%19, %c0_24, %c0_25] : memref<20x16x20xf32, #tpu.memory_space<vmem>>, vector<1x16x20xf32>
      %21 = vector.shape_cast %20 : vector<1x16x20xf32> to vector<16x20xf32>
      %c1_i32_26 = arith.constant 1 : i32
      %22 = arith.addi %17, %c1_i32_26 : i32
      %23 = arith.index_cast %22 : i32 to index
      %c0_27 = arith.constant 0 : index
      %c0_28 = arith.constant 0 : index
      %24 = vector.load %arg9[%23, %c0_27, %c0_28] : memref<20x16x20xf32, #tpu.memory_space<vmem>>, vector<1x16x20xf32>
      %25 = vector.shape_cast %24 : vector<1x16x20xf32> to vector<16x20xf32>
      %c2_i32 = arith.constant 2 : i32
      %26 = arith.addi %17, %c2_i32 : i32
      %27 = arith.index_cast %26 : i32 to index
      %c0_29 = arith.constant 0 : index
      %c0_30 = arith.constant 0 : index
      %28 = vector.load %arg9[%27, %c0_29, %c0_30] : memref<20x16x20xf32, #tpu.memory_space<vmem>>, vector<1x16x20xf32>
      %29 = vector.shape_cast %28 : vector<1x16x20xf32> to vector<16x20xf32>
      %c3_i32 = arith.constant 3 : i32
      %30 = arith.addi %17, %c3_i32 : i32
      %31 = arith.index_cast %30 : i32 to index
      %c0_31 = arith.constant 0 : index
      %c0_32 = arith.constant 0 : index
      %32 = vector.load %arg9[%31, %c0_31, %c0_32] : memref<20x16x20xf32, #tpu.memory_space<vmem>>, vector<1x16x20xf32>
      %33 = vector.shape_cast %32 : vector<1x16x20xf32> to vector<16x20xf32>
      %c4_i32 = arith.constant 4 : i32
      %34 = arith.addi %17, %c4_i32 : i32
      %35 = arith.index_cast %34 : i32 to index
      %c0_33 = arith.constant 0 : index
      %c0_34 = arith.constant 0 : index
      %36 = vector.load %arg9[%35, %c0_33, %c0_34] : memref<20x16x20xf32, #tpu.memory_space<vmem>>, vector<1x16x20xf32>
      %37 = vector.shape_cast %36 : vector<1x16x20xf32> to vector<16x20xf32>
      %38 = tpu.concatenate %21, %25, %29, %33, %37 in 0 : vector<16x20xf32>, vector<16x20xf32>, vector<16x20xf32>, vector<16x20xf32>, vector<16x20xf32> -> vector<80x20xf32>
      %c0_35 = arith.constant 0 : index
      %c0_36 = arith.constant 0 : index
      %c0_37 = arith.constant 0 : index
      %39 = vector.load %arg4[%c0_35, %c0_36, %c0_37] : memref<5x8x80xf32, #tpu.memory_space<vmem>>, vector<1x8x80xf32>
      %40 = vector.shape_cast %39 : vector<1x8x80xf32> to vector<8x80xf32>
      %41 = vector.extract_strided_slice %38 {offsets = [0, 0], sizes = [80, 16], strides = [1, 1]} : vector<80x20xf32> to vector<80x16xf32>
      %cst = arith.constant dense<0.000000e+00> : vector<8x16xf32>
      %42 = tpu.matmul %40, %41, %cst {dimension_numbers = #tpu.dot_dimension_numbers<[1], [0], [0], [1], [0, 0, 1, 1], [], []>} : vector<8x80xf32>, vector<80x16xf32>, vector<8x16xf32> -> vector<8x16xf32>
      %43 = arith.addf %14, %42 : vector<8x16xf32>
      %c1 = arith.constant 1 : index
      %c0_38 = arith.constant 0 : index
      %c0_39 = arith.constant 0 : index
      %44 = vector.load %arg4[%c1, %c0_38, %c0_39] : memref<5x8x80xf32, #tpu.memory_space<vmem>>, vector<1x8x80xf32>
      %45 = vector.shape_cast %44 : vector<1x8x80xf32> to vector<8x80xf32>
      %46 = vector.extract_strided_slice %38 {offsets = [0, 1], sizes = [80, 16], strides = [1, 1]} : vector<80x20xf32> to vector<80x16xf32>
      %cst_40 = arith.constant dense<0.000000e+00> : vector<8x16xf32>
      %47 = tpu.matmul %45, %46, %cst_40 {dimension_numbers = #tpu.dot_dimension_numbers<[1], [0], [0], [1], [0, 0, 1, 1], [], []>} : vector<8x80xf32>, vector<80x16xf32>, vector<8x16xf32> -> vector<8x16xf32>
      %48 = arith.addf %43, %47 : vector<8x16xf32>
      %c2 = arith.constant 2 : index
      %c0_41 = arith.constant 0 : index
      %c0_42 = arith.constant 0 : index
      %49 = vector.load %arg4[%c2, %c0_41, %c0_42] : memref<5x8x80xf32, #tpu.memory_space<vmem>>, vector<1x8x80xf32>
      %50 = vector.shape_cast %49 : vector<1x8x80xf32> to vector<8x80xf32>
      %51 = vector.extract_strided_slice %38 {offsets = [0, 2], sizes = [80, 16], strides = [1, 1]} : vector<80x20xf32> to vector<80x16xf32>
      %cst_43 = arith.constant dense<0.000000e+00> : vector<8x16xf32>
      %52 = tpu.matmul %50, %51, %cst_43 {dimension_numbers = #tpu.dot_dimension_numbers<[1], [0], [0], [1], [0, 0, 1, 1], [], []>} : vector<8x80xf32>, vector<80x16xf32>, vector<8x16xf32> -> vector<8x16xf32>
      %53 = arith.addf %48, %52 : vector<8x16xf32>
      %c3 = arith.constant 3 : index
      %c0_44 = arith.constant 0 : index
      %c0_45 = arith.constant 0 : index
      %54 = vector.load %arg4[%c3, %c0_44, %c0_45] : memref<5x8x80xf32, #tpu.memory_space<vmem>>, vector<1x8x80xf32>
      %55 = vector.shape_cast %54 : vector<1x8x80xf32> to vector<8x80xf32>
      %56 = vector.extract_strided_slice %38 {offsets = [0, 3], sizes = [80, 16], strides = [1, 1]} : vector<80x20xf32> to vector<80x16xf32>
      %cst_46 = arith.constant dense<0.000000e+00> : vector<8x16xf32>
      %57 = tpu.matmul %55, %56, %cst_46 {dimension_numbers = #tpu.dot_dimension_numbers<[1], [0], [0], [1], [0, 0, 1, 1], [], []>} : vector<8x80xf32>, vector<80x16xf32>, vector<8x16xf32> -> vector<8x16xf32>
      %58 = arith.addf %53, %57 : vector<8x16xf32>
      %c4_47 = arith.constant 4 : index
      %c0_48 = arith.constant 0 : index
      %c0_49 = arith.constant 0 : index
      %59 = vector.load %arg4[%c4_47, %c0_48, %c0_49] : memref<5x8x80xf32, #tpu.memory_space<vmem>>, vector<1x8x80xf32>
      %60 = vector.shape_cast %59 : vector<1x8x80xf32> to vector<8x80xf32>
      %61 = vector.extract_strided_slice %38 {offsets = [0, 4], sizes = [80, 16], strides = [1, 1]} : vector<80x20xf32> to vector<80x16xf32>
      %cst_50 = arith.constant dense<0.000000e+00> : vector<8x16xf32>
      %62 = tpu.matmul %60, %61, %cst_50 {dimension_numbers = #tpu.dot_dimension_numbers<[1], [0], [0], [1], [0, 0, 1, 1], [], []>} : vector<8x80xf32>, vector<80x16xf32>, vector<8x16xf32> -> vector<8x16xf32>
      %63 = arith.addf %58, %62 : vector<8x16xf32>
      %64 = math.tanh %63 : vector<8x16xf32>
      %c0_51 = arith.constant 0 : index
      %65 = arith.index_cast %17 : i32 to index
      %c0_52 = arith.constant 0 : index
      %c0_53 = arith.constant 0 : index
      %66 = vector.load %arg6[%c0_51, %65, %c0_52, %c0_53] : memref<1x16x8x16xf32, #tpu.memory_space<vmem>>, vector<1x1x8x16xf32>
      %67 = vector.shape_cast %66 : vector<1x1x8x16xf32> to vector<8x16xf32>
      %68 = vector.shape_cast %64 : vector<8x16xf32> to vector<1x1x8x16xf32>
      tpu.vector_store %arg6[%c0_51, %65, %c0_52, %c0_53], %68 {strides = array<i32>} : memref<1x16x8x16xf32, #tpu.memory_space<vmem>>, vector<1x1x8x16xf32>,
    }
    %c16_i32_20 = arith.constant 16 : i32
    return
  }
  func.func @transform_0(%arg0: i32) -> (i32, i32, i32, i32) {
    %c0_i32 = arith.constant 0 : i32
    %c0_i32_0 = arith.constant 0 : i32
    %c0_i32_1 = arith.constant 0 : i32
    %c0_i32_2 = arith.constant 0 : i32
    return %arg0, %c0_i32, %c0_i32_0, %c0_i32_1 : i32, i32, i32, i32
  }
  func.func @transform_1(%arg0: i32) -> (i32, i32, i32) {
    %c0_i32 = arith.constant 0 : i32
    %c0_i32_0 = arith.constant 0 : i32
    %c0_i32_1 = arith.constant 0 : i32
    %c0_i32_2 = arith.constant 0 : i32
    return %c0_i32, %c0_i32_0, %c0_i32_1 : i32, i32, i32
  }
  func.func @transform_2(%arg0: i32) -> (i32, i32) {
    %c0_i32 = arith.constant 0 : i32
    %c0_i32_0 = arith.constant 0 : i32
    %c0_i32_1 = arith.constant 0 : i32
    return %c0_i32, %c0_i32_0 : i32, i32
  }
  func.func @transform_3(%arg0: i32) -> (i32, i32, i32) {
    %c0_i32 = arith.constant 0 : i32
    %c0_i32_0 = arith.constant 0 : i32
    %c0_i32_1 = arith.constant 0 : i32
    %c0_i32_2 = arith.constant 0 : i32
    return %c0_i32, %c0_i32_0, %c0_i32_1 : i32, i32, i32
  }
  func.func @transform_4(%arg0: i32) -> (i32, i32) {
    %c0_i32 = arith.constant 0 : i32
    %c0_i32_0 = arith.constant 0 : i32
    %c0_i32_1 = arith.constant 0 : i32
    return %c0_i32, %c0_i32_0 : i32, i32
  }
  func.func @transform_5(%arg0: i32) -> (i32, i32, i32, i32) {
    %c0_i32 = arith.constant 0 : i32
    %c0_i32_0 = arith.constant 0 : i32
    %c0_i32_1 = arith.constant 0 : i32
    %c0_i32_2 = arith.constant 0 : i32
    return %arg0, %c0_i32, %c0_i32_0, %c0_i32_1 : i32, i32, i32, i32
  }
}

</mosaic_0001>

<bundles_post_ra>
// kernel: vae_forward.5
= control target key start
LH: loop header
LB: loop body
LE: loop exit
PB: predicated region body
PF: predicated region fallthrough
CT: control target
= control target key end

     0   :  { %s2396_s18 = smov 0   ;;  %s2598_s0 = inlined_call_operand.vmem [shape: f32[2,16,8,16], index: 0, kind: input, shape index: {}]   ;;  %s2599_s1 = inlined_call_operand.vmem [shape: f32[5,16,40], index: 1, kind: input, shape index: {}]   ;;  %s2600_s2 = inlined_call_operand.vmem [shape: f32[16,1], index: 2, kind: input, shape index: {}]   ;;  %s2601_s3 = inlined_call_operand.vmem [shape: f32[5,32,80], index: 3, kind: input, shape index: {}]   ;;  %s2602_s4 = inlined_call_operand.vmem [shape: f32[32,1], index: 4, kind: input, shape index: {}]   ;;  %s2603_s5 = inlined_call_operand.vmem [shape: f32[2,8,32,8], index: 5, kind: output, shape index: {}]  }
   0x1 LB: > { %s1586_s19 = sadd.s32 4294967295, %s2347_s18   ;;  %p1590_p0 = scmp.ge.s32.totalorder %s2347_s18, 1  ;;  %s2347_s18 = sphi %s2396_s18, %s15_s18  }
   0x2   : > { %p187_p1 = scmp.lt.s32.totalorder %s2347_s18, 3 }
   0x4   : > { %p188_p2 = pnand %p1590_p0, %p187_p1 }
   0x5   : > { %v225_v0 = vld [vmem:[%s2600_s2] sm:$0xff] (!%p188_p2)  ;;  %p215_p3 = scmp.lt.s32.totalorder (!%p188_p2), %s1586_s19, 1  ;;  %v2357_v1 = vmov (!%p188_p2), 0   ;;  %v226_v2 = vld [vmem:[%s2600_s2 + $0x8] sm:$0xff] (!%p188_p2)  ;;  %s2425_s7 = smov (!%p188_p2), 0  }
   0x6   : > { %191 = sbr.rel (%p188_p2) target bundleno = 1030 (0x406), region = 40  ;;  %2190 = vset.pattern.permute.xlu0 (!%p188_p2), %v2357_v1 }
   0x7   : > { %229 = vperm.xlu0 (!%p188_p2), %2190, %v225_v0  }
   0xb   : > { %234 = vperm.xlu0 (!%p188_p2), %2190, %v226_v2  }
   0xd   : > { %s2605_s19 = smov (!%p215_p3, %s1586_s19), 1 }
   0xe   : > { %s1675_s24 = sshll.u32 %s2605_s19, 7  ;;  %s1676_s25 = sshll.u32 %s2605_s19, 8 }
   0xf   : > { %s2414_s28 = scalar_lea.vmem %s2598_s0, %s1675_s24  ;;  %s2419_s6 = scalar_lea.vmem %s2603_s5, %s1676_s25 }
  0x86   : > { %v2421_v3 = vpop.permute.xlu0 %229 }
  0x8a   : > { %v2423_v4 = vpop.permute.xlu0 %234 }
  0x8b LB: >> { %s1595_s8 = sshll.u32 %s2351_s7, 3  ;;  %s2358_s10 = smov 126   ;;  %vm264_vm0 = vcmask 326656   ;;  %v1610_v14 = vld [vmem:[%s2599_s1 + $0x20] sm:$0xff]  ;;  %v263_v16 = vld [vmem:[%s2599_s1 + $0x8] sm:$0xff]  ;;  %v1606_v17 = vld [vmem:[%s2599_s1 + $0x10] sm:$0xff]  ;;  %s2351_s7 = sphi %s2425_s7, %s242_s7  }
  0x8c   : >> { %s244_s9 = scalar_lea.vmem %s2414_s28, %s1595_s8  ;;  %1818 = vmatprep.mubr.msk.f32.mxu0 %vm264_vm0, %v1610_v14  ;;  %s2359_s13 = smov 125   ;;  %v262_v15 = vld [vmem:[%s2599_s1] sm:$0xff]  ;;  %v1611_v40 = vld [vmem:[%s2599_s1 + $0x28] sm:$0xff]  ;;  %v1614_v42 = vld [vmem:[%s2599_s1 + $0x30] sm:$0xff]  ;;  %vm761_vm1 = vcmask 97280  }
  0x8d   : >> { %v245_v5 = vld [vmem:[%s244_s9] sm:$0xff]  ;;  %v1597_v6 = vld [vmem:[%s244_s9 + $0x8] sm:$0xff]  ;;  %v1599_v9 = vld [vmem:[%s244_s9 + $0x10] sm:$0xff]  ;;  %1792 = vmatprep.mubr.msk.f32.mxu1 %vm264_vm0, %v262_v15  ;;  %s2360_s16 = smov 127   ;;  %s2361_s20 = smov 124  }
  0x8e   : >> { %v1603_v7 = vld [vmem:[%s244_s9 + $0x20] sm:$0xff]  ;;  %v2191_v8 = vpack.i.bf16 %v1597_v6, %v245_v5  ;;  %v1601_v10 = vld [vmem:[%s244_s9 + $0x18] sm:$0xff]  ;;  %v1977_v12 = vpack.c.bf16 %v1597_v6, %v245_v5  ;;  %v1619_v59 = vld [vmem:[%s2599_s1 + $0x48] sm:$0xff] }
  0x8f   : >> { %465 = vrot.lane.b32.xlu1 %v1603_v7, %s2358_s10  ;;  %v2196_v11 = vpack.i.bf16 %v1601_v10, %v1599_v9  ;;  %v1981_v13 = vpack.c.bf16 %v1601_v10, %v1599_v9  ;;  %v1615_v54 = vld [vmem:[%s2599_s1 + $0x38] sm:$0xff]  ;;  %v1618_v57 = vld [vmem:[%s2599_s1 + $0x40] sm:$0xff] }
  0x90   : >> { %2192 = vrot.lane.b32.xlu0 %v2191_v8, %s2358_s10  ;;  %1978 = vmatprep.subr.bf16.mxu1 %v1977_v12  ;;  %v1607_v56 = vld [vmem:[%s2599_s1 + $0x18] sm:$0xff] }
  0x91   : >> { %1980 = vmatpush3.bf16.msra.mxu1 %v1977_v12 }
  0x92   : >> { %1982 = vmatprep.subr.bf16.mxu1 %v1981_v13 }
  0x93   : >> { %2202 = vrot.lane.b32.xlu1 %v2191_v8, %s2359_s13 }
  0x94   : >> { %2197 = vrot.lane.b32.xlu0 %v2196_v11, %s2358_s10 }
  0x95   : >> { %1984 = vmatpush3.bf16.msra.mxu1 %v1981_v13 }
  0x96   : >> { %1790 = vmatprep.subr.mxu1 %v1603_v7 }
  0x97   : >> { %2212 = vrot.lane.b32.xlu1 %v2191_v8, %s2360_s16 }
  0x98   : >> { %2207 = vrot.lane.b32.xlu0 %v2196_v11, %s2359_s13 }
  0x99   : >> { %1791 = vmatpush3.msra.mxu1 %v1603_v7 }
  0x9a   : >> { %1793 = vmatmul.mubr.msk.f32.vlgmr.msra.gmra.mrb[0].mxu1 %vm264_vm0, %v263_v16 }
  0x9b   : >> { %2217 = vrot.lane.b32.xlu1 %v2191_v8, %s2361_s20  ;;  %1805 = vmatprep.mubr.msk.f32.mxu1 %vm264_vm0, %v1606_v17 }
  0x9c   : >> { %566 = vrot.lane.b32.xlu0 %v1603_v7, %s2359_s13  ;;  %s1622_s13 = sshll.u32 %s2351_s7, 4  ;;  %s242_s7 = sadd.s32 1, %s2351_s7  }
  0x9d   : >> { %s760_s14 = scalar_lea.vmem [#allocation2], %s1622_s13  ;;  %p239_p4 = scmp.ge.s32.totalorder %s242_s7, 12  }
  0x9e   : > { %2232 = vset.pattern.permute.xlu1 (%p239_p4), %v2357_v1  ;;  %2231 = vset.pattern.permute.xlu0 (%p239_p4), %v2357_v1  ;;  %v766_v9 = vld [vmem:[%s2602_s4 + $0x10] sm:$0xff] (%p239_p4)  ;;  %v764_v10 = vld [vmem:[%s2602_s4] sm:$0xff] (%p239_p4)  ;;  %s2500_s28 = smov (%p239_p4), 0  }
  0x9f   : >> { %2227 = vrot.lane.b32.xlu1 %v2196_v11, %s2361_s20 }
  0xa0   : >> { %2222 = vrot.lane.b32.xlu0 %v2196_v11, %s2360_s16  ;;  %v767_v11 = vld [vmem:[%s2602_s4 + $0x18] sm:$0xff] (%p239_p4) }
  0xa3   : >> { %667 = vrot.lane.b32.xlu1 %v1603_v7, %s2361_s20 }
  0xa4   : >> { %364 = vrot.lane.b32.xlu0 %v1603_v7, %s2360_s16 }
  0xa7   : > { %780 = vperm.xlu1 (%p239_p4), %2232, %v766_v9  }
  0xa8   : > { %770 = vperm.xlu0 (%p239_p4), %2231, %v764_v10  }
  0xab   : > { %785 = vperm.xlu1 (%p239_p4), %2232, %v767_v11  }
 0x101   : >> { %v466_v18 = vpop.permute.xlu1 %465 }
 0x102   : >> { %v2193_v19 = vpop.permute.xlu0 %2192 }
 0x103   : >> { %v2195_v20 = vunpack.i.h.bf16 %v2193_v19  ;;  %v2194_v21 = vunpack.i.l.bf16 %v2193_v19 }
 0x105   : >> { %v2203_v22 = vpop.permute.xlu1 %2202  ;;  %v1993_v23 = vpack.c.bf16 %v2195_v20, %v2194_v21 }
 0x106   : >> { %v2198_v24 = vpop.permute.xlu0 %2197  ;;  %v2205_v27 = vunpack.i.h.bf16 %v2203_v22  ;;  %v2204_v30 = vunpack.i.l.bf16 %v2203_v22 }
 0x107   : >> { %v2200_v25 = vunpack.i.h.bf16 %v2198_v24  ;;  %v2199_v26 = vunpack.i.l.bf16 %v2198_v24  ;;  %1994 = vmatprep.subr.bf16.mxu0 %v1993_v23 }
 0x108   : >> { %1996 = vmatpush3.bf16.msra.mxu0 %v1993_v23  ;;  %v2001_v38 = vpack.c.bf16 %v2205_v27, %v2204_v30 }
 0x109   : >> { %v2213_v28 = vpop.permute.xlu1 %2212  ;;  %v1997_v29 = vpack.c.bf16 %v2200_v25, %v2199_v26 }
 0x10a   : >> { %v2215_v31 = vunpack.i.h.bf16 %v2213_v28  ;;  %v2214_v32 = vunpack.i.l.bf16 %v2213_v28  ;;  %v2208_v33 = vpop.permute.xlu0 %2207 }
 0x10b   : >> { %v2210_v34 = vunpack.i.h.bf16 %v2208_v33  ;;  %v2209_v35 = vunpack.i.l.bf16 %v2208_v33  ;;  %1998 = vmatprep.subr.bf16.mxu0 %v1997_v29 }
 0x10c   : >> { %v1985_v36 = vpack.c.bf16 %v2215_v31, %v2214_v32  ;;  %2000 = vmatpush3.bf16.msra.mxu0 %v1997_v29 }
 0x10d   : >> { %v2218_v37 = vpop.permute.xlu1 %2217  ;;  %1816 = vmatprep.subr.mxu0 %v466_v18  ;;  %v2005_v41 = vpack.c.bf16 %v2210_v34, %v2209_v35 }
 0x10e   : >> { %1986 = vmatprep.subr.bf16.mxu1 %v1985_v36  ;;  %v567_v39 = vpop.permute.xlu0 %566  ;;  %v2220_v47 = vunpack.i.h.bf16 %v2218_v37  ;;  %v2219_v48 = vunpack.i.l.bf16 %v2218_v37 }
 0x10f   : >> { %1988 = vmatpush3.bf16.msra.mxu1 %v1985_v36 }
 0x110   : >> { %1817 = vmatpush3.msra.mxu0 %v466_v18  ;;  %v2009_v53 = vpack.c.bf16 %v2220_v47, %v2219_v48 }
 0x111   : >> { %2002 = vmatprep.subr.bf16.mxu0 %v2001_v38  ;;  %1819 = vmatmul.mubr.msk.f32.vlgmr.msra.gmra.mrb[0].mxu0 %vm264_vm0, %v1611_v40  ;;  %v2228_v44 = vpop.permute.xlu1 %2227 }
 0x112   : >> { %v2223_v43 = vpop.permute.xlu0 %2222  ;;  %2004 = vmatpush3.bf16.msra.mxu0 %v2001_v38  ;;  %1831 = vmatprep.mubr.msk.f32.mxu0 %vm264_vm0, %v1614_v42  ;;  %v2230_v50 = vunpack.i.h.bf16 %v2228_v44  ;;  %v2229_v51 = vunpack.i.l.bf16 %v2228_v44 }
 0x113   : >> { %v2225_v45 = vunpack.i.h.bf16 %v2223_v43  ;;  %v2224_v46 = vunpack.i.l.bf16 %v2223_v43  ;;  %2006 = vmatprep.subr.bf16.mxu0 %v2005_v41 }
 0x114   : >> { %v2013_v55 = vpack.c.bf16 %v2230_v50, %v2229_v51 }
 0x115   : >> { %v1989_v49 = vpack.c.bf16 %v2225_v45, %v2224_v46  ;;  %v668_v58 = vpop.permute.xlu1 %667 }
 0x116   : >> { %2008 = vmatpush3.bf16.msra.mxu0 %v2005_v41  ;;  %v365_v52 = vpop.permute.xlu0 %364 }
 0x117   : >> { %1990 = vmatprep.subr.bf16.mxu1 %v1989_v49  ;;  %1829 = vmatprep.subr.mxu0 %v567_v39 }
 0x118   : >> { %1992 = vmatpush3.bf16.msra.mxu1 %v1989_v49 }
 0x119   : >> { %1803 = vmatprep.subr.mxu1 %v365_v52 }
 0x11a   : >> { %1830 = vmatpush3.msra.mxu0 %v567_v39 }
 0x11b   : >> { %2010 = vmatprep.subr.bf16.mxu0 %v2009_v53  ;;  %1832 = vmatmul.mubr.msk.f32.vlgmr.msra.gmra.mrb[0].mxu0 %vm264_vm0, %v1615_v54 }
 0x11c   : >> { %1804 = vmatpush3.msra.mxu1 %v365_v52  ;;  %2012 = vmatpush3.bf16.msra.mxu0 %v2009_v53 }
 0x11d   : >> { %1806 = vmatmul.mubr.msk.f32.vlgmr.msra.gmra.mrb[0].mxu1 %vm264_vm0, %v1607_v56  ;;  %2014 = vmatprep.subr.bf16.mxu0 %v2013_v55 }
 0x11e   : >> { %1844 = vmatprep.mubr.msk.f32.mxu0 %vm264_vm0, %v1618_v57 }
 0x120   : >> { %2016 = vmatpush3.bf16.msra.mxu0 %v2013_v55 }
 0x121   : >> { %1842 = vmatprep.subr.mxu0 %v668_v58 }
 0x124   : >> { %1843 = vmatpush3.msra.mxu0 %v668_v58 }
 0x125   : >> { %1845 = vmatmul.mubr.msk.f32.vlgmr.msra.gmra.mrb[0].mxu0 %vm264_vm0, %v1619_v59 }
 0x126   : > { %v2492_v1 = vpop.permute.xlu1 (%p239_p4), %780 }
 0x12a   : > { %v2496_v12 = vpop.permute.xlu1 (%p239_p4), %785 }
 0x1f0   : >> { %v1807_v60 = vpop.f32.mrb[0].mxu1 }
 0x1f1   : >> { %v443_v61 = vpop.f32.mrb[1].mxu1  ;;  %v2117_v62 = vadd.f32 %v1807_v60, %v2423_v4  ;;  %v2494_v4 = vpop.permute.xlu0 (%p239_p4), %770 }
 0x1f2   : >> { %v2119_v63 = vadd.f32 %v443_v61, %v2421_v3  ;;  %v765_v3 = vld [vmem:[%s2602_s4 + $0x8] sm:$0xff] (%p239_p4) }
 0x1f3   : > { %775 = vperm.xlu0 (%p239_p4), %2231, %v765_v3  }
 0x1f8   : >> { %v1846_v0 = vpop.f32.mrb[0].mxu0  ;;  %241 = sbr.rel (!%p239_p4) target bundleno = 139 (0x8b), region = 104 }
 0x1f9   : >> { %v2118_v2 = vadd.f32 %v2117_v62, %v1846_v0  ;;  %v746_v5 = vpop.f32.mrb[1].mxu0 }
 0x1fa   : >> { %v2120_v6 = vadd.f32 %v2119_v63, %v746_v5 }
 0x1fb   : >> { %v758_v7 = vmax.f32 %v2118_v2, 0.0 }
 0x1fc   : >> { %v757_v8 = vmax.f32 %v2120_v6, 0.0 }
 0x1fd   : >> { %763 = vst.msk [vmem:[%s760_s14 + $0x8] sm:$0xff] %vm761_vm1, %v758_v7 }
 0x1fe   : >> { %762 = vst.msk [vmem:[%s760_s14] sm:$0xff] %vm761_vm1, %v757_v8 }
 0x272   : > { %v2498_v13 = vpop.permute.xlu0 %775 }
 0x273 LB: >> { %s1623_s23 = sshll.u32 %s2355_s28, 4  ;;  %s2362_s25 = smov 126   ;;  %v818_v30 = vld [vmem:[%s2601_s3] sm:$0xff]  ;;  %vm822_vm2 = vcmask 654336   ;;  %v819_v36 = vld [vmem:[%s2601_s3 + $0x8] sm:$0xff]  ;;  %v820_v37 = vld [vmem:[%s2601_s3 + $0x10] sm:$0xff]  ;;  %s2355_s28 = sphi %s2500_s28, %s793_s28  }
 0x274   : >> { %s795_s24 = scalar_lea.vmem [#allocation2], %s1623_s23  ;;  %1867 = vmatprep.mubr.msk.f32.mxu1 %vm822_vm2, %v818_v30  ;;  %s2363_s29 = smov 127   ;;  %v1648_v34 = vld [vmem:[%s2601_s3 + $0x40] sm:$0xff]  ;;  %v821_v38 = vld [vmem:[%s2601_s3 + $0x18] sm:$0xff]  ;;  %vm1484_vm3 = vcmask 64512  }
 0x275   : >> { %v1628_v14 = vld [vmem:[%s795_s24 + $0x20] sm:$0xff]  ;;  %v1629_v15 = vld [vmem:[%s795_s24 + $0x28] sm:$0xff]  ;;  %v1631_v19 = vld [vmem:[%s795_s24 + $0x30] sm:$0xff]  ;;  %1919 = vmatprep.mubr.msk.f32.mxu0 %vm822_vm2, %v1648_v34  ;;  %s2364_s9 = smov 125   ;;  %s2365_s19 = smov 124  }
 0x276   : >> { %v796_v16 = vld [vmem:[%s795_s24] sm:$0xff]  ;;  %v2243_v17 = vpack.i.bf16 %v1629_v15, %v1628_v14  ;;  %v797_v18 = vld [vmem:[%s795_s24 + $0x8] sm:$0xff]  ;;  %v1632_v20 = vld [vmem:[%s795_s24 + $0x38] sm:$0xff]  ;;  %v2025_v32 = vpack.c.bf16 %v1629_v15, %v1628_v14 }
 0x277   : >> { %v2233_v21 = vpack.i.bf16 %v797_v18, %v796_v16  ;;  %v1625_v22 = vld [vmem:[%s795_s24 + $0x10] sm:$0xff]  ;;  %v1626_v23 = vld [vmem:[%s795_s24 + $0x18] sm:$0xff]  ;;  %v2248_v24 = vpack.i.bf16 %v1632_v20, %v1631_v19  ;;  %v1634_v26 = vld [vmem:[%s795_s24 + $0x40] sm:$0xff]  ;;  %v2017_v28 = vpack.c.bf16 %v797_v18, %v796_v16  ;;  %v2029_v33 = vpack.c.bf16 %v1632_v20, %v1631_v19 }
 0x278   : >> { %2244 = vrot.lane.b32.xlu1 %v2243_v17, %s2362_s25  ;;  %v2238_v25 = vpack.i.bf16 %v1626_v23, %v1625_v22  ;;  %v1635_v27 = vld [vmem:[%s795_s24 + $0x48] sm:$0xff]  ;;  %v2021_v29 = vpack.c.bf16 %v1626_v23, %v1625_v22  ;;  %v1640_v39 = vld [vmem:[%s2601_s3 + $0x20] sm:$0xff]  ;;  %v1651_v34 = vld [vmem:[%s2601_s3 + $0x58] sm:$0xff] }
 0x279   : >> { %2234 = vrot.lane.b32.xlu0 %v2233_v21, %s2362_s25  ;;  %v2253_v31 = vpack.i.bf16 %v1635_v27, %v1634_v26  ;;  %2018 = vmatprep.subr.bf16.mxu1 %v2017_v28  ;;  %v2033_v35 = vpack.c.bf16 %v1635_v27, %v1634_v26 }
 0x27a   : >> { %2020 = vmatpush3.bf16.msra.mxu1 %v2017_v28 }
 0x27b   : >> { %2022 = vmatprep.subr.bf16.mxu1 %v2021_v29 }
 0x27c   : >> { %2249 = vrot.lane.b32.xlu1 %v2248_v24, %s2362_s25 }
 0x27d   : >> { %2239 = vrot.lane.b32.xlu0 %v2238_v25, %s2362_s25 }
 0x27e   : >> { %2024 = vmatpush3.bf16.msra.mxu1 %v2021_v29  ;;  %v1650_v29 = vld [vmem:[%s2601_s3 + $0x50] sm:$0xff] }
 0x27f   : >> { %2026 = vmatprep.subr.bf16.mxu1 %v2025_v32 }
 0x280   : >> { %2259 = vrot.lane.b32.xlu1 %v2233_v21, %s2363_s29 }
 0x281   : >> { %2254 = vrot.lane.b32.xlu0 %v2253_v31, %s2362_s25  ;;  %s1672_s25 = sshll.u32 %s2355_s28, 5  ;;  %s793_s28 = sadd.s32 1, %s2355_s28  }
 0x282   : >> { %2028 = vmatpush3.bf16.msra.mxu1 %v2025_v32  ;;  %s1483_s26 = scalar_lea.vmem %s2419_s6, %s1672_s25  ;;  %p790_p5 = scmp.ge.s32.totalorder %s793_s28, 8  }
 0x283   : >> { %2030 = vmatprep.subr.bf16.mxu1 %v2029_v33 }
 0x284   : >> { %2269 = vrot.lane.b32.xlu1 %v2238_v25, %s2363_s29 }
 0x285   : >> { %2264 = vrot.lane.b32.xlu0 %v2233_v21, %s2364_s9 }
 0x286   : >> { %2032 = vmatpush3.bf16.msra.mxu1 %v2029_v33 }
 0x287   : >> { %2034 = vmatprep.subr.bf16.mxu1 %v2033_v35 }
 0x288   : >> { %2279 = vrot.lane.b32.xlu1 %v2243_v17, %s2363_s29 }
 0x289   : >> { %2274 = vrot.lane.b32.xlu0 %v2238_v25, %s2364_s9 }
 0x28a   : >> { %2036 = vmatpush3.bf16.msra.mxu1 %v2033_v35 }
 0x28c   : >> { %2289 = vrot.lane.b32.xlu1 %v2248_v24, %s2363_s29 }
 0x28d   : >> { %2284 = vrot.lane.b32.xlu0 %v2243_v17, %s2364_s9  ;;  %1868 = vmatmul.mubr.msk.f32.vlgmr.msra.gmra.mrb[0].mxu1 %vm822_vm2, %v819_v36 }
 0x28e   : >> { %1870 = vmatprep.mubr.msk.f32.mxu1 %vm822_vm2, %v820_v37 }
 0x290   : >> { %2299 = vrot.lane.b32.xlu1 %v2253_v31, %s2363_s29 }
 0x291   : >> { %2294 = vrot.lane.b32.xlu0 %v2248_v24, %s2364_s9  ;;  %1871 = vmatmul.mubr.msk.f32.gmra.mrb[2].mxu1 %vm822_vm2, %v821_v38 }
 0x292   : >> { %1893 = vmatprep.mubr.msk.f32.mxu1 %vm822_vm2, %v1640_v39  ;;  %v1656_v39 = vld [vmem:[%s2601_s3 + $0x60] sm:$0xff] }
 0x294   : >> { %2309 = vrot.lane.b32.xlu1 %v2233_v21, %s2365_s19 }
 0x295   : >> { %2304 = vrot.lane.b32.xlu0 %v2253_v31, %s2364_s9 }
 0x298   : >> { %2319 = vrot.lane.b32.xlu1 %v2243_v17, %s2365_s19 }
 0x299   : >> { %2314 = vrot.lane.b32.xlu0 %v2238_v25, %s2365_s19 }
 0x29c   : >> { %2329 = vrot.lane.b32.xlu1 %v2253_v31, %s2365_s19 }
 0x29d   : >> { %2324 = vrot.lane.b32.xlu0 %v2248_v24, %s2365_s19  ;;  %v1649_v24 = vld [vmem:[%s2601_s3 + $0x48] sm:$0xff] }
 0x2ea   : >> { %v2245_v40 = vpop.permute.xlu1 %2244 }
 0x2eb   : >> { %v2235_v41 = vpop.permute.xlu0 %2234  ;;  %v2247_v44 = vunpack.i.h.bf16 %v2245_v40  ;;  %v2246_v45 = vunpack.i.l.bf16 %v2245_v40 }
 0x2ec   : >> { %v2237_v42 = vunpack.i.h.bf16 %v2235_v41  ;;  %v2236_v43 = vunpack.i.l.bf16 %v2235_v41 }
 0x2ed   : >> { %v2065_v51 = vpack.c.bf16 %v2247_v44, %v2246_v45  ;;  %v1642_v45 = vld [vmem:[%s2601_s3 + $0x30] sm:$0xff] }
 0x2ee   : >> { %v2250_v46 = vpop.permute.xlu1 %2249  ;;  %v2057_v47 = vpack.c.bf16 %v2237_v42, %v2236_v43  ;;  %v1641_v43 = vld [vmem:[%s2601_s3 + $0x28] sm:$0xff] }
 0x2ef   : >> { %v2240_v48 = vpop.permute.xlu0 %2239  ;;  %v2252_v52 = vunpack.i.h.bf16 %v2250_v46  ;;  %v2251_v53 = vunpack.i.l.bf16 %v2250_v46 }
 0x2f0   : >> { %v2242_v49 = vunpack.i.h.bf16 %v2240_v48  ;;  %v2241_v50 = vunpack.i.l.bf16 %v2240_v48  ;;  %2058 = vmatprep.subr.bf16.mxu0 %v2057_v47 }
 0x2f1   : >> { %2060 = vmatpush3.bf16.msra.mxu0 %v2057_v47  ;;  %v2069_v60 = vpack.c.bf16 %v2252_v52, %v2251_v53 }
 0x2f2   : >> { %v2061_v54 = vpack.c.bf16 %v2242_v49, %v2241_v50  ;;  %v2260_v55 = vpop.permute.xlu1 %2259 }
 0x2f3   : >> { %v2262_v56 = vunpack.i.h.bf16 %v2260_v55  ;;  %v2261_v57 = vunpack.i.l.bf16 %v2260_v55  ;;  %v2255_v58 = vpop.permute.xlu0 %2254  ;;  %v1643_v55 = vld [vmem:[%s2601_s3 + $0x38] sm:$0xff] }
 0x2f4   : >> { %2062 = vmatprep.subr.bf16.mxu0 %v2061_v54  ;;  %v2257_v61 = vunpack.i.h.bf16 %v2255_v58  ;;  %v2256_v62 = vunpack.i.l.bf16 %v2255_v58 }
 0x2f5   : >> { %v2037_v59 = vpack.c.bf16 %v2262_v56, %v2261_v57  ;;  %2064 = vmatpush3.bf16.msra.mxu0 %v2061_v54  ;;  %v1666_v56 = vld [vmem:[%s2601_s3 + $0x90] sm:$0xff] }
 0x2f6   : >> { %v2270_v63 = vpop.permute.xlu1 %2269  ;;  %2066 = vmatprep.subr.bf16.mxu0 %v2065_v51  ;;  %v2073_v7 = vpack.c.bf16 %v2257_v61, %v2256_v62 }
 0x2f7   : >> { %v2272_v0 = vunpack.i.h.bf16 %v2270_v63  ;;  %v2271_v2 = vunpack.i.l.bf16 %v2270_v63  ;;  %v2265_v5 = vpop.permute.xlu0 %2264  ;;  %2038 = vmatprep.subr.bf16.mxu1 %v2037_v59 }
 0x2f8   : >> { %2040 = vmatpush3.bf16.msra.mxu1 %v2037_v59  ;;  %v2267_v8 = vunpack.i.h.bf16 %v2265_v5  ;;  %v2266_v9 = vunpack.i.l.bf16 %v2265_v5 }
 0x2f9   : >> { %v2041_v6 = vpack.c.bf16 %v2272_v0, %v2271_v2  ;;  %2068 = vmatpush3.bf16.msra.mxu0 %v2065_v51 }
 0x2fa   : >> { %v2280_v10 = vpop.permute.xlu1 %2279  ;;  %2070 = vmatprep.subr.bf16.mxu0 %v2069_v60  ;;  %v2077_v16 = vpack.c.bf16 %v2267_v8, %v2266_v9  ;;  %v1658_v8 = vld [vmem:[%s2601_s3 + $0x70] sm:$0xff]  ;;  %v1659_v9 = vld [vmem:[%s2601_s3 + $0x78] sm:$0xff] }
 0x2fb   : >> { %v2282_v11 = vunpack.i.h.bf16 %v2280_v10  ;;  %v2281_v3 = vunpack.i.l.bf16 %v2280_v10  ;;  %v2275_v14 = vpop.permute.xlu0 %2274  ;;  %2042 = vmatprep.subr.bf16.mxu1 %v2041_v6  ;;  %v1664_v10 = vld [vmem:[%s2601_s3 + $0x80] sm:$0xff] }
 0x2fc   : >> { %2044 = vmatpush3.bf16.msra.mxu1 %v2041_v6  ;;  %v2277_v17 = vunpack.i.h.bf16 %v2275_v14  ;;  %v2276_v18 = vunpack.i.l.bf16 %v2275_v14  ;;  %v1657_v6 = vld [vmem:[%s2601_s3 + $0x68] sm:$0xff] }
 0x2fd   : >> { %v2045_v15 = vpack.c.bf16 %v2282_v11, %v2281_v3  ;;  %2072 = vmatpush3.bf16.msra.mxu0 %v2069_v60  ;;  %v1667_v11 = vld [vmem:[%s2601_s3 + $0x98] sm:$0xff]  ;;  %v1665_v3 = vld [vmem:[%s2601_s3 + $0x88] sm:$0xff] }
 0x2fe   : >> { %v2290_v19 = vpop.permute.xlu1 %2289  ;;  %2074 = vmatprep.subr.bf16.mxu0 %v2073_v7  ;;  %v2081_v25 = vpack.c.bf16 %v2277_v17, %v2276_v18 }
 0x2ff   : >> { %v2292_v20 = vunpack.i.h.bf16 %v2290_v19  ;;  %v2291_v21 = vunpack.i.l.bf16 %v2290_v19  ;;  %v2285_v22 = vpop.permute.xlu0 %2284  ;;  %2046 = vmatprep.subr.bf16.mxu1 %v2045_v15 }
 0x300   : >> { %2048 = vmatpush3.bf16.msra.mxu1 %v2045_v15  ;;  %v2287_v26 = vunpack.i.h.bf16 %v2285_v22  ;;  %v2286_v27 = vunpack.i.l.bf16 %v2285_v22 }
 0x301   : >> { %v2049_v23 = vpack.c.bf16 %v2292_v20, %v2291_v21  ;;  %2076 = vmatpush3.bf16.msra.mxu0 %v2073_v7 }
 0x302   : >> { %v2300_v28 = vpop.permute.xlu1 %2299  ;;  %2078 = vmatprep.subr.bf16.mxu0 %v2077_v16  ;;  %v2085_v35 = vpack.c.bf16 %v2287_v26, %v2286_v27 }
 0x303   : >> { %v2302_v30 = vunpack.i.h.bf16 %v2300_v28  ;;  %v2301_v31 = vunpack.i.l.bf16 %v2300_v28  ;;  %v2295_v32 = vpop.permute.xlu0 %2294  ;;  %2050 = vmatprep.subr.bf16.mxu1 %v2049_v23 }
 0x304   : >> { %2052 = vmatpush3.bf16.msra.mxu1 %v2049_v23  ;;  %1920 = vmatmul.mubr.msk.f32.vlgmr.msra.gmra.mrb[0].mxu0 %vm822_vm2, %v1649_v24  ;;  %v2297_v36 = vunpack.i.h.bf16 %v2295_v32  ;;  %v2296_v37 = vunpack.i.l.bf16 %v2295_v32 }
 0x305   : >> { %v2053_v33 = vpack.c.bf16 %v2302_v30, %v2301_v31  ;;  %2080 = vmatpush3.bf16.msra.mxu0 %v2077_v16  ;;  %1922 = vmatprep.mubr.msk.f32.mxu0 %vm822_vm2, %v1650_v29 }
 0x306   : >> { %v2310_v38 = vpop.permute.xlu1 %2309  ;;  %2082 = vmatprep.subr.bf16.mxu0 %v2081_v25  ;;  %v2089_v46 = vpack.c.bf16 %v2297_v36, %v2296_v37 }
 0x307   : >> { %v2312_v40 = vunpack.i.h.bf16 %v2310_v38  ;;  %v2311_v41 = vunpack.i.l.bf16 %v2310_v38  ;;  %v2305_v42 = vpop.permute.xlu0 %2304  ;;  %2054 = vmatprep.subr.bf16.mxu1 %v2053_v33 }
 0x308   : >> { %2056 = vmatpush3.bf16.msra.mxu1 %v2053_v33  ;;  %1923 = vmatmul.mubr.msk.f32.gmra.mrb[2].mxu0 %vm822_vm2, %v1651_v34  ;;  %v2307_v47 = vunpack.i.h.bf16 %v2305_v42  ;;  %v2306_v48 = vunpack.i.l.bf16 %v2305_v42 }
 0x309   : >> { %v2097_v44 = vpack.c.bf16 %v2312_v40, %v2311_v41  ;;  %2084 = vmatpush3.bf16.msra.mxu0 %v2081_v25  ;;  %1945 = vmatprep.mubr.msk.f32.mxu0 %vm822_vm2, %v1656_v39 }
 0x30a   : >> { %2086 = vmatprep.subr.bf16.mxu0 %v2085_v35  ;;  %v2320_v49 = vpop.permute.xlu1 %2319  ;;  %v2093_v57 = vpack.c.bf16 %v2307_v47, %v2306_v48 }
 0x30b   : >> { %v2315_v50 = vpop.permute.xlu0 %2314  ;;  %1894 = vmatmul.mubr.msk.f32.vlgmr.msra.gmra.mrb[0].mxu1 %vm822_vm2, %v1641_v43  ;;  %2127 = vmatprep.subr.bf16.mxu1 %v2097_v44  ;;  %v2322_v51 = vunpack.i.h.bf16 %v2320_v49  ;;  %v2321_v52 = vunpack.i.l.bf16 %v2320_v49 }
 0x30c   : >> { %v2317_v53 = vunpack.i.h.bf16 %v2315_v50  ;;  %v2316_v54 = vunpack.i.l.bf16 %v2315_v50  ;;  %2132 = vmatpush3.bf16.msra.mxu1 %v2097_v44  ;;  %1896 = vmatprep.mubr.msk.f32.mxu1 %vm822_vm2, %v1642_v45 }
 0x30d   : >> { %2088 = vmatpush3.bf16.msra.mxu0 %v2085_v35  ;;  %v2105_v59 = vpack.c.bf16 %v2322_v51, %v2321_v52 }
 0x30e   : >> { %v2101_v58 = vpack.c.bf16 %v2317_v53, %v2316_v54  ;;  %2090 = vmatprep.subr.bf16.mxu0 %v2089_v46  ;;  %v2330_v63 = vpop.permute.xlu1 %2329 }
 0x30f   : >> { %v2325_v60 = vpop.permute.xlu0 %2324  ;;  %1897 = vmatmul.mubr.msk.f32.gmra.mrb[2].mxu1 %vm822_vm2, %v1643_v55  ;;  %v2332_v2 = vunpack.i.h.bf16 %v2330_v63  ;;  %v2331_v5 = vunpack.i.l.bf16 %v2330_v63 }
 0x310   : >> { %2128 = vmatprep.subr.bf16.mxu1 %v2101_v58  ;;  %v2327_v61 = vunpack.i.h.bf16 %v2325_v60  ;;  %v2326_v62 = vunpack.i.l.bf16 %v2325_v60  ;;  %1974 = vmatprep.mubr.msk.f32.mxu1 %vm822_vm2, %v1666_v56 }
 0x311   : >> { %2092 = vmatpush3.bf16.msra.mxu0 %v2089_v46  ;;  %2133 = vmatpush3.bf16.msra.mxu1 %v2101_v58  ;;  %v2113_v7 = vpack.c.bf16 %v2332_v2, %v2331_v5 }
 0x312   : >> { %v2109_v0 = vpack.c.bf16 %v2327_v61, %v2326_v62  ;;  %2094 = vmatprep.subr.bf16.mxu0 %v2093_v57  ;;  %2129 = vmatprep.subr.bf16.mxu1 %v2105_v59 }
 0x315   : >> { %2096 = vmatpush3.bf16.msra.mxu0 %v2093_v57  ;;  %2134 = vmatpush3.bf16.msra.mxu1 %v2105_v59 }
 0x316   : >> { %2098 = vmatprep.subr.bf16.mxu0 %v2097_v44  ;;  %2130 = vmatprep.subr.bf16.mxu1 %v2109_v0 }
 0x318   : >> { %1946 = vmatmul.mubr.msk.f32.vlgmr.msra.gmra.mrb[0].mxu0 %vm822_vm2, %v1657_v6 }
 0x319   : >> { %2100 = vmatpush3.bf16.msra.mxu0 %v2097_v44  ;;  %2135 = vmatpush3.bf16.msra.mxu1 %v2109_v0 }
 0x31a   : >> { %1948 = vmatprep.mubr.msk.f32.mxu0 %vm822_vm2, %v1658_v8  ;;  %2102 = vmatprep.subr.bf16.mxu0 %v2101_v58 }
 0x31b   : >> { %2131 = vmatprep.subr.bf16.mxu1 %v2113_v7 }
 0x31c   : >> { %1949 = vmatmul.mubr.msk.f32.gmra.mrb[2].mxu0 %vm822_vm2, %v1659_v9 }
 0x31d   : >> { %2104 = vmatpush3.bf16.msra.mxu0 %v2101_v58  ;;  %2136 = vmatpush3.bf16.msra.mxu1 %v2113_v7 }
 0x31e   : >> { %2106 = vmatprep.subr.bf16.mxu0 %v2105_v59  ;;  %1971 = vmatprep.mubr.msk.f32.mxu0 %vm822_vm2, %v1664_v10 }
 0x320   : >> { %1975 = vmatmul.mubr.msk.f32.vlgmr.msra.gmra.mrb[4].mxu1 %vm822_vm2, %v1667_v11 }
 0x321   : >> { %2108 = vmatpush3.bf16.msra.mxu0 %v2105_v59 }
 0x322   : >> { %2110 = vmatprep.subr.bf16.mxu0 %v2109_v0 }
 0x325   : >> { %2112 = vmatpush3.bf16.msra.mxu0 %v2109_v0 }
 0x326   : >> { %2114 = vmatprep.subr.bf16.mxu0 %v2113_v7 }
 0x329   : >> { %2116 = vmatpush3.bf16.msra.mxu0 %v2113_v7 }
 0x32c   : >> { %1972 = vmatmul.mubr.msk.f32.vlgmr.msra.gmra.mrb[0].mxu0 %vm822_vm2, %v1665_v3 }
 0x3de   : >> { %v1895_v14 = vpop.f32.mrb[0].mxu1 }
 0x3df   : >> { %v1047_v15 = vpop.f32.mrb[1].mxu1  ;;  %v2137_v30 = vadd.f32 %v1895_v14, %v2498_v13 }
 0x3e0   : >> { %v2139_v31 = vadd.f32 %v1047_v15, %v2494_v4 }
 0x3e2   : >> { %v1898_v16 = vpop.f32.mrb[2].mxu1 }
 0x3e3   : >> { %v1057_v17 = vpop.f32.mrb[3].mxu1  ;;  %v2141_v18 = vadd.f32 %v1898_v16, %v2496_v12 }
 0x3e4   : >> { %v2144_v19 = vadd.f32 %v1057_v17, %v2492_v1 }
 0x3ef   : >> { %v1950_v20 = vpop.f32.mrb[2].mxu0 }
 0x3f0   : >> { %v2142_v21 = vadd.f32 %v2141_v18, %v1950_v20  ;;  %v1329_v22 = vpop.f32.mrb[3].mxu0 }
 0x3f1   : >> { %v2145_v23 = vadd.f32 %v2144_v19, %v1329_v22 }
 0x3f3   : >> { %v1976_v24 = vpop.f32.mrb[4].mxu1 }
 0x3f4   : >> { %v2143_v25 = vadd.f32 %v2142_v21, %v1976_v24  ;;  %v1465_v26 = vpop.f32.mrb[5].mxu1 }
 0x3f5   : >> { %v2146_v27 = vadd.f32 %v2145_v23, %v1465_v26 }
 0x3f6   : >> { %v1481_v28 = vmax.f32 %v2143_v25, 0.0 }
 0x3f7   : >> { %v1480_v29 = vmax.f32 %v2146_v27, 0.0 }
 0x3f8   : >> { %1488 = vst.msk [vmem:[%s1483_s26 + $0x18] sm:$0xff] %vm1484_vm3, %v1481_v28 }
 0x3f9   : >> { %1487 = vst.msk [vmem:[%s1483_s26 + $0x10] sm:$0xff] %vm1484_vm3, %v1480_v29 }
 0x3ff   : >> { %v1973_v32 = vpop.f32.mrb[0].mxu0  ;;  %792 = sbr.rel (!%p790_p5) target bundleno = 627 (0x273), region = 115 }
 0x400   : >> { %v2138_v33 = vadd.f32 %v2137_v30, %v1973_v32  ;;  %v1455_v34 = vpop.f32.mrb[1].mxu0 }
 0x401   : >> { %v2140_v35 = vadd.f32 %v2139_v31, %v1455_v34 }
 0x402   : >> { %v1479_v36 = vmax.f32 %v2138_v33, 0.0 }
 0x403   : >> { %v1478_v37 = vmax.f32 %v2140_v35, 0.0 }
 0x404   : >> { %1486 = vst.msk [vmem:[%s1483_s26 + $0x8] sm:$0xff] %vm1484_vm3, %v1479_v36 }
 0x405   : >> { %1485 = vst.msk [vmem:[%s1483_s26] sm:$0xff] %vm1484_vm3, %v1478_v37 }
 0x406 PF: > { %s15_s18 = sadd.s32 1, %s2347_s18  }
 0x407   : > { %p12_p6 = scmp.ge.s32.totalorder %s15_s18, 4  }
 0x409   :  { %14 = sbr.rel (!%p12_p6) target bundleno = 1 (0x1), region = 126 }

// kernel: vae_forward.7
= control target key start
LH: loop header
LB: loop body
LE: loop exit
PB: predicated region body
PF: predicated region fallthrough
CT: control target
= control target key end

     0   :  { %15 = vsyncpa [#allocation3], 0  ;;  %v382_v3 = vmov 0.0|0.0   ;;  %vm383_vm0 = vmmov 0   ;;  %v384_v6 = vmov 0.0   ;;  %s509_s0 = inlined_call_operand.vmem [shape: f32[2,32], index: 0, kind: input, shape index: {}]   ;;  %s510_s1 = inlined_call_operand.vmem [shape: f32[32,16], index: 1, kind: input, shape index: {}]   ;;  %s511_s2 = inlined_call_operand.vmem [shape: f32[1,16], index: 2, kind: input, shape index: {}]   ;;  %s512_s3 = inlined_call_operand.vmem [shape: f32[2,8], index: 3, kind: input, shape index: {}]   ;;  %s513_s4 = inlined_call_operand.vmem [shape: f32[8,32], index: 4, kind: input, shape index: {}]   ;;  %s514_s5 = inlined_call_operand.vmem [shape: f32[1,32], index: 5, kind: input, shape index: {}]   ;;  %s515_s6 = inlined_call_operand.hbm [shape: f32[2,8], index: 6, kind: output, shape index: {0}]   ;;  %s516_s7 = inlined_call_operand.hbm [shape: f32[2,8], index: 7, kind: output, shape index: {1}]   ;;  %s517_s8 = inlined_call_operand.hbm [shape: f32[2,8], index: 8, kind: output, shape index: {2}]   ;;  %s518_s9 = inlined_call_operand.vmem [shape: f32[2,32], index: 9, kind: output, shape index: {3}]  }
   0x1   :  { %v30_v0 = vld [vmem:[%s510_s1] sm:$0xff]  ;;  %v31_v1 = vld [vmem:[%s510_s1 + $0x8] sm:$0xff]  ;;  %v32_v2 = vld [vmem:[%s510_s1 + $0x10] sm:$0xff]  ;;  %296 = vmatprep.subr.bf16.mxu0 %v382_v3  ;;  %288 = vmatprep.mubr.msk.f32.mxu0 %vm383_vm0, %v384_v6 }
   0x2   :  { %v297_v4 = vpack.c.bf16 %v31_v1, %v30_v0  ;;  %v33_v5 = vld [vmem:[%s510_s1 + $0x18] sm:$0xff]  ;;  %v118_v7 = vld [vmem:[%s512_s3] sm:$0x3]  ;;  %291 = vmatprep.subr.mxu1 %v384_v6  ;;  %293 = vmatprep.mubr.msk.f32.mxu1 %vm383_vm0, %v384_v6 }
   0x3   :  { %16 = vsyncpa [#allocation5], 0  ;;  %v300_v8 = vpack.c.bf16 %v33_v5, %v32_v2  ;;  %s385_s19 = smov 8   ;;  %v29_v9 = vld [vmem:[%s509_s0] sm:$0x3]  ;;  %vm41_vm1 = vcmask 261120  }
   0x4   :  { %298 = vmatpush3.bf16.msra.mxu0 %v297_v4  ;;  %120 = vrot.lane.b32.xlu0 %v118_v7, %s385_s19  ;;  %v269_v10 = vld [vmem:[%s511_s2] ss:$0 sm:$0xff]  ;;  %vm129_vm2 = vcmask 58368   ;;  %s386_s3 = smov 120   ;;  %vm145_vm3 = vcmask 64512   ;;  %s387_s0 = smov [#allocation4]  }
   0x5   :  { %299 = vmatprep.subr.bf16.mxu0 %v382_v3  ;;  %v137_v16 = vld [vmem:[%s513_s4] sm:$0xff]  ;;  %s240_s2 = sshll.u32 %s387_s0, 4  ;;  %s388_s25 = smov [#allocation2]   ;;  %s241_s2 = int_to_ptr.vmem [resolvable:$true] %s240_s2 }
   0x6   :  { %292 = vmatpush3.msra.mxu1 %v137_v16  ;;  %s230_s26 = sshll.u32 %s388_s25, 4  ;;  %s312_s4 = scalar_lea.vmem %s241_s2, 32  ;;  %s231_s26 = int_to_ptr.vmem [resolvable:$true] %s230_s26 }
   0x7   :  { %p313_p0 = scmp.ne.s32.totalorder %s241_s2, %s312_s4  ;;  %p317_p1 = scmp.lt.s32.totalorder %s241_s2, %s241_s2 }
   0x8   :  { %301 = vmatpush3.bf16.msra.mxu0 %v300_v8  ;;  %p318_p2 = scmp.lt.s32.totalorder %s312_s4, %s312_s4 }
   0xa   :  { %p319_p3 = por %p318_p2, %p317_p1 }
   0xb   :  { %289 = vmatmul.mubr.msk.f32.vlgmr.msra.gmra.mrb[0].mxu0 %vm41_vm1, %v29_v9 }
   0xc   :  { %p320_p4 = pnand %p319_p3, %p313_p0 }
  0x76   :  { %v121_v17 = vpop.permute.xlu0 %120 }
  0xde   :  { %v111_v11 = vpop.f32.mrb[0].mxu0 }
  0xdf   :  { %v112_v12 = vadd.f32 %v269_v10, %v111_v11  ;;  %v290_v13 = vpop.f32.mrb[1].mxu0 }
  0xe1   :  { %v115_v14 = vmul.f32 0.5, %v112_v12  ;;  %132 = vrot.lane.b32.xlu1 %v112_v12, %s386_s3  ;;  %130 = vst.msk [vmem:[#allocation2] sm:$0x3] %vm129_vm2, %v112_v12 }
  0xe3   :  { %v116_v15 = vmul.f32 1.442695, %v115_v14 }
  0xe5   :  { %310 = vpow2.f32 %v116_v15 }
  0xef   :  { %v311_v18 = vpop.eup %310 }
  0xf0   :  { %v123_v19 = vmul.f32 %v311_v18, %v121_v17 }
  0xf2   :  { %125 = vrot.lane.b32.xlu0 %v123_v19, %s386_s3 }
 0x153   :  { %v133_v20 = vpop.permute.xlu1 %132 }
 0x154   :  { %135 = vst.msk [vmem:[#allocation4] sm:$0x3] %vm129_vm2, %v133_v20 }
 0x164   :  { %v126_v21 = vpop.permute.xlu0 %125 }
 0x165   :  { %v128_v22 = vadd.f32 %v126_v21, %v112_v12 }
 0x167   :  { %136 = vst.msk [vmem:[#allocation6] sm:$0x3] %vm129_vm2, %v128_v22  ;;  %294 = vmatmul.mubr.msk.f32.vlgmr.msra.gmra.mrb[0].mxu1 %vm145_vm3, %v128_v22 }
 0x168   :  { %323 = shalt.err (!%p320_p4)
}
 0x169   :  { %s324_s29 = scalar_lea.hbm %s516_s7, 32 }
 0x16a   :  { %p325_p5 = scmp.ne.s32.totalorder %s516_s7, %s324_s29  ;;  %p328_p6 = scmp.lt.u32.totalorder %s324_s29, %s516_s7 }
 0x16c   :  { %p330_p7 = pnand %p328_p6, %p325_p5 }
 0x16e   :  { %333 = shalt.err (!%p330_p7)
}
 0x16f   :  { %243 = dma.vmem_to_hbm [thread:$0]  %s241_s2, 32, %s516_s7, [#allocation5]  }
 0x170   :  { %s334_s15 = scalar_lea.vmem %s231_s26, 32  ;;  %p339_p9 = scmp.lt.s32.totalorder %s231_s26, %s231_s26 }
 0x171   :  { %p335_p8 = scmp.ne.s32.totalorder %s231_s26, %s334_s15  ;;  %p340_p10 = scmp.lt.s32.totalorder %s334_s15, %s334_s15 }
 0x173   :  { %p341_p11 = por %p340_p10, %p339_p9 }
 0x175   :  { %p342_p12 = pnand %p341_p11, %p335_p8 }
 0x177   :  { %345 = shalt.err (!%p342_p12)
}
 0x178   :  { %s346_s18 = scalar_lea.hbm %s515_s6, 32 }
 0x179   :  { %p347_p13 = scmp.ne.s32.totalorder %s515_s6, %s346_s18  ;;  %p350_p0 = scmp.lt.u32.totalorder %s346_s18, %s515_s6 }
 0x17b   :  { %p352_p1 = pnand %p350_p0, %p347_p13 }
 0x17d   :  { %355 = shalt.err (!%p352_p1)
}
 0x17e   :  { %233 = dma.vmem_to_hbm [thread:$0]  %s231_s26, 32, %s515_s6, [#allocation3]  }
 0x17f   :  { %s389_s3 = smov [#allocation6]  }
 0x180   :  { %s250_s23 = sshll.u32 %s389_s3, 4  ;;  %s251_s23 = int_to_ptr.vmem [resolvable:$true] %s250_s23 }
 0x181   :  { %s356_s24 = scalar_lea.vmem %s251_s23, 32  ;;  %p361_p3 = scmp.lt.s32.totalorder %s251_s23, %s251_s23 }
 0x182   :  { %p357_p2 = scmp.ne.s32.totalorder %s251_s23, %s356_s24  ;;  %p362_p4 = scmp.lt.s32.totalorder %s356_s24, %s356_s24 }
 0x184   :  { %p363_p5 = por %p362_p4, %p361_p3 }
 0x186   :  { %p364_p6 = pnand %p363_p5, %p357_p2 }
 0x188   :  { %367 = shalt.err (!%p364_p6)
}
 0x189   :  { %s368_s25 = scalar_lea.hbm %s517_s8, 32 }
 0x18a   :  { %p369_p7 = scmp.ne.s32.totalorder %s517_s8, %s368_s25  ;;  %p372_p8 = scmp.lt.u32.totalorder %s368_s25, %s517_s8 }
 0x18c   :  { %p374_p9 = pnand %p372_p8, %p369_p7 }
 0x18e   :  { %377 = shalt.err (!%p374_p9)
}
 0x18f   :  { %253 = dma.vmem_to_hbm [thread:$0]  %s251_s23, 32, %s517_s8, [#allocation5]   ;;  %v271_v23 = vld [vmem:[%s514_s5] ss:$0 sm:$0xff]  ;;  %vm222_vm5 = vcmask 254976  }
 0x23a   :  { %v215_v24 = vpop.f32.mrb[0].mxu1 }
 0x23b   :  { %v216_v25 = vadd.f32 %v271_v23, %v215_v24  ;;  %v295_v26 = vpop.f32.mrb[1].mxu1 }
 0x23d   :  { %vm219_vm4 = vcmp.gt.f32.partialorder %v216_v25, 0.0  ;;  %v220_v27 = vmul.f32 0.2, %v216_v25 }
 0x23f   :  { %v221_v28 = vsel %vm219_vm4, %v216_v25, %v220_v27 }
 0x240   :  { %223 = vst.msk [vmem:[%s518_s9] sm:$0x3] %vm222_vm5, %v221_v28 }
 0x241   :  { %378 = dma.done.wait [#allocation3], 32  }
 0x242   :  { %379 = vsyncadd [#allocation3], 4294967264 }
 0x243   :  { %380 = dma.done.wait [#allocation5], 64  }
 0x244   :  { %381 = vsyncadd [#allocation5], 4294967232 }
 0x245   :  { %267 = vsyncpa [#allocation3], 1 }
 0x246   :  { %268 = vsyncpa [#allocation5], 1 }

// kernel: vae_forward.6
= control target key start
LH: loop header
LB: loop body
LE: loop exit
PB: predicated region body
PF: predicated region fallthrough
CT: control target
= control target key end

     0   :  { %v1921_v22 = vmov 1983009808   ;;  %v27_v24 = vlaneseq  ;;  %vm1477_vm1 = vcmask 254976   ;;  %s2354_s1 = inlined_call_operand.vmem [shape: bf16[2048,32], index: 1, kind: input, shape index: {}]   ;;  %s2355_s0 = inlined_call_operand.vmem [shape: f32[2,2048], index: 0, kind: input, shape index: {}]   ;;  %s2356_s2 = inlined_call_operand.vmem [shape: f32[1,32], index: 2, kind: input, shape index: {}]   ;;  %s2357_s3 = inlined_call_operand.vmem [shape: f32[2,32], index: 3, kind: output, shape index: {}]  }
   0x1   :  { %v1789_v0 = vld [vmem:[%s2354_s1 + $0x40] sm:$0xff]   ;;  %v1793_v4 = vld [vmem:[%s2354_s1 + $0x48] sm:$0xff]   ;;  %v1797_v8 = vld [vmem:[%s2354_s1 + $0x50] sm:$0xff]   ;;  %v25_v23 = vunpack.c.l.s4 %v1921_v22 }
   0x2   :  { %v1790_v1 = vld [vmem:[%s2354_s1 + $0xc0] sm:$0xff]   ;;  %1612 = vmatprep.subr.bf16.mxu0 %v1789_v0  ;;  %v1794_v5 = vld [vmem:[%s2354_s1 + $0xc8] sm:$0xff]   ;;  %v1798_v9 = vld [vmem:[%s2354_s1 + $0xd0] sm:$0xff]   ;;  %v28_v30 = vshrl.u32 %v27_v24, 7 }
   0x3   :  { %v1791_v2 = vld [vmem:[%s2354_s1] sm:$0xff]   ;;  %1634 = vmatprep.subr.bf16.mxu1 %v1790_v1  ;;  %v1795_v6 = vld [vmem:[%s2354_s1 + $0x8] sm:$0xff]   ;;  %v1799_v10 = vld [vmem:[%s2354_s1 + $0x10] sm:$0xff]   ;;  %v26_v29 = vunpack.c.0.s8 %v25_v23 }
   0x4   :  { %v1792_v3 = vld [vmem:[%s2354_s1 + $0x80] sm:$0xff]   ;;  %1613 = vmatpush3.bf16.msra.mxu0 %v1791_v2  ;;  %v1796_v7 = vld [vmem:[%s2354_s1 + $0x88] sm:$0xff]   ;;  %v1800_v11 = vld [vmem:[%s2354_s1 + $0x90] sm:$0xff]  }
   0x5   :  { %1635 = vmatpush3.bf16.msra.mxu1 %v1792_v3  ;;  %1614 = vmatprep.subr.bf16.mxu0 %v1793_v4  ;;  %v1801_v12 = vld [vmem:[%s2354_s1 + $0x58] sm:$0xff]   ;;  %v1805_v16 = vld [vmem:[%s2354_s1 + $0x60] sm:$0xff]   ;;  %v1809_v20 = vld [vmem:[%s2354_s1 + $0x68] sm:$0xff]   ;;  %v2032_v35 = vsub.s32 %v26_v29, %v28_v30 }
   0x6   :  { %1636 = vmatprep.subr.bf16.mxu1 %v1794_v5  ;;  %v1802_v13 = vld [vmem:[%s2354_s1 + $0xd8] sm:$0xff]   ;;  %v1806_v17 = vld [vmem:[%s2354_s1 + $0xe0] sm:$0xff]   ;;  %v1810_v21 = vld [vmem:[%s2354_s1 + $0xe8] sm:$0xff]  }
   0x7   :  { %v1803_v14 = vld [vmem:[%s2354_s1 + $0x18] sm:$0xff]   ;;  %v1807_v18 = vld [vmem:[%s2354_s1 + $0x20] sm:$0xff]   ;;  %v1811_v25 = vld [vmem:[%s2354_s1 + $0x28] sm:$0xff]  }
   0x8   :  { %1615 = vmatpush3.bf16.msra.mxu0 %v1795_v6  ;;  %v1804_v15 = vld [vmem:[%s2354_s1 + $0x98] sm:$0xff]   ;;  %v1808_v19 = vld [vmem:[%s2354_s1 + $0xa0] sm:$0xff]   ;;  %v1812_v26 = vld [vmem:[%s2354_s1 + $0xa8] sm:$0xff]  }
   0x9   :  { %1637 = vmatpush3.bf16.msra.mxu1 %v1796_v7  ;;  %1616 = vmatprep.subr.bf16.mxu0 %v1797_v8  ;;  %v1813_v27 = vld [vmem:[%s2354_s1 + $0x70] sm:$0xff]   ;;  %v1817_v33 = vld [vmem:[%s2354_s1 + $0x78] sm:$0xff]   ;;  %v15_v38 = vld [vmem:[%s2355_s0] sm:$0xff] }
   0xa   :  { %1638 = vmatprep.subr.bf16.mxu1 %v1798_v9  ;;  %v1814_v28 = vld [vmem:[%s2354_s1 + $0xf0] sm:$0xff]   ;;  %v1818_v34 = vld [vmem:[%s2354_s1 + $0xf8] sm:$0xff]   ;;  %v30_v39 = vrot.slane %v15_v38, %v2032_v35  ;;  %v23_v40 = vcombine.high %v15_v38, %v15_v38  ;;  %v1822_v41 = vld [vmem:[%s2354_s1 + $0x140] sm:$0xff]  }
   0xb   :  { %v1815_v31 = vld [vmem:[%s2354_s1 + $0x30] sm:$0xff]   ;;  %v1819_v36 = vld [vmem:[%s2354_s1 + $0x38] sm:$0xff]   ;;  %v1823_v42 = vld [vmem:[%s2354_s1 + $0x1c0] sm:$0xff]  }
   0xc   :  { %1617 = vmatpush3.bf16.msra.mxu0 %v1799_v10  ;;  %v1816_v32 = vld [vmem:[%s2354_s1 + $0xb0] sm:$0xff]   ;;  %v1820_v37 = vld [vmem:[%s2354_s1 + $0xb8] sm:$0xff]   ;;  %v38_v43 = vcombine.high %v30_v39, %v30_v39  ;;  %v37_v44 = vrot.slane %v23_v40, %v2032_v35  ;;  %v107_v45 = vpack.c.bf16 %v30_v39, %v30_v39  ;;  %v1824_v48 = vld [vmem:[%s2354_s1 + $0x100] sm:$0xff]  }
   0xd   :  { %1639 = vmatpush3.bf16.msra.mxu1 %v1800_v11  ;;  %1618 = vmatprep.subr.bf16.mxu0 %v1801_v12  ;;  %v1826_v50 = vld [vmem:[%s2354_s1 + $0x148] sm:$0xff]   ;;  %v1825_v52 = vld [vmem:[%s2354_s1 + $0x180] sm:$0xff]   ;;  %v1830_v55 = vld [vmem:[%s2354_s1 + $0x150] sm:$0xff]  }
   0xe   :  { %1640 = vmatprep.subr.bf16.mxu1 %v1802_v13  ;;  %v108_v46 = vpack.c.bf16 %v38_v43, %v38_v43  ;;  %v39_v47 = vcombine.high %v37_v44, %v37_v44  ;;  %v109_v49 = vpack.c.bf16 %v37_v44, %v37_v44  ;;  %v1827_v53 = vld [vmem:[%s2354_s1 + $0x1c8] sm:$0xff]   ;;  %v1831_v57 = vld [vmem:[%s2354_s1 + $0x1d0] sm:$0xff]   ;;  %v1834_v59 = vld [vmem:[%s2354_s1 + $0x158] sm:$0xff]  }
   0xf   :  { %v1828_v54 = vld [vmem:[%s2354_s1 + $0x108] sm:$0xff]   ;;  %v1832_v58 = vld [vmem:[%s2354_s1 + $0x110] sm:$0xff]   ;;  %v1835_v61 = vld [vmem:[%s2354_s1 + $0x1d8] sm:$0xff]  }
  0x10   :  { %1619 = vmatpush3.bf16.msra.mxu0 %v1803_v14  ;;  %1186 = vmatprep.mubr.bf16.mxu0 %v108_v46  ;;  %v110_v51 = vpack.c.bf16 %v39_v47, %v39_v47  ;;  %v1829_v56 = vld [vmem:[%s2354_s1 + $0x188] sm:$0xff]   ;;  %v1833_v60 = vld [vmem:[%s2354_s1 + $0x190] sm:$0xff]   ;;  %v1836_v62 = vld [vmem:[%s2354_s1 + $0x118] sm:$0xff]  }
  0x11   :  { %1641 = vmatpush3.bf16.msra.mxu1 %v1804_v15  ;;  %1620 = vmatprep.subr.bf16.mxu0 %v1805_v16  ;;  %v1838_v63 = vld [vmem:[%s2354_s1 + $0x160] sm:$0xff]   ;;  %v1837_v0 = vld [vmem:[%s2354_s1 + $0x198] sm:$0xff]   ;;  %v1842_v3 = vld [vmem:[%s2354_s1 + $0x168] sm:$0xff]  }
  0x12   :  { %1642 = vmatprep.subr.bf16.mxu1 %v1806_v17  ;;  %1226 = vmatprep.mubr.bf16.mxu1 %v110_v51  ;;  %v1839_v1 = vld [vmem:[%s2354_s1 + $0x1e0] sm:$0xff]   ;;  %v1843_v5 = vld [vmem:[%s2354_s1 + $0x1e8] sm:$0xff]   ;;  %v1846_v7 = vld [vmem:[%s2354_s1 + $0x170] sm:$0xff]  }
  0x13   :  { %v1840_v2 = vld [vmem:[%s2354_s1 + $0x120] sm:$0xff]   ;;  %v1844_v6 = vld [vmem:[%s2354_s1 + $0x128] sm:$0xff]   ;;  %v1847_v9 = vld [vmem:[%s2354_s1 + $0x1f0] sm:$0xff]  }
  0x14   :  { %1621 = vmatpush3.bf16.msra.mxu0 %v1807_v18  ;;  %v1841_v4 = vld [vmem:[%s2354_s1 + $0x1a0] sm:$0xff]   ;;  %v1845_v8 = vld [vmem:[%s2354_s1 + $0x1a8] sm:$0xff]   ;;  %v1848_v10 = vld [vmem:[%s2354_s1 + $0x130] sm:$0xff]  }
  0x15   :  { %1643 = vmatpush3.bf16.msra.mxu1 %v1808_v19  ;;  %1622 = vmatprep.subr.bf16.mxu0 %v1809_v20  ;;  %v1850_v11 = vld [vmem:[%s2354_s1 + $0x178] sm:$0xff]   ;;  %v1849_v12 = vld [vmem:[%s2354_s1 + $0x1b0] sm:$0xff]   ;;  %v16_v14 = vld [vmem:[%s2355_s0 + $0x8] sm:$0xff] }
  0x16   :  { %1644 = vmatprep.subr.bf16.mxu1 %v1810_v21  ;;  %v1851_v13 = vld [vmem:[%s2354_s1 + $0x1f8] sm:$0xff]   ;;  %v47_v16 = vrot.slane %v16_v14, %v2032_v35  ;;  %v40_v17 = vcombine.high %v16_v14, %v16_v14  ;;  %v1855_v18 = vld [vmem:[%s2354_s1 + $0x240] sm:$0xff]   ;;  %v1866_v39 = vld [vmem:[%s2354_s1 + $0x290] sm:$0xff]  }
  0x17   :  { %v1852_v15 = vld [vmem:[%s2354_s1 + $0x138] sm:$0xff]   ;;  %v1856_v23 = vld [vmem:[%s2354_s1 + $0x2c0] sm:$0xff]   ;;  %v1875_v46 = vld [vmem:[%s2354_s1 + $0x268] sm:$0xff]  }
  0x18   :  { %1623 = vmatpush3.bf16.msra.mxu0 %v1811_v25  ;;  %v1853_v19 = vld [vmem:[%s2354_s1 + $0x1b8] sm:$0xff]   ;;  %v55_v20 = vcombine.high %v47_v16, %v47_v16  ;;  %v54_v21 = vrot.slane %v40_v17, %v2032_v35  ;;  %v111_v22 = vpack.c.bf16 %v47_v16, %v47_v16  ;;  %v1858_v30 = vld [vmem:[%s2354_s1 + $0x280] sm:$0xff]   ;;  %v1878_v51 = vld [vmem:[%s2354_s1 + $0x2a8] sm:$0xff]  }
  0x19   :  { %1645 = vmatpush3.bf16.msra.mxu1 %v1812_v26  ;;  %1624 = vmatprep.subr.bf16.mxu0 %v1813_v27  ;;  %v1857_v26 = vld [vmem:[%s2354_s1 + $0x200] sm:$0xff]   ;;  %v1867_v38 = vld [vmem:[%s2354_s1 + $0x258] sm:$0xff]   ;;  %v1897_v14 = vld [vmem:[%s2354_s1 + $0x3d0] sm:$0xff]  }
  0x1a   :  { %1646 = vmatprep.subr.bf16.mxu1 %v1814_v28  ;;  %v112_v24 = vpack.c.bf16 %v55_v20, %v55_v20  ;;  %v56_v25 = vcombine.high %v54_v21, %v54_v21  ;;  %v113_v27 = vpack.c.bf16 %v54_v21, %v54_v21  ;;  %v1859_v28 = vld [vmem:[%s2354_s1 + $0x248] sm:$0xff]   ;;  %v1868_v40 = vld [vmem:[%s2354_s1 + $0x2d8] sm:$0xff]   ;;  %v1872_v44 = vld [vmem:[%s2354_s1 + $0x2e0] sm:$0xff]  }
  0x1b   :  { %v1870_v43 = vld [vmem:[%s2354_s1 + $0x298] sm:$0xff]   ;;  %v1874_v47 = vld [vmem:[%s2354_s1 + $0x2a0] sm:$0xff]   ;;  %v1899_v17 = vld [vmem:[%s2354_s1 + $0x390] sm:$0xff]  }
  0x1c   :  { %1625 = vmatpush3.bf16.msra.mxu0 %v1815_v31  ;;  %v114_v29 = vpack.c.bf16 %v56_v25, %v56_v25  ;;  %v1860_v31 = vld [vmem:[%s2354_s1 + $0x2c8] sm:$0xff]   ;;  %v1900_v16 = vld [vmem:[%s2354_s1 + $0x358] sm:$0xff]   ;;  %v1904_v20 = vld [vmem:[%s2354_s1 + $0x360] sm:$0xff]  }
  0x1d   :  { %1647 = vmatpush3.bf16.msra.mxu1 %v1816_v32  ;;  %1626 = vmatprep.subr.bf16.mxu0 %v1817_v33  ;;  %v1861_v32 = vld [vmem:[%s2354_s1 + $0x208] sm:$0xff]   ;;  %v1863_v33 = vld [vmem:[%s2354_s1 + $0x250] sm:$0xff]   ;;  %v1903_v21 = vld [vmem:[%s2354_s1 + $0x398] sm:$0xff]  }
  0x1e   :  { %1648 = vmatprep.subr.bf16.mxu1 %v1818_v34  ;;  %v1862_v34 = vld [vmem:[%s2354_s1 + $0x288] sm:$0xff]   ;;  %v1907_v25 = vld [vmem:[%s2354_s1 + $0x3a0] sm:$0xff]  }
  0x20   :  { %1627 = vmatpush3.bf16.msra.mxu0 %v1819_v36  ;;  %v1864_v36 = vld [vmem:[%s2354_s1 + $0x2d0] sm:$0xff]  }
  0x21   :  { %1649 = vmatpush3.bf16.msra.mxu1 %v1820_v37  ;;  %1656 = vmatprep.subr.bf16.mxu0 %v1822_v41  ;;  %v1865_v37 = vld [vmem:[%s2354_s1 + $0x210] sm:$0xff]   ;;  %v1869_v41 = vld [vmem:[%s2354_s1 + $0x218] sm:$0xff]  }
  0x22   :  { %1678 = vmatprep.subr.bf16.mxu1 %v1823_v42  ;;  %v1871_v42 = vld [vmem:[%s2354_s1 + $0x260] sm:$0xff]  }
  0x23   :  { %1187 = vmatmul.mubr.bf16.vlgmr.msra.gmra.mrb[0].mxu0 %v107_v45  ;;  %v1873_v45 = vld [vmem:[%s2354_s1 + $0x220] sm:$0xff]  }
  0x24   :  { %1657 = vmatpush3.bf16.msra.mxu0 %v1824_v48  ;;  %1227 = vmatmul.mubr.bf16.vlgmr.msra.gmra.mrb[0].mxu1 %v109_v49  ;;  %v1876_v48 = vld [vmem:[%s2354_s1 + $0x2e8] sm:$0xff]  }
  0x25   :  { %1658 = vmatprep.subr.bf16.mxu0 %v1826_v50  ;;  %1679 = vmatpush3.bf16.msra.mxu1 %v1825_v52  ;;  %v1877_v49 = vld [vmem:[%s2354_s1 + $0x228] sm:$0xff]   ;;  %v1879_v50 = vld [vmem:[%s2354_s1 + $0x270] sm:$0xff]  }
  0x26   :  { %1680 = vmatprep.subr.bf16.mxu1 %v1827_v53  ;;  %1266 = vmatprep.mubr.bf16.mxu0 %v112_v24  ;;  %v1880_v52 = vld [vmem:[%s2354_s1 + $0x2f0] sm:$0xff]   ;;  %v1908_v24 = vld [vmem:[%s2354_s1 + $0x368] sm:$0xff]  }
  0x27   :  { %1306 = vmatprep.mubr.bf16.mxu1 %v114_v29  ;;  %v1881_v53 = vld [vmem:[%s2354_s1 + $0x230] sm:$0xff]   ;;  %v1911_v29 = vld [vmem:[%s2354_s1 + $0x3a8] sm:$0xff]  }
  0x28   :  { %1659 = vmatpush3.bf16.msra.mxu0 %v1828_v54  ;;  %v1883_v54 = vld [vmem:[%s2354_s1 + $0x278] sm:$0xff]  }
  0x29   :  { %1660 = vmatprep.subr.bf16.mxu0 %v1830_v55  ;;  %1681 = vmatpush3.bf16.msra.mxu1 %v1829_v56  ;;  %v1882_v55 = vld [vmem:[%s2354_s1 + $0x2b0] sm:$0xff]   ;;  %v1884_v56 = vld [vmem:[%s2354_s1 + $0x2f8] sm:$0xff]  }
  0x2a   :  { %1682 = vmatprep.subr.bf16.mxu1 %v1831_v57  ;;  %v17_v57 = vld [vmem:[%s2355_s0 + $0x10] sm:$0xff] }
  0x2c   :  { %1661 = vmatpush3.bf16.msra.mxu0 %v1832_v58  ;;  %v1885_v58 = vld [vmem:[%s2354_s1 + $0x238] sm:$0xff]  }
  0x2d   :  { %1662 = vmatprep.subr.bf16.mxu0 %v1834_v59  ;;  %1683 = vmatpush3.bf16.msra.mxu1 %v1833_v60  ;;  %v64_v59 = vrot.slane %v17_v57, %v2032_v35  ;;  %v57_v60 = vcombine.high %v17_v57, %v17_v57 }
  0x2e   :  { %1684 = vmatprep.subr.bf16.mxu1 %v1835_v61  ;;  %v1888_v61 = vld [vmem:[%s2354_s1 + $0x340] sm:$0xff]  }
  0x30   :  { %1663 = vmatpush3.bf16.msra.mxu0 %v1836_v62  ;;  %v1886_v62 = vld [vmem:[%s2354_s1 + $0x2b8] sm:$0xff]  }
  0x31   :  { %1664 = vmatprep.subr.bf16.mxu0 %v1838_v63  ;;  %1685 = vmatpush3.bf16.msra.mxu1 %v1837_v0  ;;  %v72_v63 = vcombine.high %v64_v59, %v64_v59  ;;  %v71_v0 = vrot.slane %v57_v60, %v2032_v35 }
  0x32   :  { %1686 = vmatprep.subr.bf16.mxu1 %v1839_v1  ;;  %v115_v1 = vpack.c.bf16 %v64_v59, %v64_v59 }
  0x34   :  { %1665 = vmatpush3.bf16.msra.mxu0 %v1840_v2  ;;  %v1889_v2 = vld [vmem:[%s2354_s1 + $0x3c0] sm:$0xff]  }
  0x35   :  { %1666 = vmatprep.subr.bf16.mxu0 %v1842_v3  ;;  %1687 = vmatpush3.bf16.msra.mxu1 %v1841_v4  ;;  %v116_v3 = vpack.c.bf16 %v72_v63, %v72_v63  ;;  %v73_v4 = vcombine.high %v71_v0, %v71_v0 }
  0x36   :  { %1688 = vmatprep.subr.bf16.mxu1 %v1843_v5  ;;  %v1890_v5 = vld [vmem:[%s2354_s1 + $0x300] sm:$0xff]  }
  0x38   :  { %1667 = vmatpush3.bf16.msra.mxu0 %v1844_v6  ;;  %v117_v6 = vpack.c.bf16 %v71_v0, %v71_v0 }
  0x39   :  { %1668 = vmatprep.subr.bf16.mxu0 %v1846_v7  ;;  %1689 = vmatpush3.bf16.msra.mxu1 %v1845_v8  ;;  %v1892_v7 = vld [vmem:[%s2354_s1 + $0x348] sm:$0xff]   ;;  %v118_v8 = vpack.c.bf16 %v73_v4, %v73_v4 }
  0x3a   :  { %1690 = vmatprep.subr.bf16.mxu1 %v1847_v9  ;;  %v1891_v9 = vld [vmem:[%s2354_s1 + $0x380] sm:$0xff]  }
  0x3c   :  { %1669 = vmatpush3.bf16.msra.mxu0 %v1848_v10  ;;  %v1893_v10 = vld [vmem:[%s2354_s1 + $0x3c8] sm:$0xff]  }
  0x3d   :  { %1670 = vmatprep.subr.bf16.mxu0 %v1850_v11  ;;  %1691 = vmatpush3.bf16.msra.mxu1 %v1849_v12  ;;  %v1894_v11 = vld [vmem:[%s2354_s1 + $0x308] sm:$0xff]   ;;  %v1896_v12 = vld [vmem:[%s2354_s1 + $0x350] sm:$0xff]  }
  0x3e   :  { %1692 = vmatprep.subr.bf16.mxu1 %v1851_v13  ;;  %v1895_v13 = vld [vmem:[%s2354_s1 + $0x388] sm:$0xff]  }
  0x40   :  { %1671 = vmatpush3.bf16.msra.mxu0 %v1852_v15  ;;  %v1898_v15 = vld [vmem:[%s2354_s1 + $0x310] sm:$0xff]  }
  0x41   :  { %1700 = vmatprep.subr.bf16.mxu0 %v1855_v18  ;;  %1693 = vmatpush3.bf16.msra.mxu1 %v1853_v19  ;;  %v1901_v18 = vld [vmem:[%s2354_s1 + $0x3d8] sm:$0xff]  }
  0x42   :  { %1722 = vmatprep.subr.bf16.mxu1 %v1856_v23  ;;  %v1902_v19 = vld [vmem:[%s2354_s1 + $0x318] sm:$0xff]   ;;  %v1906_v23 = vld [vmem:[%s2354_s1 + $0x320] sm:$0xff]  }
  0x43   :  { %1267 = vmatmul.mubr.bf16.vlgmr.msra.gmra.mrb[4].mxu0 %v111_v22  ;;  %v1905_v22 = vld [vmem:[%s2354_s1 + $0x3e0] sm:$0xff]  }
  0x44   :  { %1701 = vmatpush3.bf16.msra.mxu0 %v1857_v26  ;;  %1307 = vmatmul.mubr.bf16.vlgmr.msra.gmra.mrb[4].mxu1 %v113_v27  ;;  %v1909_v26 = vld [vmem:[%s2354_s1 + $0x3e8] sm:$0xff]  }
  0x45   :  { %1702 = vmatprep.subr.bf16.mxu0 %v1859_v28  ;;  %1723 = vmatpush3.bf16.msra.mxu1 %v1858_v30  ;;  %v1910_v27 = vld [vmem:[%s2354_s1 + $0x328] sm:$0xff]   ;;  %v1912_v28 = vld [vmem:[%s2354_s1 + $0x370] sm:$0xff]  }
  0x46   :  { %1724 = vmatprep.subr.bf16.mxu1 %v1860_v31  ;;  %1346 = vmatprep.mubr.bf16.mxu0 %v116_v3  ;;  %v1913_v30 = vld [vmem:[%s2354_s1 + $0x3f0] sm:$0xff]  }
  0x47   :  { %1386 = vmatprep.mubr.bf16.mxu1 %v118_v8  ;;  %v1914_v31 = vld [vmem:[%s2354_s1 + $0x330] sm:$0xff]  }
  0x48   :  { %1703 = vmatpush3.bf16.msra.mxu0 %v1861_v32  ;;  %v1916_v32 = vld [vmem:[%s2354_s1 + $0x378] sm:$0xff]  }
  0x49   :  { %1704 = vmatprep.subr.bf16.mxu0 %v1863_v33  ;;  %1725 = vmatpush3.bf16.msra.mxu1 %v1862_v34  ;;  %v1915_v33 = vld [vmem:[%s2354_s1 + $0x3b0] sm:$0xff]   ;;  %v1917_v34 = vld [vmem:[%s2354_s1 + $0x3f8] sm:$0xff]  }
  0x4a   :  { %1726 = vmatprep.subr.bf16.mxu1 %v1864_v36  ;;  %v1918_v36 = vld [vmem:[%s2354_s1 + $0x338] sm:$0xff]  }
  0x4c   :  { %1705 = vmatpush3.bf16.msra.mxu0 %v1865_v37  ;;  %v18_v37 = vld [vmem:[%s2355_s0 + $0x18] sm:$0xff] }
  0x4d   :  { %1706 = vmatprep.subr.bf16.mxu0 %v1867_v38  ;;  %1727 = vmatpush3.bf16.msra.mxu1 %v1866_v39  ;;  %v81_v38 = vrot.slane %v18_v37, %v2032_v35  ;;  %v74_v39 = vcombine.high %v18_v37, %v18_v37 }
  0x4e   :  { %1728 = vmatprep.subr.bf16.mxu1 %v1868_v40  ;;  %v1919_v40 = vld [vmem:[%s2354_s1 + $0x3b8] sm:$0xff]  }
  0x50   :  { %1707 = vmatpush3.bf16.msra.mxu0 %v1869_v41  ;;  %v89_v41 = vcombine.high %v81_v38, %v81_v38 }
  0x51   :  { %1708 = vmatprep.subr.bf16.mxu0 %v1871_v42  ;;  %1729 = vmatpush3.bf16.msra.mxu1 %v1870_v43  ;;  %v88_v42 = vrot.slane %v74_v39, %v2032_v35  ;;  %v119_v43 = vpack.c.bf16 %v81_v38, %v81_v38 }
  0x52   :  { %1730 = vmatprep.subr.bf16.mxu1 %v1872_v44  ;;  %v120_v44 = vpack.c.bf16 %v89_v41, %v89_v41 }
  0x54   :  { %1709 = vmatpush3.bf16.msra.mxu0 %v1873_v45  ;;  %v90_v45 = vcombine.high %v88_v42, %v88_v42 }
  0x55   :  { %1710 = vmatprep.subr.bf16.mxu0 %v1875_v46  ;;  %1731 = vmatpush3.bf16.msra.mxu1 %v1874_v47  ;;  %v121_v46 = vpack.c.bf16 %v88_v42, %v88_v42 }
  0x56   :  { %1732 = vmatprep.subr.bf16.mxu1 %v1876_v48  ;;  %v122_v47 = vpack.c.bf16 %v90_v45, %v90_v45 }
  0x58   :  { %1711 = vmatpush3.bf16.msra.mxu0 %v1877_v49  ;;  %v1483_v49 = vld [vmem:[%s2356_s2] ss:$0 sm:$0xff] }
  0x59   :  { %1712 = vmatprep.subr.bf16.mxu0 %v1879_v50  ;;  %1733 = vmatpush3.bf16.msra.mxu1 %v1878_v51 }
  0x5a   :  { %1734 = vmatprep.subr.bf16.mxu1 %v1880_v52 }
  0x5c   :  { %1713 = vmatpush3.bf16.msra.mxu0 %v1881_v53 }
  0x5d   :  { %1714 = vmatprep.subr.bf16.mxu0 %v1883_v54  ;;  %1735 = vmatpush3.bf16.msra.mxu1 %v1882_v55 }
  0x5e   :  { %1736 = vmatprep.subr.bf16.mxu1 %v1884_v56 }
  0x60   :  { %1715 = vmatpush3.bf16.msra.mxu0 %v1885_v58 }
  0x61   :  { %1744 = vmatprep.subr.bf16.mxu0 %v1888_v61  ;;  %1737 = vmatpush3.bf16.msra.mxu1 %v1886_v62 }
  0x62   :  { %1766 = vmatprep.subr.bf16.mxu1 %v1889_v2 }
  0x63   :  { %1347 = vmatmul.mubr.bf16.vlgmr.msra.gmra.mrb[8].mxu0 %v115_v1 }
  0x64   :  { %1745 = vmatpush3.bf16.msra.mxu0 %v1890_v5  ;;  %1387 = vmatmul.mubr.bf16.vlgmr.msra.gmra.mrb[8].mxu1 %v117_v6 }
  0x65   :  { %1746 = vmatprep.subr.bf16.mxu0 %v1892_v7  ;;  %1767 = vmatpush3.bf16.msra.mxu1 %v1891_v9 }
  0x66   :  { %1768 = vmatprep.subr.bf16.mxu1 %v1893_v10  ;;  %1426 = vmatprep.mubr.bf16.mxu0 %v120_v44 }
  0x67   :  { %1466 = vmatprep.mubr.bf16.mxu1 %v122_v47 }
  0x68   :  { %1747 = vmatpush3.bf16.msra.mxu0 %v1894_v11 }
  0x69   :  { %1748 = vmatprep.subr.bf16.mxu0 %v1896_v12  ;;  %1769 = vmatpush3.bf16.msra.mxu1 %v1895_v13 }
  0x6a   :  { %1770 = vmatprep.subr.bf16.mxu1 %v1897_v14 }
  0x6c   :  { %1749 = vmatpush3.bf16.msra.mxu0 %v1898_v15 }
  0x6d   :  { %1750 = vmatprep.subr.bf16.mxu0 %v1900_v16  ;;  %1771 = vmatpush3.bf16.msra.mxu1 %v1899_v17 }
  0x6e   :  { %1772 = vmatprep.subr.bf16.mxu1 %v1901_v18 }
  0x70   :  { %1751 = vmatpush3.bf16.msra.mxu0 %v1902_v19 }
  0x71   :  { %1752 = vmatprep.subr.bf16.mxu0 %v1904_v20  ;;  %1773 = vmatpush3.bf16.msra.mxu1 %v1903_v21 }
  0x72   :  { %1774 = vmatprep.subr.bf16.mxu1 %v1905_v22 }
  0x74   :  { %1753 = vmatpush3.bf16.msra.mxu0 %v1906_v23 }
  0x75   :  { %1754 = vmatprep.subr.bf16.mxu0 %v1908_v24  ;;  %1775 = vmatpush3.bf16.msra.mxu1 %v1907_v25 }
  0x76   :  { %1776 = vmatprep.subr.bf16.mxu1 %v1909_v26 }
  0x78   :  { %1755 = vmatpush3.bf16.msra.mxu0 %v1910_v27 }
  0x79   :  { %1756 = vmatprep.subr.bf16.mxu0 %v1912_v28  ;;  %1777 = vmatpush3.bf16.msra.mxu1 %v1911_v29 }
  0x7a   :  { %1778 = vmatprep.subr.bf16.mxu1 %v1913_v30 }
  0x7c   :  { %1757 = vmatpush3.bf16.msra.mxu0 %v1914_v31 }
  0x7d   :  { %1758 = vmatprep.subr.bf16.mxu0 %v1916_v32  ;;  %1779 = vmatpush3.bf16.msra.mxu1 %v1915_v33 }
  0x7e   :  { %1780 = vmatprep.subr.bf16.mxu1 %v1917_v34 }
  0x80   :  { %1759 = vmatpush3.bf16.msra.mxu0 %v1918_v36 }
  0x81   :  { %1781 = vmatpush3.bf16.msra.mxu1 %v1919_v40 }
  0x83   :  { %1427 = vmatmul.mubr.bf16.vlgmr.msra.gmra.mrb[12].mxu0 %v119_v43 }
  0x84   :  { %1467 = vmatmul.mubr.bf16.vlgmr.msra.gmra.mrb[12].mxu1 %v121_v46 }
  0xf6   :  { %v1628_v48 = vpop.f32.mrb[0].mxu0 }
  0xf7   :  { %v1629_v50 = vpop.f32.mrb[1].mxu0  ;;  %v1650_v51 = vpop.f32.mrb[0].mxu1 }
  0xf8   :  { %v1630_v52 = vadd.f32 %v1629_v50, %v1628_v48  ;;  %v1631_v35 = vpop.f32.mrb[2].mxu0  ;;  %v1651_v53 = vpop.f32.mrb[1].mxu1 }
  0xf9   :  { %v1632_v54 = vpop.f32.mrb[3].mxu0  ;;  %v1652_v56 = vadd.f32 %v1651_v53, %v1650_v51  ;;  %v1653_v57 = vpop.f32.mrb[2].mxu1 }
  0xfa   :  { %v1189_v55 = vadd.f32 %v1630_v52, %v1483_v49  ;;  %v1654_v58 = vpop.f32.mrb[3].mxu1 }
  0xfc   :  { %v1229_v59 = vadd.f32 %v1652_v56, %v1189_v55 }
 0x116   :  { %v1672_v60 = vpop.f32.mrb[4].mxu0 }
 0x117   :  { %v1673_v61 = vpop.f32.mrb[5].mxu0  ;;  %v1694_v62 = vpop.f32.mrb[4].mxu1 }
 0x118   :  { %v1674_v63 = vadd.f32 %v1673_v61, %v1672_v60  ;;  %v1675_v0 = vpop.f32.mrb[6].mxu0  ;;  %v1695_v1 = vpop.f32.mrb[5].mxu1 }
 0x119   :  { %v1676_v2 = vpop.f32.mrb[7].mxu0  ;;  %v1696_v4 = vadd.f32 %v1695_v1, %v1694_v62  ;;  %v1697_v5 = vpop.f32.mrb[6].mxu1 }
 0x11a   :  { %v1269_v3 = vadd.f32 %v1674_v63, %v1229_v59  ;;  %v1698_v6 = vpop.f32.mrb[7].mxu1 }
 0x11c   :  { %v1309_v7 = vadd.f32 %v1696_v4, %v1269_v3 }
 0x136   :  { %v1716_v8 = vpop.f32.mrb[8].mxu0 }
 0x137   :  { %v1717_v9 = vpop.f32.mrb[9].mxu0  ;;  %v1738_v10 = vpop.f32.mrb[8].mxu1 }
 0x138   :  { %v1718_v11 = vadd.f32 %v1717_v9, %v1716_v8  ;;  %v1719_v12 = vpop.f32.mrb[10].mxu0  ;;  %v1739_v13 = vpop.f32.mrb[9].mxu1 }
 0x139   :  { %v1720_v14 = vpop.f32.mrb[11].mxu0  ;;  %v1740_v16 = vadd.f32 %v1739_v13, %v1738_v10  ;;  %v1741_v17 = vpop.f32.mrb[10].mxu1 }
 0x13a   :  { %v1349_v15 = vadd.f32 %v1718_v11, %v1309_v7  ;;  %v1742_v18 = vpop.f32.mrb[11].mxu1 }
 0x13c   :  { %v1389_v19 = vadd.f32 %v1740_v16, %v1349_v15 }
 0x156   :  { %v1760_v20 = vpop.f32.mrb[12].mxu0 }
 0x157   :  { %v1761_v21 = vpop.f32.mrb[13].mxu0  ;;  %v1782_v22 = vpop.f32.mrb[12].mxu1 }
 0x158   :  { %v1762_v23 = vadd.f32 %v1761_v21, %v1760_v20  ;;  %v1763_v24 = vpop.f32.mrb[14].mxu0  ;;  %v1783_v25 = vpop.f32.mrb[13].mxu1 }
 0x159   :  { %v1764_v26 = vpop.f32.mrb[15].mxu0  ;;  %v1784_v28 = vadd.f32 %v1783_v25, %v1782_v22  ;;  %v1785_v29 = vpop.f32.mrb[14].mxu1 }
 0x15a   :  { %v1429_v27 = vadd.f32 %v1762_v23, %v1389_v19  ;;  %v1786_v30 = vpop.f32.mrb[15].mxu1 }
 0x15c   :  { %v1469_v31 = vadd.f32 %v1784_v28, %v1429_v27 }
 0x15e   :  { %vm1474_vm0 = vcmp.gt.f32.partialorder %v1469_v31, 0.0  ;;  %v1475_v32 = vmul.f32 0.2, %v1469_v31 }
 0x160   :  { %v1476_v33 = vsel %vm1474_vm0, %v1469_v31, %v1475_v32 }
 0x161   :  { %1478 = vst.msk [vmem:[%s2357_s3] sm:$0x3] %vm1477_vm1, %v1476_v33 }

// kernel: vae_forward.8
= control target key start
LH: loop header
LB: loop body
LE: loop exit
PB: predicated region body
PF: predicated region fallthrough
CT: control target
= control target key end

     0   :  { %v811_v3 = vmov 0   ;;  %vm293_vm0 = vcmask 261120   ;;  %s1039_s1 = inlined_call_operand.vmem [shape: bf16[32,2048], index: 1, kind: input, shape index: {}]   ;;  %s1040_s0 = inlined_call_operand.vmem [shape: f32[2,32], index: 0, kind: input, shape index: {}]   ;;  %s1041_s2 = inlined_call_operand.vmem [shape: f32[1,2048], index: 2, kind: input, shape index: {}]   ;;  %s1042_s3 = inlined_call_operand.vmem [shape: f32[2,2048], index: 3, kind: output, shape index: {}]  }
   0x1   :  { %v17_v0 = vld [vmem:[%s1039_s1] sm:$0xff]  ;;  %v18_v2 = vld [vmem:[%s1039_s1 + $0x8] sm:$0xff]  ;;  %329 = vmatprep.mubr.bf16.mxu0 %v811_v3  ;;  %370 = vmatprep.mubr.bf16.mxu1 %v811_v3  ;;  %v19_v15 = vld [vmem:[%s1039_s1 + $0x10] sm:$0xff] }
   0x2   :  { %v25_v1 = vld [vmem:[%s1039_s1 + $0x40] sm:$0xff]  ;;  %v26_v5 = vld [vmem:[%s1039_s1 + $0x48] sm:$0xff]  ;;  %v27_v16 = vld [vmem:[%s1039_s1 + $0x50] sm:$0xff] }
   0x3   :  { %v770_v4 = vcombine.high %v17_v0, %v25_v1  ;;  %v769_v6 = vcombine.low %v17_v0, %v25_v1  ;;  %v33_v7 = vld [vmem:[%s1039_s1 + $0x80] sm:$0xff]  ;;  %v772_v9 = vcombine.high %v18_v2, %v26_v5  ;;  %v771_v10 = vcombine.low %v18_v2, %v26_v5  ;;  %v34_v12 = vld [vmem:[%s1039_s1 + $0x88] sm:$0xff]  ;;  %v20_v17 = vld [vmem:[%s1039_s1 + $0x18] sm:$0xff] }
   0x4   :  { %v41_v8 = vld [vmem:[%s1039_s1 + $0xc0] sm:$0xff]  ;;  %v42_v13 = vld [vmem:[%s1039_s1 + $0xc8] sm:$0xff]  ;;  %v28_v20 = vld [vmem:[%s1039_s1 + $0x58] sm:$0xff]  ;;  %v774_v22 = vcombine.high %v19_v15, %v27_v16  ;;  %v773_v29 = vcombine.low %v19_v15, %v27_v16 }
   0x5   :  { %v786_v11 = vcombine.high %v33_v7, %v41_v8  ;;  %297 = vmatprep.subr.bf16.mxu0 %v770_v4  ;;  %v788_v14 = vcombine.high %v34_v12, %v42_v13  ;;  %338 = vmatprep.subr.bf16.mxu1 %v772_v9  ;;  %v785_v18 = vcombine.low %v33_v7, %v41_v8  ;;  %v15_v19 = vld [vmem:[%s1040_s0] sm:$0x3]  ;;  %v35_v24 = vld [vmem:[%s1039_s1 + $0x90] sm:$0xff]  ;;  %v36_v27 = vld [vmem:[%s1039_s1 + $0x98] sm:$0xff]  ;;  %v53_v4 = vlaneseq }
   0x6   :  { %298 = vmatpush1.bf16.msra.mxu0 %v769_v6  ;;  %339 = vmatpush1.bf16.msra.mxu1 %v771_v10  ;;  %v787_v21 = vcombine.low %v34_v12, %v42_v13  ;;  %v776_v23 = vcombine.high %v20_v17, %v28_v20  ;;  %v43_v25 = vld [vmem:[%s1039_s1 + $0xd0] sm:$0xff]  ;;  %v880_v26 = vpack.c.bf16 %v15_v19, %v15_v19  ;;  %v44_v28 = vld [vmem:[%s1039_s1 + $0xd8] sm:$0xff]  ;;  %v21_v33 = vld [vmem:[%s1039_s1 + $0x20] sm:$0xff]  ;;  %v812_v9 = vmov 1983009808  }
   0x7   :  { %299 = vmatprep.subr.bf16.mxu0 %v786_v11  ;;  %340 = vmatprep.subr.bf16.mxu1 %v788_v14  ;;  %v775_v30 = vcombine.low %v20_v17, %v28_v20  ;;  %v790_v31 = vcombine.high %v35_v24, %v43_v25  ;;  %v792_v32 = vcombine.high %v36_v27, %v44_v28  ;;  %v29_v34 = vld [vmem:[%s1039_s1 + $0x60] sm:$0xff]  ;;  %v22_v35 = vld [vmem:[%s1039_s1 + $0x28] sm:$0xff]  ;;  %v23_v49 = vld [vmem:[%s1039_s1 + $0x30] sm:$0xff]  ;;  %v958_v5 = vshrl.u32 %v53_v4, 7 }
   0x8   :  { %v30_v36 = vld [vmem:[%s1039_s1 + $0x68] sm:$0xff]  ;;  %v789_v37 = vcombine.low %v35_v24, %v43_v25  ;;  %v791_v38 = vcombine.low %v36_v27, %v44_v28  ;;  %v778_v39 = vcombine.high %v21_v33, %v29_v34  ;;  %v37_v41 = vld [vmem:[%s1039_s1 + $0xa0] sm:$0xff]  ;;  %v777_v45 = vcombine.low %v21_v33, %v29_v34  ;;  %v31_v50 = vld [vmem:[%s1039_s1 + $0x70] sm:$0xff] }
   0x9   :  { %v780_v40 = vcombine.high %v22_v35, %v30_v36  ;;  %v45_v42 = vld [vmem:[%s1039_s1 + $0xe0] sm:$0xff]  ;;  %v38_v43 = vld [vmem:[%s1039_s1 + $0xa8] sm:$0xff]  ;;  %v779_v46 = vcombine.low %v22_v35, %v30_v36  ;;  %v24_v51 = vld [vmem:[%s1039_s1 + $0x38] sm:$0xff]  ;;  %v782_v55 = vcombine.high %v23_v49, %v31_v50  ;;  %v781_v61 = vcombine.low %v23_v49, %v31_v50 }
   0xa   :  { %300 = vmatpush1.bf16.msra.mxu0 %v785_v18  ;;  %341 = vmatpush1.bf16.msra.mxu1 %v787_v21  ;;  %v46_v44 = vld [vmem:[%s1039_s1 + $0xe8] sm:$0xff]  ;;  %v794_v47 = vcombine.high %v37_v41, %v45_v42  ;;  %v32_v52 = vld [vmem:[%s1039_s1 + $0x78] sm:$0xff]  ;;  %v793_v53 = vcombine.low %v37_v41, %v45_v42  ;;  %v39_v57 = vld [vmem:[%s1039_s1 + $0xb0] sm:$0xff]  ;;  %v55_v6 = vsub.s32 0, %v958_v5  ;;  %v63_v8 = vsub.s32 2, %v958_v5 }
   0xb   :  { %379 = vmatprep.subr.bf16.mxu0 %v774_v22  ;;  %420 = vmatprep.subr.bf16.mxu1 %v776_v23  ;;  %v796_v48 = vcombine.high %v38_v43, %v46_v44  ;;  %v795_v54 = vcombine.low %v38_v43, %v46_v44  ;;  %v784_v56 = vcombine.high %v24_v51, %v32_v52  ;;  %v47_v58 = vld [vmem:[%s1039_s1 + $0xf0] sm:$0xff]  ;;  %v40_v59 = vld [vmem:[%s1039_s1 + $0xb8] sm:$0xff]  ;;  %v49_v7 = vld [vmem:[%s1041_s2] sm:$0xff]  ;;  %v692_v10 = vunpack.c.l.s4 %v812_v9 }
   0xc   :  { %v48_v60 = vld [vmem:[%s1039_s1 + $0xf8] sm:$0xff]  ;;  %v783_v62 = vcombine.low %v24_v51, %v32_v52  ;;  %v798_v63 = vcombine.high %v39_v57, %v47_v58  ;;  %v797_v1 = vcombine.low %v39_v57, %v47_v58  ;;  %v67_v11 = vsub.s32 3, %v958_v5  ;;  %v993_v49 = vld [vmem:[%s1041_s2 + $0x8] sm:$0xff] }
   0xd   :  { %801 = vmatmul.mubr.msk.bf16.vlgmr.msra.gmra.mrb[0].mxu0 %vm293_vm0, %v880_v26  ;;  %802 = vmatmul.mubr.msk.bf16.vlgmr.msra.gmra.mrb[0].mxu1 %vm293_vm0, %v880_v26  ;;  %v800_v0 = vcombine.high %v40_v59, %v48_v60  ;;  %v799_v2 = vcombine.low %v40_v59, %v48_v60  ;;  %v56_v12 = vrot.slane %v49_v7, %v55_v6  ;;  %v693_v15 = vunpack.c.0.s8 %v692_v10 }
   0xe   :  { %380 = vmatpush1.bf16.msra.mxu0 %v773_v29  ;;  %421 = vmatpush1.bf16.msra.mxu1 %v775_v30  ;;  %v64_v13 = vrot.slane %v49_v7, %v63_v8  ;;  %v68_v16 = vrot.slane %v49_v7, %v67_v11  ;;  %v71_v21 = vsub.s32 4, %v958_v5  ;;  %v79_v22 = vsub.s32 6, %v958_v5 }
   0xf   :  { %381 = vmatprep.subr.bf16.mxu0 %v790_v31  ;;  %422 = vmatprep.subr.bf16.mxu1 %v792_v32  ;;  %v978_v25 = vsub.s32 %v693_v15, %v958_v5  ;;  %v75_v28 = vsub.s32 5, %v958_v5  ;;  %v83_v33 = vsub.s32 7, %v958_v5  ;;  %v100_v15 = vrot.slane %v993_v49, %v67_v11 }
  0x10   :  { %411 = vmatprep.mubr.bf16.mxu0 %v811_v3  ;;  %452 = vmatprep.mubr.bf16.mxu1 %v811_v3  ;;  %v80_v42 = vrot.slane %v49_v7, %v79_v22  ;;  %v104_v11 = vrot.slane %v993_v49, %v71_v21 }
  0x11   :  { %v76_v43 = vrot.slane %v49_v7, %v75_v28 }
  0x12   :  { %382 = vmatpush1.bf16.msra.mxu0 %v789_v37  ;;  %423 = vmatpush1.bf16.msra.mxu1 %v791_v38 }
  0x13   :  { %461 = vmatprep.subr.bf16.mxu0 %v778_v39  ;;  %502 = vmatprep.subr.bf16.mxu1 %v780_v40  ;;  %v72_v39 = vrot.slane %v49_v7, %v71_v21  ;;  %v108_v21 = vrot.slane %v993_v49, %v75_v28 }
  0x15   :  { %803 = vmatmul.mubr.msk.bf16.vlgmr.msra.gmra.mrb[4].mxu0 %vm293_vm0, %v880_v26  ;;  %804 = vmatmul.mubr.msk.bf16.vlgmr.msra.gmra.mrb[4].mxu1 %vm293_vm0, %v880_v26 }
  0x16   :  { %462 = vmatpush1.bf16.msra.mxu0 %v777_v45  ;;  %503 = vmatpush1.bf16.msra.mxu1 %v779_v46  ;;  %v84_v46 = vrot.slane %v49_v7, %v83_v33 }
  0x17   :  { %463 = vmatprep.subr.bf16.mxu0 %v794_v47  ;;  %504 = vmatprep.subr.bf16.mxu1 %v796_v48 }
  0x18   :  { %493 = vmatprep.mubr.bf16.mxu0 %v811_v3  ;;  %534 = vmatprep.mubr.bf16.mxu1 %v811_v3 }
  0x1a   :  { %464 = vmatpush1.bf16.msra.mxu0 %v793_v53  ;;  %505 = vmatpush1.bf16.msra.mxu1 %v795_v54 }
  0x1b   :  { %543 = vmatprep.subr.bf16.mxu0 %v782_v55  ;;  %584 = vmatprep.subr.bf16.mxu1 %v784_v56 }
  0x1d   :  { %805 = vmatmul.mubr.msk.bf16.vlgmr.msra.gmra.mrb[8].mxu0 %vm293_vm0, %v880_v26  ;;  %806 = vmatmul.mubr.msk.bf16.vlgmr.msra.gmra.mrb[8].mxu1 %vm293_vm0, %v880_v26 }
  0x1e   :  { %544 = vmatpush1.bf16.msra.mxu0 %v781_v61  ;;  %585 = vmatpush1.bf16.msra.mxu1 %v783_v62 }
  0x1f   :  { %545 = vmatprep.subr.bf16.mxu0 %v798_v63  ;;  %586 = vmatprep.subr.bf16.mxu1 %v800_v0  ;;  %v88_v63 = vrot.slane %v993_v49, %v55_v6 }
  0x20   :  { %575 = vmatprep.mubr.bf16.mxu0 %v811_v3  ;;  %616 = vmatprep.mubr.bf16.mxu1 %v811_v3  ;;  %v59_v3 = vsub.s32 1, %v958_v5 }
  0x22   :  { %546 = vmatpush1.bf16.msra.mxu0 %v797_v1  ;;  %587 = vmatpush1.bf16.msra.mxu1 %v799_v2  ;;  %v60_v14 = vrot.slane %v49_v7, %v59_v3  ;;  %v92_v6 = vrot.slane %v993_v49, %v59_v3 }
  0x25   :  { %807 = vmatmul.mubr.msk.bf16.vlgmr.msra.gmra.mrb[12].mxu0 %vm293_vm0, %v880_v26  ;;  %808 = vmatmul.mubr.msk.bf16.vlgmr.msra.gmra.mrb[12].mxu1 %vm293_vm0, %v880_v26 }
  0xe0   :  { %v331_v17 = vpop.f32.mrb[0].mxu0  ;;  %v372_v19 = vpop.f32.mrb[0].mxu1 }
  0xe1   :  { %v332_v18 = vadd.f32 %v331_v17, %v56_v12  ;;  %v333_v20 = vpop.f32.mrb[1].mxu0  ;;  %v373_v23 = vadd.f32 %v372_v19, %v64_v13  ;;  %v374_v26 = vpop.f32.mrb[1].mxu1  ;;  %v96_v12 = vrot.slane %v993_v49, %v63_v8 }
  0xe2   :  { %v334_v24 = vadd.f32 %v333_v20, %v60_v14  ;;  %v335_v27 = vpop.f32.mrb[2].mxu0  ;;  %v375_v30 = vadd.f32 %v374_v26, %v68_v16  ;;  %v376_v31 = vpop.f32.mrb[2].mxu1 }
  0xe3   :  { %vm625_vm1 = vcmp.gt.f32.partialorder %v332_v18, 0.0  ;;  %v641_v29 = vmul.f32 0.2, %v332_v18  ;;  %v336_v32 = vpop.f32.mrb[3].mxu0  ;;  %vm627_vm2 = vcmp.gt.f32.partialorder %v373_v23, 0.0  ;;  %v377_v38 = vpop.f32.mrb[3].mxu1 }
  0xe4   :  { %v643_v34 = vmul.f32 0.2, %v373_v23  ;;  %vm626_vm3 = vcmp.gt.f32.partialorder %v334_v24, 0.0  ;;  %v642_v35 = vmul.f32 0.2, %v334_v24  ;;  %vm628_vm4 = vcmp.gt.f32.partialorder %v375_v30, 0.0 }
  0xe5   :  { %v657_v36 = vsel %vm625_vm1, %v332_v18, %v641_v29  ;;  %v644_v37 = vmul.f32 0.2, %v375_v30 }
  0xe6   :  { %v659_v40 = vsel %vm627_vm2, %v373_v23, %v643_v34  ;;  %v658_v41 = vsel %vm626_vm3, %v334_v24, %v642_v35 }
  0xe7   :  { %v689_v44 = vcombine.low %v657_v36, %v658_v41  ;;  %v660_v45 = vsel %vm628_vm4, %v375_v30, %v644_v37 }
  0xe8   :  { %v690_v47 = vcombine.low %v659_v40, %v660_v45  ;;  %v413_v48 = vpop.f32.mrb[4].mxu0  ;;  %v454_v52 = vpop.f32.mrb[4].mxu1  ;;  %v116_v45 = vrot.slane %v993_v49, %v83_v33 }
  0xe9   :  { %v697_v50 = vrot.slane %v689_v44, %v978_v25  ;;  %v414_v51 = vadd.f32 %v413_v48, %v72_v39  ;;  %v415_v53 = vpop.f32.mrb[5].mxu0  ;;  %v455_v55 = vadd.f32 %v454_v52, %v80_v42  ;;  %v456_v57 = vpop.f32.mrb[5].mxu1  ;;  %v112_v42 = vrot.slane %v993_v49, %v79_v22 }
  0xea   :  { %v704_v54 = vrot.slane %v690_v47, %v978_v25  ;;  %v416_v56 = vadd.f32 %v415_v53, %v76_v43  ;;  %v417_v58 = vpop.f32.mrb[6].mxu0  ;;  %v457_v60 = vadd.f32 %v456_v57, %v84_v46  ;;  %v458_v61 = vpop.f32.mrb[6].mxu1 }
  0xeb   :  { %vm629_vm5 = vcmp.gt.f32.partialorder %v414_v51, 0.0  ;;  %v645_v59 = vmul.f32 0.2, %v414_v51  ;;  %v418_v62 = vpop.f32.mrb[7].mxu0  ;;  %vm631_vm6 = vcmp.gt.f32.partialorder %v455_v55, 0.0  ;;  %v459_v2 = vpop.f32.mrb[7].mxu1 }
  0xec   :  { %v705_v0 = vcombine.low %v697_v50, %v704_v54  ;;  %v647_v1 = vmul.f32 0.2, %v455_v55  ;;  %vm630_vm7 = vcmp.gt.f32.partialorder %v416_v56, 0.0  ;;  %v646_v7 = vmul.f32 0.2, %v416_v56 }
  0xed   :  { %v661_v4 = vsel %vm629_vm5, %v414_v51, %v645_v59  ;;  %vm632_vm8 = vcmp.gt.f32.partialorder %v457_v60, 0.0  ;;  %v648_v9 = vmul.f32 0.2, %v457_v60 }
  0xee   :  { %761 = vst [vmem:[%s1042_s3] sm:$0xff] %v705_v0  ;;  %v663_v10 = vsel %vm631_vm6, %v455_v55, %v647_v1  ;;  %v662_v13 = vsel %vm630_vm7, %v416_v56, %v646_v7 }
  0xef   :  { %v664_v14 = vsel %vm632_vm8, %v457_v60, %v648_v9  ;;  %v706_v16 = vcombine.low %v661_v4, %v662_v13 }
  0xf0   :  { %v707_v17 = vcombine.low %v663_v10, %v664_v14  ;;  %v495_v18 = vpop.f32.mrb[8].mxu0  ;;  %v536_v20 = vpop.f32.mrb[8].mxu1 }
  0xf1   :  { %v496_v19 = vadd.f32 %v495_v18, %v88_v63  ;;  %v497_v23 = vpop.f32.mrb[9].mxu0  ;;  %v714_v24 = vrot.slane %v706_v16, %v978_v25  ;;  %v537_v26 = vadd.f32 %v536_v20, %v96_v12  ;;  %v538_v29 = vpop.f32.mrb[9].mxu1 }
  0xf2   :  { %v721_v8 = vrot.slane %v707_v17, %v978_v25  ;;  %v498_v27 = vadd.f32 %v497_v23, %v92_v6  ;;  %v499_v3 = vpop.f32.mrb[10].mxu0  ;;  %v539_v31 = vadd.f32 %v538_v29, %v100_v15  ;;  %v540_v32 = vpop.f32.mrb[10].mxu1 }
  0xf3   :  { %vm633_vm9 = vcmp.gt.f32.partialorder %v496_v19, 0.0  ;;  %v649_v30 = vmul.f32 0.2, %v496_v19  ;;  %v500_v34 = vpop.f32.mrb[11].mxu0  ;;  %vm635_vm10 = vcmp.gt.f32.partialorder %v537_v26, 0.0  ;;  %v541_v37 = vpop.f32.mrb[11].mxu1 }
  0xf4   :  { %v722_v35 = vcombine.low %v714_v24, %v721_v8  ;;  %v651_v36 = vmul.f32 0.2, %v537_v26  ;;  %vm634_vm11 = vcmp.gt.f32.partialorder %v498_v27, 0.0  ;;  %v650_v39 = vmul.f32 0.2, %v498_v27 }
  0xf5   :  { %v665_v38 = vsel %vm633_vm9, %v496_v19, %v649_v30  ;;  %vm636_vm12 = vcmp.gt.f32.partialorder %v539_v31, 0.0  ;;  %v652_v40 = vmul.f32 0.2, %v539_v31 }
  0xf6   :  { %762 = vst [vmem:[%s1042_s3 + $0x8] sm:$0xff] %v722_v35  ;;  %v667_v41 = vsel %vm635_vm10, %v537_v26, %v651_v36  ;;  %v666_v43 = vsel %vm634_vm11, %v498_v27, %v650_v39 }
  0xf7   :  { %v668_v44 = vsel %vm636_vm12, %v539_v31, %v652_v40  ;;  %v723_v46 = vcombine.low %v665_v38, %v666_v43 }
  0xf8   :  { %v724_v47 = vcombine.low %v667_v41, %v668_v44  ;;  %v577_v48 = vpop.f32.mrb[12].mxu0  ;;  %v618_v51 = vpop.f32.mrb[12].mxu1 }
  0xf9   :  { %v578_v50 = vadd.f32 %v577_v48, %v104_v11  ;;  %v579_v52 = vpop.f32.mrb[13].mxu0  ;;  %v731_v53 = vrot.slane %v723_v46, %v978_v25  ;;  %v619_v54 = vadd.f32 %v618_v51, %v112_v42  ;;  %v620_v56 = vpop.f32.mrb[13].mxu1 }
  0xfa   :  { %v738_v22 = vrot.slane %v724_v47, %v978_v25  ;;  %v580_v55 = vadd.f32 %v579_v52, %v108_v21  ;;  %v581_v28 = vpop.f32.mrb[14].mxu0  ;;  %v621_v58 = vadd.f32 %v620_v56, %v116_v45  ;;  %v622_v5 = vpop.f32.mrb[14].mxu1 }
  0xfb   :  { %vm637_vm13 = vcmp.gt.f32.partialorder %v578_v50, 0.0  ;;  %v653_v57 = vmul.f32 0.2, %v578_v50  ;;  %v582_v59 = vpop.f32.mrb[15].mxu0  ;;  %vm639_vm14 = vcmp.gt.f32.partialorder %v619_v54, 0.0  ;;  %v623_v60 = vpop.f32.mrb[15].mxu1 }
  0xfc   :  { %v739_v33 = vcombine.low %v731_v53, %v738_v22  ;;  %v655_v49 = vmul.f32 0.2, %v619_v54  ;;  %vm638_vm15 = vcmp.gt.f32.partialorder %v580_v55, 0.0  ;;  %v654_v62 = vmul.f32 0.2, %v580_v55 }
  0xfd   :  { %v669_v61 = vsel %vm637_vm13, %v578_v50, %v653_v57  ;;  %vm640_vm0 = vcmp.gt.f32.partialorder %v621_v58, 0.0  ;;  %v656_v63 = vmul.f32 0.2, %v621_v58 }
  0xfe   :  { %763 = vst [vmem:[%s1042_s3 + $0x10] sm:$0xff] %v739_v33  ;;  %v671_v0 = vsel %vm639_vm14, %v619_v54, %v655_v49  ;;  %v670_v1 = vsel %vm638_vm15, %v580_v55, %v654_v62 }
  0xff   :  { %v672_v2 = vsel %vm640_vm0, %v621_v58, %v656_v63  ;;  %v740_v4 = vcombine.low %v669_v61, %v670_v1 }
 0x100   :  { %v741_v7 = vcombine.low %v671_v0, %v672_v2 }
 0x101   :  { %v748_v9 = vrot.slane %v740_v4, %v978_v25 }
 0x102   :  { %v755_v10 = vrot.slane %v741_v7, %v978_v25 }
 0x104   :  { %v756_v12 = vcombine.low %v748_v9, %v755_v10 }
 0x106   :  { %764 = vst [vmem:[%s1042_s3 + $0x18] sm:$0xff] %v756_v12 }

// kernel: vae_forward.9
= control target key start
LH: loop header
LB: loop body
LE: loop exit
PB: predicated region body
PF: predicated region fallthrough
CT: control target
= control target key end

     0   :  { %s3018_s18 = smov 0   ;;  %s3750_s0 = inlined_call_operand.vmem [shape: f32[2,8,32,8], index: 0, kind: input, shape index: {}]   ;;  %s3751_s1 = inlined_call_operand.vmem [shape: f32[5,16,160], index: 1, kind: input, shape index: {}]   ;;  %s3752_s2 = inlined_call_operand.vmem [shape: f32[16,1], index: 2, kind: input, shape index: {}]   ;;  %s3753_s3 = inlined_call_operand.vmem [shape: f32[5,8,80], index: 3, kind: input, shape index: {}]   ;;  %s3754_s4 = inlined_call_operand.vmem [shape: f32[8,1], index: 4, kind: input, shape index: {}]   ;;  %s3755_s5 = inlined_call_operand.vmem [shape: f32[2,16,8,16], index: 5, kind: output, shape index: {}]  }
   0x1 LB: > { %s2082_s19 = sadd.s32 4294967295, %s2963_s18   ;;  %p2086_p0 = scmp.ge.s32.totalorder %s2963_s18, 1  ;;  %s2963_s18 = sphi %s3018_s18, %s15_s18  }
   0x2   : > { %p187_p1 = scmp.lt.s32.totalorder %s2963_s18, 3 }
   0x4   : > { %p188_p2 = pnand %p2086_p0, %p187_p1 }
   0x5   : > { %p215_p3 = scmp.lt.s32.totalorder (!%p188_p2), %s2082_s19, 1  ;;  %p2091_p4 = scmp.ne.s32.totalorder (!%p188_p2), %s2082_s19, 0 }
   0x6   : > { %191 = sbr.rel (%p188_p2) target bundleno = 1305 (0x519), region = 40 }
   0xd   : > { %s216_s20 = scalar_select %p215_p3, %s2082_s19, 1 }
   0xe   : > { %228 = sbr.rel (%p2091_p4) target bundleno = 67 (0x43), region = 44  ;;  %vm229_vm0 = vcmask (!%p2091_p4), 130048   ;;  %vm294_vm1 = vcmask (!%p2091_p4), 162816   ;;  %v2973_v0 = vmov (!%p2091_p4), 0.0  }
   0xf   : > { %s2165_s21 = sshll.u32 %s216_s20, 8  ;;  %s2166_s22 = sshll.u32 %s216_s20, 7  ;;  %230 = vst.msk [vmem:[#allocation2] sm:$0xff] (!%p2091_p4), %vm229_vm0, %v2973_v0  ;;  %231 = vst.msk [vmem:[#allocation2 + $0x8] sm:$0xff] (!%p2091_p4), %vm229_vm0, %v2973_v0 }
  0x10   : > { %s3029_s25 = scalar_lea.vmem %s3750_s0, %s2165_s21  ;;  %s3034_s28 = scalar_lea.vmem %s3755_s5, %s2166_s22  ;;  %232 = vst.msk [vmem:[#allocation2 + $0x10] sm:$0xff] (!%p2091_p4), %vm229_vm0, %v2973_v0  ;;  %233 = vst.msk [vmem:[#allocation2 + $0x18] sm:$0xff] (!%p2091_p4), %vm229_vm0, %v2973_v0 }
  0x11   : > { %234 = vst.msk [vmem:[#allocation2 + $0x20] sm:$0xff] (!%p2091_p4), %vm229_vm0, %v2973_v0  ;;  %235 = vst.msk [vmem:[#allocation2 + $0x28] sm:$0xff] (!%p2091_p4), %vm229_vm0, %v2973_v0 }
  0x12   : > { %236 = vst.msk [vmem:[#allocation2 + $0x30] sm:$0xff] (!%p2091_p4), %vm229_vm0, %v2973_v0  ;;  %237 = vst.msk [vmem:[#allocation2 + $0x38] sm:$0xff] (!%p2091_p4), %vm229_vm0, %v2973_v0 }
  0x13   : > { %238 = vst.msk [vmem:[#allocation2 + $0x40] sm:$0xff] (!%p2091_p4), %vm229_vm0, %v2973_v0  ;;  %239 = vst.msk [vmem:[#allocation2 + $0x48] sm:$0xff] (!%p2091_p4), %vm229_vm0, %v2973_v0 }
  0x14   : > { %240 = vst.msk [vmem:[#allocation2 + $0x50] sm:$0xff] (!%p2091_p4), %vm229_vm0, %v2973_v0  ;;  %241 = vst.msk [vmem:[#allocation2 + $0x58] sm:$0xff] (!%p2091_p4), %vm229_vm0, %v2973_v0 }
  0x15   : > { %242 = vst.msk [vmem:[#allocation2 + $0x60] sm:$0xff] %vm229_vm0, %v2973_v0  ;;  %243 = vst.msk [vmem:[#allocation2 + $0x68] sm:$0xff] %vm229_vm0, %v2973_v0 }
  0x16   : > { %244 = vst.msk [vmem:[#allocation2 + $0x70] sm:$0xff] %vm229_vm0, %v2973_v0  ;;  %245 = vst.msk [vmem:[#allocation2 + $0x78] sm:$0xff] %vm229_vm0, %v2973_v0 }
  0x17   : > { %246 = vst.msk [vmem:[#allocation2 + $0x80] sm:$0xff] %vm229_vm0, %v2973_v0  ;;  %247 = vst.msk [vmem:[#allocation2 + $0x88] sm:$0xff] %vm229_vm0, %v2973_v0 }
  0x18   : > { %248 = vst.msk [vmem:[#allocation2 + $0x90] sm:$0xff] %vm229_vm0, %v2973_v0  ;;  %249 = vst.msk [vmem:[#allocation2 + $0x98] sm:$0xff] %vm229_vm0, %v2973_v0 }
  0x19   : > { %250 = vst.msk [vmem:[#allocation2 + $0xa0] sm:$0xff] %vm229_vm0, %v2973_v0  ;;  %251 = vst.msk [vmem:[#allocation2 + $0xa8] sm:$0xff] %vm229_vm0, %v2973_v0 }
  0x1a   : > { %252 = vst.msk [vmem:[#allocation2 + $0xb0] sm:$0xff] %vm229_vm0, %v2973_v0  ;;  %253 = vst.msk [vmem:[#allocation2 + $0xb8] sm:$0xff] %vm229_vm0, %v2973_v0 }
  0x1b   : > { %254 = vst.msk [vmem:[#allocation2 + $0xc0] sm:$0xff] %vm229_vm0, %v2973_v0  ;;  %255 = vst.msk [vmem:[#allocation2 + $0xc8] sm:$0xff] %vm229_vm0, %v2973_v0 }
  0x1c   : > { %256 = vst.msk [vmem:[#allocation2 + $0xd0] sm:$0xff] %vm229_vm0, %v2973_v0  ;;  %257 = vst.msk [vmem:[#allocation2 + $0xd8] sm:$0xff] %vm229_vm0, %v2973_v0 }
  0x1d   : > { %258 = vst.msk [vmem:[#allocation2 + $0xe0] sm:$0xff] %vm229_vm0, %v2973_v0  ;;  %259 = vst.msk [vmem:[#allocation2 + $0xe8] sm:$0xff] %vm229_vm0, %v2973_v0 }
  0x1e   : > { %260 = vst.msk [vmem:[#allocation2 + $0xf0] sm:$0xff] %vm229_vm0, %v2973_v0  ;;  %261 = vst.msk [vmem:[#allocation2 + $0xf8] sm:$0xff] %vm229_vm0, %v2973_v0 }
  0x1f   : > { %262 = vst.msk [vmem:[#allocation2 + $0x100] sm:$0xff] %vm229_vm0, %v2973_v0  ;;  %263 = vst.msk [vmem:[#allocation2 + $0x108] sm:$0xff] %vm229_vm0, %v2973_v0 }
  0x20   : > { %264 = vst.msk [vmem:[#allocation2 + $0x110] sm:$0xff] %vm229_vm0, %v2973_v0  ;;  %265 = vst.msk [vmem:[#allocation2 + $0x118] sm:$0xff] %vm229_vm0, %v2973_v0 }
  0x21   : > { %266 = vst.msk [vmem:[#allocation2 + $0x120] sm:$0xff] %vm229_vm0, %v2973_v0  ;;  %267 = vst.msk [vmem:[#allocation2 + $0x128] sm:$0xff] %vm229_vm0, %v2973_v0 }
  0x22   : > { %268 = vst.msk [vmem:[#allocation2 + $0x130] sm:$0xff] %vm229_vm0, %v2973_v0  ;;  %269 = vst.msk [vmem:[#allocation2 + $0x138] sm:$0xff] %vm229_vm0, %v2973_v0 }
  0x23   : > { %270 = vst.msk [vmem:[#allocation2 + $0x140] sm:$0xff] %vm229_vm0, %v2973_v0  ;;  %271 = vst.msk [vmem:[#allocation2 + $0x148] sm:$0xff] %vm229_vm0, %v2973_v0 }
  0x24   : > { %272 = vst.msk [vmem:[#allocation2 + $0x150] sm:$0xff] %vm229_vm0, %v2973_v0  ;;  %273 = vst.msk [vmem:[#allocation2 + $0x158] sm:$0xff] %vm229_vm0, %v2973_v0 }
  0x25   : > { %274 = vst.msk [vmem:[#allocation2 + $0x160] sm:$0xff] %vm229_vm0, %v2973_v0  ;;  %275 = vst.msk [vmem:[#allocation2 + $0x168] sm:$0xff] %vm229_vm0, %v2973_v0 }
  0x26   : > { %276 = vst.msk [vmem:[#allocation2 + $0x170] sm:$0xff] %vm229_vm0, %v2973_v0  ;;  %277 = vst.msk [vmem:[#allocation2 + $0x178] sm:$0xff] %vm229_vm0, %v2973_v0 }
  0x27   : > { %278 = vst.msk [vmem:[#allocation2 + $0x180] sm:$0xff] %vm229_vm0, %v2973_v0  ;;  %279 = vst.msk [vmem:[#allocation2 + $0x188] sm:$0xff] %vm229_vm0, %v2973_v0 }
  0x28   : > { %280 = vst.msk [vmem:[#allocation2 + $0x190] sm:$0xff] %vm229_vm0, %v2973_v0  ;;  %281 = vst.msk [vmem:[#allocation2 + $0x198] sm:$0xff] %vm229_vm0, %v2973_v0 }
  0x29   : > { %282 = vst.msk [vmem:[#allocation2 + $0x1a0] sm:$0xff] %vm229_vm0, %v2973_v0  ;;  %283 = vst.msk [vmem:[#allocation2 + $0x1a8] sm:$0xff] %vm229_vm0, %v2973_v0 }
  0x2a   : > { %284 = vst.msk [vmem:[#allocation2 + $0x1b0] sm:$0xff] %vm229_vm0, %v2973_v0  ;;  %285 = vst.msk [vmem:[#allocation2 + $0x1b8] sm:$0xff] %vm229_vm0, %v2973_v0 }
  0x2b   : > { %286 = vst.msk [vmem:[#allocation2 + $0x1c0] sm:$0xff] %vm229_vm0, %v2973_v0  ;;  %287 = vst.msk [vmem:[#allocation2 + $0x1c8] sm:$0xff] %vm229_vm0, %v2973_v0 }
  0x2c   : > { %288 = vst.msk [vmem:[#allocation2 + $0x1d0] sm:$0xff] %vm229_vm0, %v2973_v0  ;;  %289 = vst.msk [vmem:[#allocation2 + $0x1d8] sm:$0xff] %vm229_vm0, %v2973_v0 }
  0x2d   : > { %290 = vst.msk [vmem:[#allocation2 + $0x1e0] sm:$0xff] %vm229_vm0, %v2973_v0  ;;  %291 = vst.msk [vmem:[#allocation2 + $0x1e8] sm:$0xff] %vm229_vm0, %v2973_v0 }
  0x2e   : > { %292 = vst.msk [vmem:[#allocation2 + $0x1f0] sm:$0xff] %vm229_vm0, %v2973_v0  ;;  %293 = vst.msk [vmem:[#allocation2 + $0x1f8] sm:$0xff] %vm229_vm0, %v2973_v0 }
  0x2f   : > { %295 = vst.msk [vmem:[#allocation4] sm:$0xff] %vm294_vm1, %v2973_v0  ;;  %296 = vst.msk [vmem:[#allocation4 + $0x8] sm:$0xff] %vm294_vm1, %v2973_v0 }
  0x30   : > { %297 = vst.msk [vmem:[#allocation4 + $0x10] sm:$0xff] %vm294_vm1, %v2973_v0  ;;  %298 = vst.msk [vmem:[#allocation4 + $0x18] sm:$0xff] %vm294_vm1, %v2973_v0 }
  0x31   : > { %299 = vst.msk [vmem:[#allocation4 + $0x20] sm:$0xff] %vm294_vm1, %v2973_v0  ;;  %300 = vst.msk [vmem:[#allocation4 + $0x28] sm:$0xff] %vm294_vm1, %v2973_v0 }
  0x32   : > { %301 = vst.msk [vmem:[#allocation4 + $0x30] sm:$0xff] %vm294_vm1, %v2973_v0  ;;  %302 = vst.msk [vmem:[#allocation4 + $0x38] sm:$0xff] %vm294_vm1, %v2973_v0 }
  0x33   : > { %303 = vst.msk [vmem:[#allocation4 + $0x40] sm:$0xff] %vm294_vm1, %v2973_v0  ;;  %304 = vst.msk [vmem:[#allocation4 + $0x48] sm:$0xff] %vm294_vm1, %v2973_v0 }
  0x34   : > { %305 = vst.msk [vmem:[#allocation4 + $0x50] sm:$0xff] %vm294_vm1, %v2973_v0  ;;  %306 = vst.msk [vmem:[#allocation4 + $0x58] sm:$0xff] %vm294_vm1, %v2973_v0 }
  0x35   : > { %307 = vst.msk [vmem:[#allocation4 + $0x60] sm:$0xff] %vm294_vm1, %v2973_v0  ;;  %308 = vst.msk [vmem:[#allocation4 + $0x68] sm:$0xff] %vm294_vm1, %v2973_v0 }
  0x36   : > { %309 = vst.msk [vmem:[#allocation4 + $0x70] sm:$0xff] %vm294_vm1, %v2973_v0  ;;  %310 = vst.msk [vmem:[#allocation4 + $0x78] sm:$0xff] %vm294_vm1, %v2973_v0 }
  0x37   : > { %311 = vst.msk [vmem:[#allocation4 + $0x80] sm:$0xff] %vm294_vm1, %v2973_v0  ;;  %312 = vst.msk [vmem:[#allocation4 + $0x88] sm:$0xff] %vm294_vm1, %v2973_v0 }
  0x38   : > { %313 = vst.msk [vmem:[#allocation4 + $0x90] sm:$0xff] %vm294_vm1, %v2973_v0  ;;  %314 = vst.msk [vmem:[#allocation4 + $0x98] sm:$0xff] %vm294_vm1, %v2973_v0 }
  0x39   : > { %315 = vst.msk [vmem:[#allocation4 + $0xa0] sm:$0xff] %vm294_vm1, %v2973_v0  ;;  %316 = vst.msk [vmem:[#allocation4 + $0xa8] sm:$0xff] %vm294_vm1, %v2973_v0 }
  0x3a   : > { %317 = vst.msk [vmem:[#allocation4 + $0xb0] sm:$0xff] %vm294_vm1, %v2973_v0  ;;  %318 = vst.msk [vmem:[#allocation4 + $0xb8] sm:$0xff] %vm294_vm1, %v2973_v0 }
  0x3b   : > { %319 = vst.msk [vmem:[#allocation4 + $0xc0] sm:$0xff] %vm294_vm1, %v2973_v0  ;;  %320 = vst.msk [vmem:[#allocation4 + $0xc8] sm:$0xff] %vm294_vm1, %v2973_v0 }
  0x3c   : > { %321 = vst.msk [vmem:[#allocation4 + $0xd0] sm:$0xff] %vm294_vm1, %v2973_v0  ;;  %322 = vst.msk [vmem:[#allocation4 + $0xd8] sm:$0xff] %vm294_vm1, %v2973_v0 }
  0x3d   : > { %323 = vst.msk [vmem:[#allocation4 + $0xe0] sm:$0xff] %vm294_vm1, %v2973_v0  ;;  %324 = vst.msk [vmem:[#allocation4 + $0xe8] sm:$0xff] %vm294_vm1, %v2973_v0 }
  0x3e   : > { %325 = vst.msk [vmem:[#allocation4 + $0xf0] sm:$0xff] %vm294_vm1, %v2973_v0  ;;  %326 = vst.msk [vmem:[#allocation4 + $0xf8] sm:$0xff] %vm294_vm1, %v2973_v0 }
  0x3f   : > { %327 = vst.msk [vmem:[#allocation4 + $0x100] sm:$0xff] %vm294_vm1, %v2973_v0  ;;  %328 = vst.msk [vmem:[#allocation4 + $0x108] sm:$0xff] %vm294_vm1, %v2973_v0 }
  0x40   : > { %329 = vst.msk [vmem:[#allocation4 + $0x110] sm:$0xff] %vm294_vm1, %v2973_v0  ;;  %330 = vst.msk [vmem:[#allocation4 + $0x118] sm:$0xff] %vm294_vm1, %v2973_v0 }
  0x41   : > { %331 = vst.msk [vmem:[#allocation4 + $0x120] sm:$0xff] %vm294_vm1, %v2973_v0  ;;  %332 = vst.msk [vmem:[#allocation4 + $0x128] sm:$0xff] %vm294_vm1, %v2973_v0 }
  0x42   : > { %333 = vst.msk [vmem:[#allocation4 + $0x130] sm:$0xff] %vm294_vm1, %v2973_v0  ;;  %334 = vst.msk [vmem:[#allocation4 + $0x138] sm:$0xff] %vm294_vm1, %v2973_v0 }
  0x43 PF: > { %v337_v1 = vld [vmem:[%s3029_s25 + $0x10] sm:$0xff]  ;;  %v335_v2 = vld [vmem:[%s3029_s25] sm:$0xff]  ;;  %s2974_s29 = smov 4   ;;  %v338_v3 = vld [vmem:[%s3029_s25 + $0x18] sm:$0xff]  ;;  %v2975_v5 = vmov 0   ;;  %vm496_vm2 = vcmask 97312  }
  0x44   : > { %403 = vrot.lane.b32.xlu1 %v337_v1, %s2974_s29  ;;  %399 = vrot.lane.b32.xlu0 %v335_v2, %s2974_s29  ;;  %v336_v4 = vld [vmem:[%s3029_s25 + $0x8] sm:$0xff]  ;;  %v529_v7 = vld [vmem:[%s3752_s2] sm:$0xff]  ;;  %s3352_s9 = smov 0  }
  0x45   : > { %2645 = vset.pattern.permute.xlu1 %v2975_v5  ;;  %2644 = vset.pattern.permute.xlu0 %v2975_v5  ;;  %v530_v6 = vld [vmem:[%s3752_s2 + $0x8] sm:$0xff]  ;;  %v339_v8 = vld [vmem:[%s3029_s25 + $0x20] sm:$0xff]  ;;  %v341_v10 = vld [vmem:[%s3029_s25 + $0x30] sm:$0xff] }
  0x46   : > { %v340_v9 = vld [vmem:[%s3029_s25 + $0x28] sm:$0xff]  ;;  %v342_v11 = vld [vmem:[%s3029_s25 + $0x38] sm:$0xff]  ;;  %v343_v12 = vld [vmem:[%s3029_s25 + $0x40] sm:$0xff] }
  0x47   : > { %v344_v13 = vld [vmem:[%s3029_s25 + $0x48] sm:$0xff]  ;;  %v345_v14 = vld [vmem:[%s3029_s25 + $0x50] sm:$0xff]  ;;  %v346_v15 = vld [vmem:[%s3029_s25 + $0x58] sm:$0xff] }
  0x48   : > { %405 = vrot.lane.b32.xlu1 %v338_v3, %s2974_s29  ;;  %401 = vrot.lane.b32.xlu0 %v336_v4, %s2974_s29  ;;  %v347_v16 = vld [vmem:[%s3029_s25 + $0x60] sm:$0xff]  ;;  %v348_v17 = vld [vmem:[%s3029_s25 + $0x68] sm:$0xff] }
  0x49   : > { %v349_v18 = vld [vmem:[%s3029_s25 + $0x70] sm:$0xff]  ;;  %v350_v19 = vld [vmem:[%s3029_s25 + $0x78] sm:$0xff]  ;;  %v351_v20 = vld [vmem:[%s3029_s25 + $0x80] sm:$0xff] }
  0x4a   : > { %v352_v21 = vld [vmem:[%s3029_s25 + $0x88] sm:$0xff]  ;;  %v353_v22 = vld [vmem:[%s3029_s25 + $0x90] sm:$0xff]  ;;  %v354_v23 = vld [vmem:[%s3029_s25 + $0x98] sm:$0xff] }
  0x4b   : > { %v355_v24 = vld [vmem:[%s3029_s25 + $0xa0] sm:$0xff]  ;;  %v356_v25 = vld [vmem:[%s3029_s25 + $0xa8] sm:$0xff]  ;;  %v357_v26 = vld [vmem:[%s3029_s25 + $0xb0] sm:$0xff] }
  0x4c   : > { %538 = vperm.xlu1 %2645, %v530_v6   ;;  %533 = vperm.xlu0 %2644, %v529_v7   ;;  %v358_v27 = vld [vmem:[%s3029_s25 + $0xb8] sm:$0xff]  ;;  %v359_v28 = vld [vmem:[%s3029_s25 + $0xc0] sm:$0xff]  ;;  %v360_v29 = vld [vmem:[%s3029_s25 + $0xc8] sm:$0xff] }
  0x4d   : > { %v361_v30 = vld [vmem:[%s3029_s25 + $0xd0] sm:$0xff]  ;;  %v362_v31 = vld [vmem:[%s3029_s25 + $0xd8] sm:$0xff]  ;;  %v363_v32 = vld [vmem:[%s3029_s25 + $0xe0] sm:$0xff] }
  0x4e   : > { %v364_v33 = vld [vmem:[%s3029_s25 + $0xe8] sm:$0xff]  ;;  %v365_v34 = vld [vmem:[%s3029_s25 + $0xf0] sm:$0xff]  ;;  %v366_v35 = vld [vmem:[%s3029_s25 + $0xf8] sm:$0xff] }
  0x50   : > { %407 = vrot.lane.b32.xlu1 %v339_v8, %s2974_s29  ;;  %409 = vrot.lane.b32.xlu0 %v340_v9, %s2974_s29 }
  0x54   : > { %411 = vrot.lane.b32.xlu1 %v341_v10, %s2974_s29  ;;  %413 = vrot.lane.b32.xlu0 %v342_v11, %s2974_s29 }
  0x58   : > { %415 = vrot.lane.b32.xlu1 %v343_v12, %s2974_s29  ;;  %417 = vrot.lane.b32.xlu0 %v344_v13, %s2974_s29 }
  0x5c   : > { %419 = vrot.lane.b32.xlu1 %v345_v14, %s2974_s29  ;;  %421 = vrot.lane.b32.xlu0 %v346_v15, %s2974_s29 }
  0x60   : > { %423 = vrot.lane.b32.xlu1 %v347_v16, %s2974_s29  ;;  %425 = vrot.lane.b32.xlu0 %v348_v17, %s2974_s29 }
  0x64   : > { %427 = vrot.lane.b32.xlu1 %v349_v18, %s2974_s29  ;;  %429 = vrot.lane.b32.xlu0 %v350_v19, %s2974_s29 }
  0x68   : > { %431 = vrot.lane.b32.xlu1 %v351_v20, %s2974_s29  ;;  %433 = vrot.lane.b32.xlu0 %v352_v21, %s2974_s29 }
  0x6c   : > { %435 = vrot.lane.b32.xlu1 %v353_v22, %s2974_s29  ;;  %437 = vrot.lane.b32.xlu0 %v354_v23, %s2974_s29 }
  0x70   : > { %439 = vrot.lane.b32.xlu1 %v355_v24, %s2974_s29  ;;  %441 = vrot.lane.b32.xlu0 %v356_v25, %s2974_s29 }
  0x74   : > { %443 = vrot.lane.b32.xlu1 %v357_v26, %s2974_s29  ;;  %445 = vrot.lane.b32.xlu0 %v358_v27, %s2974_s29 }
  0x78   : > { %447 = vrot.lane.b32.xlu1 %v359_v28, %s2974_s29  ;;  %449 = vrot.lane.b32.xlu0 %v360_v29, %s2974_s29 }
  0x7c   : > { %451 = vrot.lane.b32.xlu1 %v361_v30, %s2974_s29  ;;  %453 = vrot.lane.b32.xlu0 %v362_v31, %s2974_s29 }
  0x80   : > { %455 = vrot.lane.b32.xlu1 %v363_v32, %s2974_s29  ;;  %457 = vrot.lane.b32.xlu0 %v364_v33, %s2974_s29 }
  0x84   : > { %459 = vrot.lane.b32.xlu1 %v365_v34, %s2974_s29  ;;  %461 = vrot.lane.b32.xlu0 %v366_v35, %s2974_s29 }
  0xb6   : > { %v404_v36 = vpop.permute.xlu1 %403  ;;  %v400_v37 = vpop.permute.xlu0 %399 }
  0xb7   : > { %499 = vst.msk [vmem:[#allocation2 + $0x90] sm:$0xff] %vm496_vm2, %v404_v36  ;;  %497 = vst.msk [vmem:[#allocation2 + $0x80] sm:$0xff] %vm496_vm2, %v400_v37 }
  0xba   : > { %v406_v38 = vpop.permute.xlu1 %405  ;;  %v402_v39 = vpop.permute.xlu0 %401 }
  0xbb   : > { %500 = vst.msk [vmem:[#allocation2 + $0x98] sm:$0xff] %vm496_vm2, %v406_v38  ;;  %498 = vst.msk [vmem:[#allocation2 + $0x88] sm:$0xff] %vm496_vm2, %v402_v39 }
  0xcb   : > { %v3320_v40 = vpop.permute.xlu1 %538  ;;  %v3322_v41 = vpop.permute.xlu0 %533 }
  0xcf   : > { %v408_v42 = vpop.permute.xlu1 %407  ;;  %v410_v43 = vpop.permute.xlu0 %409 }
  0xd0   : > { %501 = vst.msk [vmem:[#allocation2 + $0xa0] sm:$0xff] %vm496_vm2, %v408_v42  ;;  %502 = vst.msk [vmem:[#allocation2 + $0xa8] sm:$0xff] %vm496_vm2, %v410_v43 }
  0xd3   : > { %v412_v44 = vpop.permute.xlu1 %411  ;;  %v414_v45 = vpop.permute.xlu0 %413 }
  0xd4   : > { %503 = vst.msk [vmem:[#allocation2 + $0xb0] sm:$0xff] %vm496_vm2, %v412_v44  ;;  %504 = vst.msk [vmem:[#allocation2 + $0xb8] sm:$0xff] %vm496_vm2, %v414_v45 }
  0xd7   : > { %v416_v46 = vpop.permute.xlu1 %415  ;;  %v418_v47 = vpop.permute.xlu0 %417 }
  0xd8   : > { %505 = vst.msk [vmem:[#allocation2 + $0xc0] sm:$0xff] %vm496_vm2, %v416_v46  ;;  %506 = vst.msk [vmem:[#allocation2 + $0xc8] sm:$0xff] %vm496_vm2, %v418_v47 }
  0xdb   : > { %v420_v48 = vpop.permute.xlu1 %419  ;;  %v422_v49 = vpop.permute.xlu0 %421 }
  0xdc   : > { %507 = vst.msk [vmem:[#allocation2 + $0xd0] sm:$0xff] %vm496_vm2, %v420_v48  ;;  %508 = vst.msk [vmem:[#allocation2 + $0xd8] sm:$0xff] %vm496_vm2, %v422_v49 }
  0xdf   : > { %v424_v50 = vpop.permute.xlu1 %423  ;;  %v426_v51 = vpop.permute.xlu0 %425 }
  0xe0   : > { %509 = vst.msk [vmem:[#allocation2 + $0xe0] sm:$0xff] %vm496_vm2, %v424_v50  ;;  %510 = vst.msk [vmem:[#allocation2 + $0xe8] sm:$0xff] %vm496_vm2, %v426_v51 }
  0xe3   : > { %v428_v52 = vpop.permute.xlu1 %427  ;;  %v430_v53 = vpop.permute.xlu0 %429 }
  0xe4   : > { %511 = vst.msk [vmem:[#allocation2 + $0xf0] sm:$0xff] %vm496_vm2, %v428_v52  ;;  %512 = vst.msk [vmem:[#allocation2 + $0xf8] sm:$0xff] %vm496_vm2, %v430_v53 }
  0xe7   : > { %v432_v54 = vpop.permute.xlu1 %431  ;;  %v434_v55 = vpop.permute.xlu0 %433 }
  0xe8   : > { %513 = vst.msk [vmem:[#allocation2 + $0x100] sm:$0xff] %vm496_vm2, %v432_v54  ;;  %514 = vst.msk [vmem:[#allocation2 + $0x108] sm:$0xff] %vm496_vm2, %v434_v55 }
  0xeb   : > { %v436_v56 = vpop.permute.xlu1 %435  ;;  %v438_v57 = vpop.permute.xlu0 %437 }
  0xec   : > { %515 = vst.msk [vmem:[#allocation2 + $0x110] sm:$0xff] %vm496_vm2, %v436_v56  ;;  %516 = vst.msk [vmem:[#allocation2 + $0x118] sm:$0xff] %vm496_vm2, %v438_v57 }
  0xef   : > { %v440_v58 = vpop.permute.xlu1 %439  ;;  %v442_v59 = vpop.permute.xlu0 %441 }
  0xf0   : > { %517 = vst.msk [vmem:[#allocation2 + $0x120] sm:$0xff] %vm496_vm2, %v440_v58  ;;  %518 = vst.msk [vmem:[#allocation2 + $0x128] sm:$0xff] %vm496_vm2, %v442_v59 }
  0xf3   : > { %v444_v60 = vpop.permute.xlu1 %443  ;;  %v446_v61 = vpop.permute.xlu0 %445 }
  0xf4   : > { %519 = vst.msk [vmem:[#allocation2 + $0x130] sm:$0xff] %vm496_vm2, %v444_v60  ;;  %520 = vst.msk [vmem:[#allocation2 + $0x138] sm:$0xff] %vm496_vm2, %v446_v61 }
  0xf7   : > { %v448_v62 = vpop.permute.xlu1 %447  ;;  %v450_v63 = vpop.permute.xlu0 %449 }
  0xf8   : > { %521 = vst.msk [vmem:[#allocation2 + $0x140] sm:$0xff] %vm496_vm2, %v448_v62  ;;  %522 = vst.msk [vmem:[#allocation2 + $0x148] sm:$0xff] %vm496_vm2, %v450_v63 }
  0xfb   : > { %v452_v0 = vpop.permute.xlu1 %451  ;;  %v454_v1 = vpop.permute.xlu0 %453 }
  0xfc   : > { %523 = vst.msk [vmem:[#allocation2 + $0x150] sm:$0xff] %vm496_vm2, %v452_v0  ;;  %524 = vst.msk [vmem:[#allocation2 + $0x158] sm:$0xff] %vm496_vm2, %v454_v1 }
  0xff   : > { %v456_v2 = vpop.permute.xlu1 %455  ;;  %v458_v3 = vpop.permute.xlu0 %457 }
 0x100   : > { %525 = vst.msk [vmem:[#allocation2 + $0x160] sm:$0xff] %vm496_vm2, %v456_v2  ;;  %526 = vst.msk [vmem:[#allocation2 + $0x168] sm:$0xff] %vm496_vm2, %v458_v3 }
 0x103   : > { %v460_v4 = vpop.permute.xlu1 %459  ;;  %v462_v6 = vpop.permute.xlu0 %461 }
 0x104   : > { %527 = vst.msk [vmem:[#allocation2 + $0x170] sm:$0xff] %vm496_vm2, %v460_v4  ;;  %528 = vst.msk [vmem:[#allocation2 + $0x178] sm:$0xff] %vm496_vm2, %v462_v6 }
 0x105 LB: >> { %v2976_v7 = vmov 0.0|0.0   ;;  %s2092_s10 = sshll.u32 %s2967_s9, 5  ;;  %s2977_s12 = smov 126   ;;  %v582_v35 = vld [vmem:[%s3751_s1 + $0x8] sm:$0xff]  ;;  %vm585_vm3 = vcmask 261120   ;;  %v581_v52 = vld [vmem:[%s3751_s1] sm:$0xff]  ;;  %s2967_s9 = sphi %s3352_s9, %s546_s9  }
 0x106   : >> { %2337 = vmatprep.subr.bf16.mxu1 %v2976_v7  ;;  %2397 = vmatprep.subr.bf16.mxu0 %v2976_v7  ;;  %s3360_s11 = scalar_lea.vmem [#allocation2], %s2092_s10  ;;  %s2978_s15 = smov 127   ;;  %v2122_v47 = vld [vmem:[%s3751_s1 + $0x48] sm:$0xff]  ;;  %v584_v53 = vld [vmem:[%s3751_s1 + $0x18] sm:$0xff]  ;;  %v583_v54 = vld [vmem:[%s3751_s1 + $0x10] sm:$0xff]  ;;  %vm1285_vm4 = vcmask 97280  }
 0x107   : >> { %2113 = vmatprep.mubr.msk.f32.mxu1 %vm585_vm3, %v582_v35  ;;  %s2979_s16 = smov 125   ;;  %2125 = vmatprep.mubr.msk.f32.mxu0 %vm585_vm3, %v2122_v47  ;;  %v2116_v55 = vld [vmem:[%s3751_s1 + $0x28] sm:$0xff]  ;;  %s2980_s30 = smov 124  }
 0x108   : >> { %s2139_s14 = sshll.u32 %s2967_s9, 4  ;;  %s546_s9 = sadd.s32 1, %s2967_s9  }
 0x109   : >> { %p543_p5 = scmp.ge.s32.totalorder %s546_s9, 12  }
 0x10a   : > { %2846 = vset.pattern.permute.xlu0 (%p543_p5), %v2975_v5  ;;  %vm1409_vm5 = vcmask (%p543_p5), 130080  }
 0x10b   : >> { %v549_v8 = vld [vmem:[%s3360_s11] sm:$0xff]  ;;  %v550_v9 = vld [vmem:[%s3360_s11 + $0x8] sm:$0xff]  ;;  %v551_v13 = vld [vmem:[%s3360_s11 + $0x10] sm:$0xff] }
 0x10c   : >> { %v2094_v10 = vld [vmem:[%s3360_s11 + $0x20] sm:$0xff]  ;;  %v3365_v11 = vpack.i.bf16 %v550_v9, %v549_v8  ;;  %v2095_v12 = vld [vmem:[%s3360_s11 + $0x28] sm:$0xff]  ;;  %v552_v14 = vld [vmem:[%s3360_s11 + $0x18] sm:$0xff]  ;;  %v2338_v31 = vpack.c.bf16 %v550_v9, %v549_v8 }
 0x10d   : >> { %v3370_v15 = vpack.i.bf16 %v2095_v12, %v2094_v10  ;;  %v2096_v16 = vld [vmem:[%s3360_s11 + $0x30] sm:$0xff]  ;;  %v2097_v17 = vld [vmem:[%s3360_s11 + $0x38] sm:$0xff]  ;;  %v3376_v18 = vpack.i.bf16 %v552_v14, %v551_v13  ;;  %v2099_v20 = vld [vmem:[%s3360_s11 + $0x40] sm:$0xff]  ;;  %v2341_v38 = vpack.c.bf16 %v552_v14, %v551_v13  ;;  %v2344_v43 = vpack.c.bf16 %v2095_v12, %v2094_v10 }
 0x10e   : >> { %2647 = vrot.lane.b32.xlu0 %v3365_v11, %s2977_s12  ;;  %v3380_v19 = vpack.i.bf16 %v2097_v17, %v2096_v16  ;;  %v2100_v21 = vld [vmem:[%s3360_s11 + $0x48] sm:$0xff]  ;;  %v2101_v22 = vld [vmem:[%s3360_s11 + $0x50] sm:$0xff]  ;;  %v2102_v23 = vld [vmem:[%s3360_s11 + $0x58] sm:$0xff]  ;;  %2339 = vmatpush1.bf16.msra.mxu1 %v2338_v31  ;;  %v2347_v44 = vpack.c.bf16 %v2097_v17, %v2096_v16 }
 0x10f   : >> { %2657 = vrot.lane.b32.xlu1 %v3370_v15, %s2977_s12  ;;  %v3388_v24 = vpack.i.bf16 %v2100_v21, %v2099_v20  ;;  %v3392_v25 = vpack.i.bf16 %v2102_v23, %v2101_v22  ;;  %v2104_v26 = vld [vmem:[%s3360_s11 + $0x60] sm:$0xff]  ;;  %v2105_v27 = vld [vmem:[%s3360_s11 + $0x68] sm:$0xff]  ;;  %v2106_v28 = vld [vmem:[%s3360_s11 + $0x70] sm:$0xff]  ;;  %2340 = vmatprep.subr.bf16.mxu1 %v2976_v7  ;;  %v2350_v45 = vpack.c.bf16 %v2100_v21, %v2099_v20 }
 0x110   : >> { %v2107_v29 = vld [vmem:[%s3360_s11 + $0x78] sm:$0xff]  ;;  %v3400_v30 = vpack.i.bf16 %v2105_v27, %v2104_v26  ;;  %v2109_v33 = vld [vmem:[%s3360_s11 + $0x80] sm:$0xff]  ;;  %v2110_v34 = vld [vmem:[%s3360_s11 + $0x88] sm:$0xff]  ;;  %v2353_v46 = vpack.c.bf16 %v2102_v23, %v2101_v22  ;;  %v2356_v48 = vpack.c.bf16 %v2105_v27, %v2104_v26 }
 0x111   : >> { %v3404_v32 = vpack.i.bf16 %v2107_v29, %v2106_v28  ;;  %v2111_v36 = vld [vmem:[%s3360_s11 + $0x90] sm:$0xff]  ;;  %v2112_v37 = vld [vmem:[%s3360_s11 + $0x98] sm:$0xff]  ;;  %v3417_v39 = vpack.i.bf16 %v2110_v34, %v2109_v33  ;;  %v2359_v49 = vpack.c.bf16 %v2107_v29, %v2106_v28  ;;  %v2362_v50 = vpack.c.bf16 %v2110_v34, %v2109_v33 }
 0x112   : >> { %2652 = vrot.lane.b32.xlu0 %v3376_v18, %s2977_s12  ;;  %v3421_v42 = vpack.i.bf16 %v2112_v37, %v2111_v36  ;;  %2342 = vmatpush1.bf16.msra.mxu1 %v2341_v38  ;;  %v2365_v51 = vpack.c.bf16 %v2112_v37, %v2111_v36 }
 0x113   : >> { %2662 = vrot.lane.b32.xlu1 %v3380_v19, %s2977_s12  ;;  %2343 = vmatprep.subr.bf16.mxu1 %v2976_v7 }
 0x116   : >> { %2667 = vrot.lane.b32.xlu0 %v3388_v24, %s2977_s12  ;;  %2345 = vmatpush1.bf16.msra.mxu1 %v2344_v43 }
 0x117   : >> { %2672 = vrot.lane.b32.xlu1 %v3392_v25, %s2977_s12  ;;  %2346 = vmatprep.subr.bf16.mxu1 %v2976_v7 }
 0x11a   : >> { %2677 = vrot.lane.b32.xlu0 %v3400_v30, %s2977_s12  ;;  %2348 = vmatpush1.bf16.msra.mxu1 %v2347_v44 }
 0x11b   : >> { %2682 = vrot.lane.b32.xlu1 %v3404_v32, %s2977_s12  ;;  %2349 = vmatprep.subr.bf16.mxu1 %v2976_v7 }
 0x11e   : >> { %2687 = vrot.lane.b32.xlu0 %v3417_v39, %s2977_s12  ;;  %2351 = vmatpush1.bf16.msra.mxu1 %v2350_v45 }
 0x11f   : >> { %2692 = vrot.lane.b32.xlu1 %v3421_v42, %s2977_s12  ;;  %2352 = vmatprep.subr.bf16.mxu1 %v2976_v7 }
 0x122   : >> { %2697 = vrot.lane.b32.xlu0 %v3365_v11, %s2978_s15  ;;  %2354 = vmatpush1.bf16.msra.mxu1 %v2353_v46 }
 0x123   : >> { %2702 = vrot.lane.b32.xlu1 %v3365_v11, %s2979_s16  ;;  %2355 = vmatprep.subr.bf16.mxu1 %v2976_v7 }
 0x126   : >> { %2707 = vrot.lane.b32.xlu0 %v3376_v18, %s2978_s15  ;;  %2357 = vmatpush1.bf16.msra.mxu1 %v2356_v48 }
 0x127   : >> { %2712 = vrot.lane.b32.xlu1 %v3376_v18, %s2979_s16  ;;  %2358 = vmatprep.subr.bf16.mxu1 %v2976_v7 }
 0x12a   : >> { %2717 = vrot.lane.b32.xlu0 %v3370_v15, %s2978_s15  ;;  %2360 = vmatpush1.bf16.msra.mxu1 %v2359_v49 }
 0x12b   : >> { %2722 = vrot.lane.b32.xlu1 %v3370_v15, %s2979_s16  ;;  %2361 = vmatprep.subr.bf16.mxu1 %v2976_v7 }
 0x12e   : >> { %2727 = vrot.lane.b32.xlu0 %v3380_v19, %s2978_s15  ;;  %2363 = vmatpush1.bf16.msra.mxu1 %v2362_v50 }
 0x12f   : >> { %2732 = vrot.lane.b32.xlu1 %v3380_v19, %s2979_s16  ;;  %2364 = vmatprep.subr.bf16.mxu1 %v2976_v7 }
 0x132   : >> { %2737 = vrot.lane.b32.xlu0 %v3388_v24, %s2978_s15  ;;  %2366 = vmatpush1.bf16.msra.mxu1 %v2365_v51 }
 0x133   : >> { %2742 = vrot.lane.b32.xlu1 %v3388_v24, %s2979_s16  ;;  %2367 = vmatprep.subr.bf16.mxu1 %v2976_v7 }
 0x135   : >> { %657 = vmatmul.mubr.f32.vlgmr.msra.gmra.mrb[0].mxu1 %v581_v52 }
 0x136   : >> { %2747 = vrot.lane.b32.xlu0 %v3392_v25, %s2978_s15  ;;  %2114 = vmatprep.mubr.msk.f32.mxu1 %vm585_vm3, %v584_v53 }
 0x137   : >> { %2752 = vrot.lane.b32.xlu1 %v3392_v25, %s2979_s16 }
 0x139   : >> { %662 = vmatmul.mubr.f32.gmra.mrb[2].mxu1 %v583_v54 }
 0x13a   : >> { %2757 = vrot.lane.b32.xlu0 %v3400_v30, %s2978_s15  ;;  %2119 = vmatprep.mubr.msk.f32.mxu1 %vm585_vm3, %v2116_v55 }
 0x13b   : >> { %2762 = vrot.lane.b32.xlu1 %v3400_v30, %s2979_s16 }
 0x13e   : >> { %2767 = vrot.lane.b32.xlu0 %v3404_v32, %s2978_s15 }
 0x13f   : >> { %2772 = vrot.lane.b32.xlu1 %v3404_v32, %s2979_s16 }
 0x142   : >> { %2777 = vrot.lane.b32.xlu0 %v3417_v39, %s2978_s15 }
 0x143   : >> { %2782 = vrot.lane.b32.xlu1 %v3417_v39, %s2979_s16 }
 0x146   : >> { %2787 = vrot.lane.b32.xlu0 %v3421_v42, %s2978_s15  ;;  %s1284_s15 = scalar_lea.vmem [#allocation3], %s2139_s14 }
 0x147   : >> { %2792 = vrot.lane.b32.xlu1 %v3421_v42, %s2979_s16 }
 0x14a   : >> { %2797 = vrot.lane.b32.xlu0 %v3365_v11, %s2980_s30 }
 0x14b   : >> { %2802 = vrot.lane.b32.xlu1 %v3376_v18, %s2980_s30 }
 0x14e   : >> { %2807 = vrot.lane.b32.xlu0 %v3370_v15, %s2980_s30 }
 0x14f   : >> { %2812 = vrot.lane.b32.xlu1 %v3380_v19, %s2980_s30 }
 0x152   : >> { %2817 = vrot.lane.b32.xlu0 %v3388_v24, %s2980_s30 }
 0x153   : >> { %2822 = vrot.lane.b32.xlu1 %v3392_v25, %s2980_s30 }
 0x156   : >> { %2827 = vrot.lane.b32.xlu0 %v3400_v30, %s2980_s30 }
 0x157   : >> { %2832 = vrot.lane.b32.xlu1 %v3404_v32, %s2980_s30 }
 0x15a   : >> { %2837 = vrot.lane.b32.xlu0 %v3417_v39, %s2980_s30 }
 0x15b   : >> { %2842 = vrot.lane.b32.xlu1 %v3421_v42, %s2980_s30 }
 0x180   : >> { %v2648_v56 = vpop.permute.xlu0 %2647 }
 0x181   : >> { %v2650_v57 = vunpack.i.h.bf16 %v2648_v56  ;;  %v2649_v58 = vunpack.i.l.bf16 %v2648_v56  ;;  %v2658_v59 = vpop.permute.xlu1 %2657 }
 0x182   : >> { %v2660_v62 = vunpack.i.h.bf16 %v2658_v59  ;;  %v2659_v63 = vunpack.i.l.bf16 %v2658_v59 }
 0x183   : >> { %v2398_v60 = vpack.c.bf16 %v2650_v57, %v2649_v58 }
 0x184   : >> { %v2653_v61 = vpop.permute.xlu0 %2652  ;;  %v2404_v6 = vpack.c.bf16 %v2660_v62, %v2659_v63 }
 0x185   : >> { %v2655_v0 = vunpack.i.h.bf16 %v2653_v61  ;;  %v2654_v1 = vunpack.i.l.bf16 %v2653_v61  ;;  %2399 = vmatpush1.bf16.msra.mxu0 %v2398_v60  ;;  %v2663_v2 = vpop.permute.xlu1 %2662 }
 0x186   : >> { %2400 = vmatprep.subr.bf16.mxu0 %v2976_v7  ;;  %v2665_v8 = vunpack.i.h.bf16 %v2663_v2  ;;  %v2664_v9 = vunpack.i.l.bf16 %v2663_v2 }
 0x187   : >> { %v2401_v3 = vpack.c.bf16 %v2655_v0, %v2654_v1 }
 0x188   : >> { %v2668_v4 = vpop.permute.xlu0 %2667  ;;  %v2407_v12 = vpack.c.bf16 %v2665_v8, %v2664_v9  ;;  %v2121_v8 = vld [vmem:[%s3751_s1 + $0x40] sm:$0xff] }
 0x189   : >> { %2402 = vmatpush1.bf16.msra.mxu0 %v2401_v3  ;;  %v2673_v10 = vpop.permute.xlu1 %2672  ;;  %v2670_v13 = vunpack.i.h.bf16 %v2668_v4  ;;  %v2669_v14 = vunpack.i.l.bf16 %v2668_v4 }
 0x18a   : >> { %2403 = vmatprep.subr.bf16.mxu0 %v2976_v7  ;;  %v2675_v16 = vunpack.i.h.bf16 %v2673_v10  ;;  %v2674_v17 = vunpack.i.l.bf16 %v2673_v10 }
 0x18b   : >> { %v2410_v19 = vpack.c.bf16 %v2670_v13, %v2669_v14  ;;  %v2124_v13 = vld [vmem:[%s3751_s1 + $0x58] sm:$0xff] }
 0x18c   : >> { %v2678_v11 = vpop.permute.xlu0 %2677  ;;  %v2413_v21 = vpack.c.bf16 %v2675_v16, %v2674_v17 }
 0x18d   : >> { %2405 = vmatpush1.bf16.msra.mxu0 %v2404_v6  ;;  %v2683_v15 = vpop.permute.xlu1 %2682  ;;  %v2680_v23 = vunpack.i.h.bf16 %v2678_v11  ;;  %v2679_v24 = vunpack.i.l.bf16 %v2678_v11 }
 0x18e   : >> { %2406 = vmatprep.subr.bf16.mxu0 %v2976_v7  ;;  %v2685_v29 = vunpack.i.h.bf16 %v2683_v15  ;;  %v2684_v30 = vunpack.i.l.bf16 %v2683_v15 }
 0x18f   : >> { %v2416_v32 = vpack.c.bf16 %v2680_v23, %v2679_v24 }
 0x190   : >> { %v2688_v18 = vpop.permute.xlu0 %2687  ;;  %v2419_v37 = vpack.c.bf16 %v2685_v29, %v2684_v30 }
 0x191   : >> { %2408 = vmatpush1.bf16.msra.mxu0 %v2407_v12  ;;  %v2693_v20 = vpop.permute.xlu1 %2692  ;;  %v2690_v39 = vunpack.i.h.bf16 %v2688_v18  ;;  %v2689_v42 = vunpack.i.l.bf16 %v2688_v18  ;;  %v2123_v18 = vld [vmem:[%s3751_s1 + $0x50] sm:$0xff] }
 0x192   : >> { %2409 = vmatprep.subr.bf16.mxu0 %v2976_v7  ;;  %v2695_v47 = vunpack.i.h.bf16 %v2693_v20  ;;  %v2694_v50 = vunpack.i.l.bf16 %v2693_v20 }
 0x193   : >> { %v2422_v49 = vpack.c.bf16 %v2690_v39, %v2689_v42 }
 0x194   : >> { %v2698_v22 = vpop.permute.xlu0 %2697  ;;  %v2425_v58 = vpack.c.bf16 %v2695_v47, %v2694_v50 }
 0x195   : >> { %v2700_v25 = vunpack.i.h.bf16 %v2698_v22  ;;  %v2699_v26 = vunpack.i.l.bf16 %v2698_v22  ;;  %2411 = vmatpush1.bf16.msra.mxu0 %v2410_v19  ;;  %v2703_v27 = vpop.permute.xlu1 %2702  ;;  %v2128_v22 = vld [vmem:[%s3751_s1 + $0x68] sm:$0xff] }
 0x196   : >> { %2412 = vmatprep.subr.bf16.mxu0 %v2976_v7  ;;  %v2705_v55 = vunpack.i.h.bf16 %v2703_v27  ;;  %v2704_v56 = vunpack.i.l.bf16 %v2703_v27 }
 0x197   : >> { %v2368_v28 = vpack.c.bf16 %v2700_v25, %v2699_v26 }
 0x198   : >> { %v2708_v31 = vpop.permute.xlu0 %2707  ;;  %v2428_v63 = vpack.c.bf16 %v2705_v55, %v2704_v56 }
 0x199   : >> { %v2710_v33 = vunpack.i.h.bf16 %v2708_v31  ;;  %v2709_v34 = vunpack.i.l.bf16 %v2708_v31  ;;  %2369 = vmatpush1.bf16.msra.mxu1 %v2368_v28  ;;  %2414 = vmatpush1.bf16.msra.mxu0 %v2413_v21  ;;  %v2713_v35 = vpop.permute.xlu1 %2712 }
 0x19a   : >> { %2370 = vmatprep.subr.bf16.mxu1 %v2976_v7  ;;  %2415 = vmatprep.subr.bf16.mxu0 %v2976_v7  ;;  %v2715_v1 = vunpack.i.h.bf16 %v2713_v35  ;;  %v2714_v2 = vunpack.i.l.bf16 %v2713_v35 }
 0x19b   : >> { %v2371_v36 = vpack.c.bf16 %v2710_v33, %v2709_v34 }
 0x19c   : >> { %v2718_v38 = vpop.permute.xlu0 %2717  ;;  %v2431_v14 = vpack.c.bf16 %v2715_v1, %v2714_v2  ;;  %v2117_v2 = vld [vmem:[%s3751_s1 + $0x30] sm:$0xff] }
 0x19d   : >> { %v2720_v43 = vunpack.i.h.bf16 %v2718_v38  ;;  %v2719_v44 = vunpack.i.l.bf16 %v2718_v38  ;;  %2372 = vmatpush1.bf16.msra.mxu1 %v2371_v36  ;;  %2417 = vmatpush1.bf16.msra.mxu0 %v2416_v32  ;;  %v2723_v45 = vpop.permute.xlu1 %2722 }
 0x19e   : >> { %2373 = vmatprep.subr.bf16.mxu1 %v2976_v7  ;;  %2418 = vmatprep.subr.bf16.mxu0 %v2976_v7  ;;  %v2725_v10 = vunpack.i.h.bf16 %v2723_v45  ;;  %v2724_v11 = vunpack.i.l.bf16 %v2723_v45 }
 0x19f   : >> { %v2374_v46 = vpack.c.bf16 %v2720_v43, %v2719_v44 }
 0x1a0   : >> { %v2728_v48 = vpop.permute.xlu0 %2727  ;;  %v2434_v20 = vpack.c.bf16 %v2725_v10, %v2724_v11 }
 0x1a1   : >> { %v2730_v51 = vunpack.i.h.bf16 %v2728_v48  ;;  %v2729_v52 = vunpack.i.l.bf16 %v2728_v48  ;;  %2375 = vmatpush1.bf16.msra.mxu1 %v2374_v46  ;;  %2420 = vmatpush1.bf16.msra.mxu0 %v2419_v37  ;;  %v3513_v53 = vpop.permute.xlu1 %2732 }
 0x1a2   : >> { %2376 = vmatprep.subr.bf16.mxu1 %v2976_v7  ;;  %2421 = vmatprep.subr.bf16.mxu0 %v2976_v7  ;;  %v2735_v23 = vunpack.i.h.bf16 %v3513_v53  ;;  %v2734_v24 = vunpack.i.l.bf16 %v3513_v53 }
 0x1a3   : >> { %v2377_v54 = vpack.c.bf16 %v2730_v51, %v2729_v52 }
 0x1a4   : >> { %v2738_v57 = vpop.permute.xlu0 %2737  ;;  %v2437_v32 = vpack.c.bf16 %v2735_v23, %v2734_v24 }
 0x1a5   : >> { %v2740_v59 = vunpack.i.h.bf16 %v2738_v57  ;;  %v2739_v60 = vunpack.i.l.bf16 %v2738_v57  ;;  %2378 = vmatpush1.bf16.msra.mxu1 %v2377_v54  ;;  %2423 = vmatpush1.bf16.msra.mxu0 %v2422_v49  ;;  %v2743_v61 = vpop.permute.xlu1 %2742  ;;  %v2115_v54 = vld [vmem:[%s3751_s1 + $0x20] sm:$0xff] }
 0x1a6   : >> { %2379 = vmatprep.subr.bf16.mxu1 %v2976_v7  ;;  %2424 = vmatprep.subr.bf16.mxu0 %v2976_v7  ;;  %v2745_v29 = vunpack.i.h.bf16 %v2743_v61  ;;  %v2744_v30 = vunpack.i.l.bf16 %v2743_v61  ;;  %v2118_v61 = vld [vmem:[%s3751_s1 + $0x38] sm:$0xff] }
 0x1a7   : >> { %v2380_v62 = vpack.c.bf16 %v2740_v59, %v2739_v60 }
 0x1a8   : >> { %v2748_v0 = vpop.permute.xlu0 %2747  ;;  %v2440_v37 = vpack.c.bf16 %v2745_v29, %v2744_v30  ;;  %v2127_v29 = vld [vmem:[%s3751_s1 + $0x60] sm:$0xff] }
 0x1a9   : >> { %v2750_v3 = vunpack.i.h.bf16 %v2748_v0  ;;  %v2749_v4 = vunpack.i.l.bf16 %v2748_v0  ;;  %2381 = vmatpush1.bf16.msra.mxu1 %v2380_v62  ;;  %2426 = vmatpush1.bf16.msra.mxu0 %v2425_v58  ;;  %v3519_v6 = vpop.permute.xlu1 %2752 }
 0x1aa   : >> { %2382 = vmatprep.subr.bf16.mxu1 %v2976_v7  ;;  %2427 = vmatprep.subr.bf16.mxu0 %v2976_v7  ;;  %v2755_v39 = vunpack.i.h.bf16 %v3519_v6  ;;  %v2754_v42 = vunpack.i.l.bf16 %v3519_v6 }
 0x1ab   : >> { %v2383_v9 = vpack.c.bf16 %v2750_v3, %v2749_v4 }
 0x1ac   : >> { %v2758_v12 = vpop.permute.xlu0 %2757  ;;  %973 = vmatmul.mubr.f32.vlgmr.msra.gmra.mrb[0].mxu0 %v2121_v8  ;;  %v2443_v50 = vpack.c.bf16 %v2755_v39, %v2754_v42  ;;  %v2136_v8 = vld [vmem:[%s3751_s1 + $0x98] sm:$0xff] }
 0x1ad   : >> { %v2760_v15 = vunpack.i.h.bf16 %v2758_v12  ;;  %v2759_v16 = vunpack.i.l.bf16 %v2758_v12  ;;  %2384 = vmatpush1.bf16.msra.mxu1 %v2383_v9  ;;  %2429 = vmatpush1.bf16.msra.mxu0 %v2428_v63  ;;  %v2763_v17 = vpop.permute.xlu1 %2762 }
 0x1ae   : >> { %2385 = vmatprep.subr.bf16.mxu1 %v2976_v7  ;;  %2430 = vmatprep.subr.bf16.mxu0 %v2976_v7  ;;  %v2765_v47 = vunpack.i.h.bf16 %v2763_v17  ;;  %v2764_v48 = vunpack.i.l.bf16 %v2763_v17 }
 0x1af   : >> { %v2386_v19 = vpack.c.bf16 %v2760_v15, %v2759_v16  ;;  %2126 = vmatprep.mubr.msk.f32.mxu0 %vm585_vm3, %v2124_v13 }
 0x1b0   : >> { %v2768_v21 = vpop.permute.xlu0 %2767  ;;  %978 = vmatmul.mubr.f32.gmra.mrb[2].mxu0 %v2123_v18  ;;  %v2446_v58 = vpack.c.bf16 %v2765_v47, %v2764_v48  ;;  %v2135_v48 = vld [vmem:[%s3751_s1 + $0x90] sm:$0xff] }
 0x1b1   : >> { %v2770_v25 = vunpack.i.h.bf16 %v2768_v21  ;;  %v2769_v26 = vunpack.i.l.bf16 %v2768_v21  ;;  %2387 = vmatpush1.bf16.msra.mxu1 %v2386_v19  ;;  %2432 = vmatpush1.bf16.msra.mxu0 %v2431_v14  ;;  %v3540_v27 = vpop.permute.xlu1 %2772 }
 0x1b2   : >> { %2388 = vmatprep.subr.bf16.mxu1 %v2976_v7  ;;  %2433 = vmatprep.subr.bf16.mxu0 %v2976_v7  ;;  %v2775_v59 = vunpack.i.h.bf16 %v3540_v27  ;;  %v2774_v62 = vunpack.i.l.bf16 %v3540_v27 }
 0x1b3   : >> { %v2389_v28 = vpack.c.bf16 %v2770_v25, %v2769_v26  ;;  %2131 = vmatprep.mubr.msk.f32.mxu0 %vm585_vm3, %v2128_v22 }
 0x1b4   : >> { %v2778_v31 = vpop.permute.xlu0 %2777  ;;  %v2449_v9 = vpack.c.bf16 %v2775_v59, %v2774_v62 }
 0x1b5   : >> { %v2780_v33 = vunpack.i.h.bf16 %v2778_v31  ;;  %v2779_v34 = vunpack.i.l.bf16 %v2778_v31  ;;  %2390 = vmatpush1.bf16.msra.mxu1 %v2389_v28  ;;  %2435 = vmatpush1.bf16.msra.mxu0 %v2434_v20  ;;  %v2783_v35 = vpop.permute.xlu1 %2782  ;;  %v2130_v31 = vld [vmem:[%s3751_s1 + $0x78] sm:$0xff] }
 0x1b6   : >> { %2391 = vmatprep.subr.bf16.mxu1 %v2976_v7  ;;  %2436 = vmatprep.subr.bf16.mxu0 %v2976_v7  ;;  %v2785_v4 = vunpack.i.h.bf16 %v2783_v35  ;;  %v2784_v6 = vunpack.i.l.bf16 %v2783_v35  ;;  %v2129_v35 = vld [vmem:[%s3751_s1 + $0x70] sm:$0xff] }
 0x1b7   : >> { %v2392_v36 = vpack.c.bf16 %v2780_v33, %v2779_v34 }
 0x1b8   : >> { %v2788_v38 = vpop.permute.xlu0 %2787  ;;  %v2452_v14 = vpack.c.bf16 %v2785_v4, %v2784_v6 }
 0x1b9   : >> { %v2790_v43 = vunpack.i.h.bf16 %v2788_v38  ;;  %v2789_v44 = vunpack.i.l.bf16 %v2788_v38  ;;  %2393 = vmatpush1.bf16.msra.mxu1 %v2392_v36  ;;  %2438 = vmatpush1.bf16.msra.mxu0 %v2437_v32  ;;  %v2793_v45 = vpop.permute.xlu1 %2792 }
 0x1ba   : >> { %2394 = vmatprep.subr.bf16.mxu1 %v2976_v7  ;;  %2439 = vmatprep.subr.bf16.mxu0 %v2976_v7  ;;  %v2795_v15 = vunpack.i.h.bf16 %v2793_v45  ;;  %v2794_v16 = vunpack.i.l.bf16 %v2793_v45 }
 0x1bb   : >> { %v2395_v46 = vpack.c.bf16 %v2790_v43, %v2789_v44 }
 0x1bc   : >> { %v2798_v49 = vpop.permute.xlu0 %2797  ;;  %v2455_v21 = vpack.c.bf16 %v2795_v15, %v2794_v16 }
 0x1bd   : >> { %v2800_v51 = vunpack.i.h.bf16 %v2798_v49  ;;  %v2799_v52 = vunpack.i.l.bf16 %v2798_v49  ;;  %2396 = vmatpush1.bf16.msra.mxu1 %v2395_v46  ;;  %2441 = vmatpush1.bf16.msra.mxu0 %v2440_v37  ;;  %v2803_v53 = vpop.permute.xlu1 %2802  ;;  %v2134_v37 = vld [vmem:[%s3751_s1 + $0x88] sm:$0xff]  ;;  %v2133_v49 = vld [vmem:[%s3751_s1 + $0x80] sm:$0xff] }
 0x1be   : >> { %v2805_v55 = vunpack.i.h.bf16 %v2803_v53  ;;  %v2804_v56 = vunpack.i.l.bf16 %v2803_v53  ;;  %2442 = vmatprep.subr.bf16.mxu0 %v2976_v7  ;;  %2562 = vmatprep.subr.bf16.mxu1 %v2976_v7 }
 0x1bf   : >> { %v3556_v57 = vpack.c.bf16 %v2800_v51, %v2799_v52 }
 0x1c0   : >> { %825 = vmatmul.mubr.f32.vlgmr.msra.gmra.mrb[0].mxu1 %v2115_v54  ;;  %v2808_v60 = vpop.permute.xlu0 %2807  ;;  %v3563_v63 = vpack.c.bf16 %v2805_v55, %v2804_v56 }
 0x1c1   : >> { %2444 = vmatpush1.bf16.msra.mxu0 %v2443_v50  ;;  %2572 = vmatpush1.bf16.msra.mxu1 %v3556_v57  ;;  %v2810_v0 = vunpack.i.h.bf16 %v2808_v60  ;;  %v2809_v1 = vunpack.i.l.bf16 %v2808_v60  ;;  %v2813_v3 = vpop.permute.xlu1 %2812 }
 0x1c2   : >> { %2445 = vmatprep.subr.bf16.mxu0 %v2976_v7  ;;  %2563 = vmatprep.subr.bf16.mxu1 %v2976_v7  ;;  %v2815_v11 = vunpack.i.h.bf16 %v2813_v3  ;;  %v2814_v12 = vunpack.i.l.bf16 %v2813_v3 }
 0x1c3   : >> { %2120 = vmatprep.mubr.msk.f32.mxu1 %vm585_vm3, %v2118_v61  ;;  %v2464_v10 = vpack.c.bf16 %v2810_v0, %v2809_v1 }
 0x1c4   : >> { %830 = vmatmul.mubr.f32.gmra.mrb[2].mxu1 %v2117_v2  ;;  %v2818_v13 = vpop.permute.xlu0 %2817  ;;  %v2467_v17 = vpack.c.bf16 %v2815_v11, %v2814_v12  ;;  %v1434_v2 = vld [vmem:[%s3754_s4] sm:$0xff] (%p543_p5) }
 0x1c5   : >> { %2447 = vmatpush1.bf16.msra.mxu0 %v2446_v58  ;;  %2573 = vmatpush1.bf16.msra.mxu1 %v3563_v63  ;;  %v2820_v18 = vunpack.i.h.bf16 %v2818_v13  ;;  %v2819_v19 = vunpack.i.l.bf16 %v2818_v13  ;;  %v2823_v20 = vpop.permute.xlu1 %2822 }
 0x1c6   : >> { %2448 = vmatprep.subr.bf16.mxu0 %v2976_v7  ;;  %2564 = vmatprep.subr.bf16.mxu1 %v2976_v7  ;;  %v2825_v23 = vunpack.i.h.bf16 %v2823_v20  ;;  %v2824_v24 = vunpack.i.l.bf16 %v2823_v20 }
 0x1c7   : >> { %2138 = vmatprep.mubr.msk.f32.mxu1 %vm585_vm3, %v2136_v8  ;;  %v2470_v22 = vpack.c.bf16 %v2820_v18, %v2819_v19  ;;  %1437 = vperm.xlu0 (%p543_p5), %2846, %v1434_v2  }
 0x1c8   : >> { %v2828_v25 = vpop.permute.xlu0 %2827  ;;  %v2473_v26 = vpack.c.bf16 %v2825_v23, %v2824_v24 }
 0x1c9   : >> { %2450 = vmatpush1.bf16.msra.mxu0 %v2449_v9  ;;  %2574 = vmatpush1.bf16.msra.mxu1 %v2464_v10  ;;  %v2830_v27 = vunpack.i.h.bf16 %v2828_v25  ;;  %v2829_v28 = vunpack.i.l.bf16 %v2828_v25  ;;  %v2833_v30 = vpop.permute.xlu1 %2832 }
 0x1ca   : >> { %2451 = vmatprep.subr.bf16.mxu0 %v2976_v7  ;;  %2565 = vmatprep.subr.bf16.mxu1 %v2976_v7  ;;  %v2835_v33 = vunpack.i.h.bf16 %v2833_v30  ;;  %v2834_v34 = vunpack.i.l.bf16 %v2833_v30 }
 0x1cb   : >> { %v2476_v32 = vpack.c.bf16 %v2830_v27, %v2829_v28 }
 0x1cc   : >> { %v2838_v36 = vpop.permute.xlu0 %2837  ;;  %v2479_v38 = vpack.c.bf16 %v2835_v33, %v2834_v34 }
 0x1cd   : >> { %2453 = vmatpush1.bf16.msra.mxu0 %v2452_v14  ;;  %2575 = vmatpush1.bf16.msra.mxu1 %v2467_v17  ;;  %v2840_v39 = vunpack.i.h.bf16 %v2838_v36  ;;  %v2839_v42 = vunpack.i.l.bf16 %v2838_v36  ;;  %v2843_v43 = vpop.permute.xlu1 %2842 }
 0x1ce   : >> { %2454 = vmatprep.subr.bf16.mxu0 %v2976_v7  ;;  %2566 = vmatprep.subr.bf16.mxu1 %v2976_v7  ;;  %v2845_v45 = vunpack.i.h.bf16 %v2843_v43  ;;  %v2844_v46 = vunpack.i.l.bf16 %v2843_v43 }
 0x1cf   : >> { %v2482_v44 = vpack.c.bf16 %v2840_v39, %v2839_v42 }
 0x1d0   : >> { %v2485_v47 = vpack.c.bf16 %v2845_v45, %v2844_v46 }
 0x1d1   : >> { %2456 = vmatpush1.bf16.msra.mxu0 %v2455_v21  ;;  %2576 = vmatpush1.bf16.msra.mxu1 %v2470_v22 }
 0x1d2   : >> { %2457 = vmatprep.subr.bf16.mxu0 %v2976_v7  ;;  %2567 = vmatprep.subr.bf16.mxu1 %v2976_v7 }
 0x1d4   : >> { %1121 = vmatmul.mubr.f32.vlgmr.msra.gmra.mrb[0].mxu0 %v2127_v29 }
 0x1d5   : >> { %2459 = vmatpush1.bf16.msra.mxu0 %v3556_v57  ;;  %2577 = vmatpush1.bf16.msra.mxu1 %v2473_v26 }
 0x1d6   : >> { %2132 = vmatprep.mubr.msk.f32.mxu0 %vm585_vm3, %v2130_v31  ;;  %2460 = vmatprep.subr.bf16.mxu0 %v2976_v7 }
 0x1d7   : >> { %2568 = vmatprep.subr.bf16.mxu1 %v2976_v7 }
 0x1d8   : >> { %1126 = vmatmul.mubr.f32.gmra.mrb[2].mxu0 %v2129_v35 }
 0x1d9   : >> { %2462 = vmatpush1.bf16.msra.mxu0 %v3563_v63  ;;  %2578 = vmatpush1.bf16.msra.mxu1 %v2476_v32 }
 0x1da   : >> { %2463 = vmatprep.subr.bf16.mxu0 %v2976_v7  ;;  %2569 = vmatprep.subr.bf16.mxu1 %v2976_v7 }
 0x1db   : >> { %2137 = vmatprep.mubr.msk.f32.mxu0 %vm585_vm3, %v2134_v37 }
 0x1dd   : >> { %2465 = vmatpush1.bf16.msra.mxu0 %v2464_v10  ;;  %2579 = vmatpush1.bf16.msra.mxu1 %v2479_v38 }
 0x1de   : >> { %2466 = vmatprep.subr.bf16.mxu0 %v2976_v7  ;;  %2570 = vmatprep.subr.bf16.mxu1 %v2976_v7 }
 0x1e1   : >> { %2468 = vmatpush1.bf16.msra.mxu0 %v2467_v17  ;;  %2580 = vmatpush1.bf16.msra.mxu1 %v2482_v44 }
 0x1e2   : >> { %2469 = vmatprep.subr.bf16.mxu0 %v2976_v7  ;;  %2571 = vmatprep.subr.bf16.mxu1 %v2976_v7 }
 0x1e5   : >> { %2471 = vmatpush1.bf16.msra.mxu0 %v2470_v22  ;;  %2581 = vmatpush1.bf16.msra.mxu1 %v2485_v47 }
 0x1e6   : >> { %2472 = vmatprep.subr.bf16.mxu0 %v2976_v7 }
 0x1e8   : >> { %1274 = vmatmul.mubr.f32.vlgmr.msra.gmra.mrb[4].mxu1 %v2135_v48 }
 0x1e9   : >> { %2474 = vmatpush1.bf16.msra.mxu0 %v2473_v26 }
 0x1ea   : >> { %2475 = vmatprep.subr.bf16.mxu0 %v2976_v7 }
 0x1ed   : >> { %2477 = vmatpush1.bf16.msra.mxu0 %v2476_v32 }
 0x1ee   : >> { %2478 = vmatprep.subr.bf16.mxu0 %v2976_v7 }
 0x1f1   : >> { %2480 = vmatpush1.bf16.msra.mxu0 %v2479_v38 }
 0x1f2   : >> { %2481 = vmatprep.subr.bf16.mxu0 %v2976_v7 }
 0x1f5   : >> { %2483 = vmatpush1.bf16.msra.mxu0 %v2482_v44 }
 0x1f6   : >> { %2484 = vmatprep.subr.bf16.mxu0 %v2976_v7 }
 0x1f9   : >> { %2486 = vmatpush1.bf16.msra.mxu0 %v2485_v47 }
 0x1fc   : >> { %1269 = vmatmul.mubr.f32.vlgmr.msra.gmra.mrb[0].mxu0 %v2133_v49 }
 0x246   : > { %v3657_v30 = vpop.permute.xlu0 (%p543_p5), %1437 }
 0x293   : >> { %v826_v50 = vpop.f32.mrb[0].mxu1 }
 0x294   : >> { %v828_v51 = vpop.f32.mrb[1].mxu1  ;;  %v2582_v61 = vadd.f32 %v826_v50, %v3322_v41 }
 0x297   : >> { %v831_v52 = vpop.f32.mrb[2].mxu1 }
 0x298   : >> { %v833_v53 = vpop.f32.mrb[3].mxu1  ;;  %v2584_v54 = vadd.f32 %v831_v52, %v3320_v40 }
 0x2ab   : >> { %v1127_v55 = vpop.f32.mrb[2].mxu0 }
 0x2ac   : >> { %v2585_v56 = vadd.f32 %v2584_v54, %v1127_v55  ;;  %v1129_v57 = vpop.f32.mrb[3].mxu0 }
 0x2bb   : >> { %v1275_v58 = vpop.f32.mrb[4].mxu1 }
 0x2bc   : >> { %v2586_v59 = vadd.f32 %v2585_v56, %v1275_v58  ;;  %v1277_v60 = vpop.f32.mrb[5].mxu1 }
 0x2be   : >> { %v1282_v7 = vmax.f32 %v2586_v59, 0.0 }
 0x2c0   : >> { %1287 = vst.msk [vmem:[%s1284_s15 + $0x8] sm:$0xff] %vm1285_vm4, %v1282_v7 }
 0x2ce   : > { %545 = sbr.rel (!%p543_p5) target bundleno = 261 (0x105), region = 110 }
 0x2cf   : >> { %v1270_v62 = vpop.f32.mrb[0].mxu0 }
 0x2d0   : >> { %v2583_v63 = vadd.f32 %v2582_v61, %v1270_v62  ;;  %v1272_v0 = vpop.f32.mrb[1].mxu0 }
 0x2d2   : >> { %v1281_v1 = vmax.f32 %v2583_v63, 0.0 }
 0x2d4   : >> { %1286 = vst.msk [vmem:[%s1284_s15] sm:$0xff] %vm1285_vm4, %v1281_v1 }
 0x2db   : > { %v1289_v3 = vld [vmem:[#allocation3 + $0x8] sm:$0xff]  ;;  %v1288_v4 = vld [vmem:[#allocation3] sm:$0xff]  ;;  %v1290_v6 = vld [vmem:[#allocation3 + $0x10] sm:$0xff] }
 0x2dc   : > { %1338 = vrot.lane.b32.xlu1 %v1289_v3, %s2974_s29  ;;  %1336 = vrot.lane.b32.xlu0 %v1288_v4, %s2974_s29  ;;  %v1291_v8 = vld [vmem:[#allocation3 + $0x18] sm:$0xff]  ;;  %v1292_v9 = vld [vmem:[#allocation3 + $0x20] sm:$0xff]  ;;  %v1293_v5 = vld [vmem:[#allocation3 + $0x28] sm:$0xff] }
 0x2dd   : > { %v1294_v40 = vld [vmem:[#allocation3 + $0x30] sm:$0xff]  ;;  %v1295_v41 = vld [vmem:[#allocation3 + $0x38] sm:$0xff]  ;;  %v1296_v10 = vld [vmem:[#allocation3 + $0x40] sm:$0xff] }
 0x2de   : > { %v1297_v11 = vld [vmem:[#allocation3 + $0x48] sm:$0xff]  ;;  %v1298_v12 = vld [vmem:[#allocation3 + $0x50] sm:$0xff]  ;;  %v1299_v13 = vld [vmem:[#allocation3 + $0x58] sm:$0xff] }
 0x2df   : > { %v1300_v14 = vld [vmem:[#allocation3 + $0x60] sm:$0xff]  ;;  %v1301_v15 = vld [vmem:[#allocation3 + $0x68] sm:$0xff]  ;;  %v1302_v16 = vld [vmem:[#allocation3 + $0x70] sm:$0xff] }
 0x2e0   : > { %1340 = vrot.lane.b32.xlu1 %v1290_v6, %s2974_s29  ;;  %1342 = vrot.lane.b32.xlu0 %v1291_v8, %s2974_s29  ;;  %v1303_v17 = vld [vmem:[#allocation3 + $0x78] sm:$0xff]  ;;  %v1304_v18 = vld [vmem:[#allocation3 + $0x80] sm:$0xff]  ;;  %v1305_v19 = vld [vmem:[#allocation3 + $0x88] sm:$0xff] }
 0x2e1   : > { %v1306_v20 = vld [vmem:[#allocation3 + $0x90] sm:$0xff]  ;;  %v1307_v21 = vld [vmem:[#allocation3 + $0x98] sm:$0xff]  ;;  %v1308_v22 = vld [vmem:[#allocation3 + $0xa0] sm:$0xff] }
 0x2e2   : > { %v1309_v23 = vld [vmem:[#allocation3 + $0xa8] sm:$0xff]  ;;  %v1310_v24 = vld [vmem:[#allocation3 + $0xb0] sm:$0xff]  ;;  %v1311_v25 = vld [vmem:[#allocation3 + $0xb8] sm:$0xff] }
 0x2e4   : > { %1344 = vrot.lane.b32.xlu1 %v1292_v9, %s2974_s29  ;;  %1346 = vrot.lane.b32.xlu0 %v1293_v5, %s2974_s29 }
 0x2e8   : > { %1348 = vrot.lane.b32.xlu1 %v1294_v40, %s2974_s29  ;;  %1350 = vrot.lane.b32.xlu0 %v1295_v41, %s2974_s29 }
 0x2ec   : > { %1352 = vrot.lane.b32.xlu1 %v1296_v10, %s2974_s29  ;;  %1354 = vrot.lane.b32.xlu0 %v1297_v11, %s2974_s29 }
 0x2f0   : > { %1356 = vrot.lane.b32.xlu1 %v1298_v12, %s2974_s29  ;;  %1358 = vrot.lane.b32.xlu0 %v1299_v13, %s2974_s29 }
 0x2f4   : > { %1360 = vrot.lane.b32.xlu1 %v1300_v14, %s2974_s29  ;;  %1362 = vrot.lane.b32.xlu0 %v1301_v15, %s2974_s29 }
 0x2f8   : > { %1364 = vrot.lane.b32.xlu1 %v1302_v16, %s2974_s29  ;;  %1366 = vrot.lane.b32.xlu0 %v1303_v17, %s2974_s29 }
 0x2fc   : > { %1368 = vrot.lane.b32.xlu1 %v1304_v18, %s2974_s29  ;;  %1370 = vrot.lane.b32.xlu0 %v1305_v19, %s2974_s29 }
 0x300   : > { %1372 = vrot.lane.b32.xlu1 %v1306_v20, %s2974_s29  ;;  %1374 = vrot.lane.b32.xlu0 %v1307_v21, %s2974_s29 }
 0x304   : > { %1376 = vrot.lane.b32.xlu1 %v1308_v22, %s2974_s29  ;;  %1378 = vrot.lane.b32.xlu0 %v1309_v23, %s2974_s29 }
 0x308   : > { %1380 = vrot.lane.b32.xlu1 %v1310_v24, %s2974_s29  ;;  %1382 = vrot.lane.b32.xlu0 %v1311_v25, %s2974_s29  ;;  %s3680_s29 = smov 0  }
 0x34e   : > { %v1339_v26 = vpop.permute.xlu1 %1338  ;;  %v1337_v32 = vpop.permute.xlu0 %1336 }
 0x34f   : > { %1411 = vst.msk [vmem:[#allocation4 + $0x48] sm:$0xff] %vm1409_vm5, %v1339_v26  ;;  %1410 = vst.msk [vmem:[#allocation4 + $0x40] sm:$0xff] %vm1409_vm5, %v1337_v32 }
 0x352   : > { %v1341_v27 = vpop.permute.xlu1 %1340  ;;  %v1343_v34 = vpop.permute.xlu0 %1342 }
 0x353   : > { %1412 = vst.msk [vmem:[#allocation4 + $0x50] sm:$0xff] %vm1409_vm5, %v1341_v27  ;;  %1413 = vst.msk [vmem:[#allocation4 + $0x58] sm:$0xff] %vm1409_vm5, %v1343_v34 }
 0x356   : > { %v1345_v28 = vpop.permute.xlu1 %1344  ;;  %v1347_v36 = vpop.permute.xlu0 %1346 }
 0x357   : > { %1414 = vst.msk [vmem:[#allocation4 + $0x60] sm:$0xff] %vm1409_vm5, %v1345_v28  ;;  %1415 = vst.msk [vmem:[#allocation4 + $0x68] sm:$0xff] %vm1409_vm5, %v1347_v36 }
 0x35a   : > { %v1349_v29 = vpop.permute.xlu1 %1348  ;;  %v1351_v38 = vpop.permute.xlu0 %1350 }
 0x35b   : > { %1416 = vst.msk [vmem:[#allocation4 + $0x70] sm:$0xff] %vm1409_vm5, %v1349_v29  ;;  %1417 = vst.msk [vmem:[#allocation4 + $0x78] sm:$0xff] %vm1409_vm5, %v1351_v38 }
 0x35e   : > { %v1353_v31 = vpop.permute.xlu1 %1352  ;;  %v1355_v42 = vpop.permute.xlu0 %1354 }
 0x35f   : > { %1418 = vst.msk [vmem:[#allocation4 + $0x80] sm:$0xff] %vm1409_vm5, %v1353_v31  ;;  %1419 = vst.msk [vmem:[#allocation4 + $0x88] sm:$0xff] %vm1409_vm5, %v1355_v42 }
 0x362   : > { %v1357_v33 = vpop.permute.xlu1 %1356  ;;  %v1359_v44 = vpop.permute.xlu0 %1358 }
 0x363   : > { %1420 = vst.msk [vmem:[#allocation4 + $0x90] sm:$0xff] %vm1409_vm5, %v1357_v33  ;;  %1421 = vst.msk [vmem:[#allocation4 + $0x98] sm:$0xff] %vm1409_vm5, %v1359_v44 }
 0x366   : > { %v1361_v35 = vpop.permute.xlu1 %1360  ;;  %v1363_v46 = vpop.permute.xlu0 %1362 }
 0x367   : > { %1422 = vst.msk [vmem:[#allocation4 + $0xa0] sm:$0xff] %vm1409_vm5, %v1361_v35  ;;  %1423 = vst.msk [vmem:[#allocation4 + $0xa8] sm:$0xff] %vm1409_vm5, %v1363_v46 }
 0x36a   : > { %v1365_v37 = vpop.permute.xlu1 %1364  ;;  %v1367_v48 = vpop.permute.xlu0 %1366 }
 0x36b   : > { %1424 = vst.msk [vmem:[#allocation4 + $0xb0] sm:$0xff] %vm1409_vm5, %v1365_v37  ;;  %1425 = vst.msk [vmem:[#allocation4 + $0xb8] sm:$0xff] %vm1409_vm5, %v1367_v48 }
 0x36e   : > { %v1369_v39 = vpop.permute.xlu1 %1368  ;;  %v1371_v49 = vpop.permute.xlu0 %1370 }
 0x36f   : > { %1426 = vst.msk [vmem:[#allocation4 + $0xc0] sm:$0xff] %vm1409_vm5, %v1369_v39  ;;  %1427 = vst.msk [vmem:[#allocation4 + $0xc8] sm:$0xff] %vm1409_vm5, %v1371_v49 }
 0x372   : > { %v1373_v43 = vpop.permute.xlu1 %1372  ;;  %v1375_v50 = vpop.permute.xlu0 %1374 }
 0x373   : > { %1428 = vst.msk [vmem:[#allocation4 + $0xd0] sm:$0xff] %vm1409_vm5, %v1373_v43  ;;  %1429 = vst.msk [vmem:[#allocation4 + $0xd8] sm:$0xff] %vm1409_vm5, %v1375_v50 }
 0x376   : > { %v1377_v45 = vpop.permute.xlu1 %1376  ;;  %v1379_v51 = vpop.permute.xlu0 %1378 }
 0x377   : > { %1430 = vst.msk [vmem:[#allocation4 + $0xe0] sm:$0xff] %vm1409_vm5, %v1377_v45  ;;  %1431 = vst.msk [vmem:[#allocation4 + $0xe8] sm:$0xff] %vm1409_vm5, %v1379_v51 }
 0x37a   : > { %v1381_v47 = vpop.permute.xlu1 %1380  ;;  %v1383_v52 = vpop.permute.xlu0 %1382 }
 0x37b   : > { %1432 = vst.msk [vmem:[#allocation4 + $0xf0] sm:$0xff] %vm1409_vm5, %v1381_v47  ;;  %1433 = vst.msk [vmem:[#allocation4 + $0xf8] sm:$0xff] %vm1409_vm5, %v1383_v52 }
 0x37c LB: >> { %v2981_v53 = vmov 0.0|0.0   ;;  %s2140_s9 = sshll.u32 %s2971_s29, 4  ;;  %s2982_s20 = smov 126   ;;  %vm2984_vm6 = vmmov 0   ;;  %v2985_v9 = vmov 0.0   ;;  %v1470_v41 = vld [vmem:[%s3753_s3] sm:$0xff]  ;;  %s2971_s29 = sphi %s3680_s29, %s1445_s29  }
 0x37d   : >> { %2487 = vmatprep.subr.bf16.mxu1 %v2981_v53  ;;  %2517 = vmatprep.subr.bf16.mxu0 %v2981_v53  ;;  %s1447_s19 = scalar_lea.vmem [#allocation4], %s2140_s9  ;;  %s2983_s21 = smov 125   ;;  %vm1471_vm7 = vcmask 654336   ;;  %v2156_v46 = vld [vmem:[%s3753_s3 + $0x10] sm:$0xff]  ;;  %vm1983_vm8 = vcmask 130048  }
 0x37e   : >> { %2242 = vmatprep.mubr.msk.f32.mxu1 %vm2984_vm6, %v2985_v9  ;;  %2288 = vmatprep.mubr.msk.f32.mxu0 %vm2984_vm6, %v2985_v9  ;;  %s2986_s22 = smov 127   ;;  %s2987_s23 = smov 124  }
 0x37f   : >> { %s2162_s12 = sshll.u32 %s2971_s29, 3  ;;  %s1445_s29 = sadd.s32 1, %s2971_s29  }
 0x380   : >> { %s1982_s13 = scalar_lea.vmem %s3034_s28, %s2162_s12  ;;  %p1442_p6 = scmp.ge.s32.totalorder %s1445_s29, 16  }
 0x382   : >> { %v1448_v54 = vld [vmem:[%s1447_s19] sm:$0xff]  ;;  %v1449_v55 = vld [vmem:[%s1447_s19 + $0x8] sm:$0xff]  ;;  %v2142_v56 = vld [vmem:[%s1447_s19 + $0x10] sm:$0xff] }
 0x383   : >> { %v2847_v57 = vpack.i.bf16 %v1449_v55, %v1448_v54  ;;  %v2143_v58 = vld [vmem:[%s1447_s19 + $0x18] sm:$0xff]  ;;  %v2145_v59 = vld [vmem:[%s1447_s19 + $0x20] sm:$0xff]  ;;  %v2146_v60 = vld [vmem:[%s1447_s19 + $0x28] sm:$0xff]  ;;  %v2488_v3 = vpack.c.bf16 %v1449_v55, %v1448_v54 }
 0x384   : >> { %v2857_v7 = vpack.i.bf16 %v2146_v60, %v2145_v59  ;;  %v2148_v61 = vld [vmem:[%s1447_s19 + $0x30] sm:$0xff]  ;;  %v2852_v62 = vpack.i.bf16 %v2143_v58, %v2142_v56  ;;  %v2149_v63 = vld [vmem:[%s1447_s19 + $0x38] sm:$0xff]  ;;  %v2151_v0 = vld [vmem:[%s1447_s19 + $0x40] sm:$0xff]  ;;  %v2491_v6 = vpack.c.bf16 %v2143_v58, %v2142_v56  ;;  %v2494_v8 = vpack.c.bf16 %v2146_v60, %v2145_v59 }
 0x385   : >> { %2848 = vrot.lane.b32.xlu0 %v2847_v57, %s2982_s20  ;;  %v2152_v1 = vld [vmem:[%s1447_s19 + $0x48] sm:$0xff]  ;;  %v2862_v2 = vpack.i.bf16 %v2149_v63, %v2148_v61  ;;  %2489 = vmatpush3.bf16.msra.mxu1 %v2488_v3  ;;  %v2497_v5 = vpack.c.bf16 %v2149_v63, %v2148_v61 }
 0x386   : >> { %2858 = vrot.lane.b32.xlu1 %v2857_v7, %s2982_s20  ;;  %v2867_v4 = vpack.i.bf16 %v2152_v1, %v2151_v0  ;;  %2490 = vmatprep.subr.bf16.mxu1 %v2981_v53  ;;  %v2500_v40 = vpack.c.bf16 %v2152_v1, %v2151_v0 }
 0x389   : >> { %2853 = vrot.lane.b32.xlu0 %v2852_v62, %s2982_s20  ;;  %2492 = vmatpush3.bf16.msra.mxu1 %v2491_v6 }
 0x38a   : >> { %2863 = vrot.lane.b32.xlu1 %v2862_v2, %s2982_s20  ;;  %2493 = vmatprep.subr.bf16.mxu1 %v2981_v53 }
 0x38d   : >> { %2868 = vrot.lane.b32.xlu0 %v2867_v4, %s2982_s20  ;;  %2495 = vmatpush3.bf16.msra.mxu1 %v2494_v8 }
 0x38e   : >> { %2873 = vrot.lane.b32.xlu1 %v2847_v57, %s2983_s21  ;;  %2496 = vmatprep.subr.bf16.mxu1 %v2981_v53 }
 0x391   : >> { %2878 = vrot.lane.b32.xlu0 %v2852_v62, %s2983_s21  ;;  %2498 = vmatpush3.bf16.msra.mxu1 %v2497_v5 }
 0x392   : >> { %2883 = vrot.lane.b32.xlu1 %v2857_v7, %s2983_s21  ;;  %2499 = vmatprep.subr.bf16.mxu1 %v2981_v53 }
 0x395   : >> { %2888 = vrot.lane.b32.xlu0 %v2862_v2, %s2983_s21  ;;  %2501 = vmatpush3.bf16.msra.mxu1 %v2500_v40 }
 0x396   : >> { %2893 = vrot.lane.b32.xlu1 %v2867_v4, %s2983_s21  ;;  %2502 = vmatprep.subr.bf16.mxu1 %v2981_v53 }
 0x398   : >> { %2243 = vmatmul.mubr.msk.f32.vlgmr.msra.gmra.mrb[0].mxu1 %vm1471_vm7, %v1470_v41 }
 0x399   : >> { %2898 = vrot.lane.b32.xlu0 %v2847_v57, %s2986_s22  ;;  %2265 = vmatprep.mubr.msk.f32.mxu1 %vm2984_vm6, %v2985_v9 }
 0x39a   : >> { %2903 = vrot.lane.b32.xlu1 %v2847_v57, %s2987_s23 }
 0x39d   : >> { %2908 = vrot.lane.b32.xlu0 %v2852_v62, %s2986_s22 }
 0x39e   : >> { %2913 = vrot.lane.b32.xlu1 %v2852_v62, %s2987_s23 }
 0x3a1   : >> { %2918 = vrot.lane.b32.xlu0 %v2857_v7, %s2986_s22 }
 0x3a2   : >> { %2923 = vrot.lane.b32.xlu1 %v2857_v7, %s2987_s23 }
 0x3a5   : >> { %2928 = vrot.lane.b32.xlu0 %v2862_v2, %s2986_s22 }
 0x3a6   : >> { %2933 = vrot.lane.b32.xlu1 %v2862_v2, %s2987_s23 }
 0x3a9   : >> { %2938 = vrot.lane.b32.xlu0 %v2867_v4, %s2986_s22 }
 0x3aa   : >> { %2943 = vrot.lane.b32.xlu1 %v2867_v4, %s2987_s23 }
 0x3f7   : >> { %v2849_v10 = vpop.permute.xlu0 %2848 }
 0x3f8   : >> { %v2851_v11 = vunpack.i.h.bf16 %v2849_v10  ;;  %v2850_v12 = vunpack.i.l.bf16 %v2849_v10  ;;  %v2859_v13 = vpop.permute.xlu1 %2858 }
 0x3f9   : >> { %v2861_v18 = vunpack.i.h.bf16 %v2859_v13  ;;  %v2860_v19 = vunpack.i.l.bf16 %v2859_v13 }
 0x3fa   : >> { %v2518_v14 = vpack.c.bf16 %v2851_v11, %v2850_v12 }
 0x3fb   : >> { %v2854_v15 = vpop.permute.xlu0 %2853  ;;  %v2524_v23 = vpack.c.bf16 %v2861_v18, %v2860_v19  ;;  %v2154_v18 = vld [vmem:[%s3753_s3 + $0x8] sm:$0xff]  ;;  %v2158_v19 = vld [vmem:[%s3753_s3 + $0x18] sm:$0xff] }
 0x3fc   : >> { %v2856_v16 = vunpack.i.h.bf16 %v2854_v15  ;;  %v2855_v17 = vunpack.i.l.bf16 %v2854_v15  ;;  %2519 = vmatpush3.bf16.msra.mxu0 %v2518_v14  ;;  %v2864_v20 = vpop.permute.xlu1 %2863 }
 0x3fd   : >> { %2520 = vmatprep.subr.bf16.mxu0 %v2981_v53  ;;  %v2866_v24 = vunpack.i.h.bf16 %v2864_v20  ;;  %v2865_v25 = vunpack.i.l.bf16 %v2864_v20 }
 0x3fe   : >> { %v2521_v21 = vpack.c.bf16 %v2856_v16, %v2855_v17 }
 0x3ff   : >> { %v2869_v22 = vpop.permute.xlu0 %2868  ;;  %v2527_v31 = vpack.c.bf16 %v2866_v24, %v2865_v25 }
 0x400   : >> { %2522 = vmatpush3.bf16.msra.mxu0 %v2521_v21  ;;  %v2874_v27 = vpop.permute.xlu1 %2873  ;;  %v2871_v28 = vunpack.i.h.bf16 %v2869_v22  ;;  %v2870_v29 = vunpack.i.l.bf16 %v2869_v22 }
 0x401   : >> { %2523 = vmatprep.subr.bf16.mxu0 %v2981_v53  ;;  %v2876_v33 = vunpack.i.h.bf16 %v2874_v27  ;;  %v2875_v34 = vunpack.i.l.bf16 %v2874_v27 }
 0x402   : >> { %v2530_v36 = vpack.c.bf16 %v2871_v28, %v2870_v29 }
 0x403   : >> { %v2879_v26 = vpop.permute.xlu0 %2878  ;;  %v2533_v37 = vpack.c.bf16 %v2876_v33, %v2875_v34 }
 0x404   : >> { %2525 = vmatpush3.bf16.msra.mxu0 %v2524_v23  ;;  %v2884_v35 = vpop.permute.xlu1 %2883  ;;  %v2881_v42 = vunpack.i.h.bf16 %v2879_v26  ;;  %v2880_v43 = vunpack.i.l.bf16 %v2879_v26 }
 0x405   : >> { %2526 = vmatprep.subr.bf16.mxu0 %v2981_v53  ;;  %v2886_v49 = vunpack.i.h.bf16 %v2884_v35  ;;  %v2885_v50 = vunpack.i.l.bf16 %v2884_v35 }
 0x406   : >> { %v2536_v51 = vpack.c.bf16 %v2881_v42, %v2880_v43 }
 0x407   : >> { %v2889_v32 = vpop.permute.xlu0 %2888  ;;  %v2539_v57 = vpack.c.bf16 %v2886_v49, %v2885_v50 }
 0x408   : >> { %2528 = vmatpush3.bf16.msra.mxu0 %v2527_v31  ;;  %v2894_v39 = vpop.permute.xlu1 %2893  ;;  %v2891_v59 = vunpack.i.h.bf16 %v2889_v32  ;;  %v2890_v60 = vunpack.i.l.bf16 %v2889_v32 }
 0x409   : >> { %2529 = vmatprep.subr.bf16.mxu0 %v2981_v53  ;;  %v2896_v0 = vunpack.i.h.bf16 %v2894_v39  ;;  %v2895_v1 = vunpack.i.l.bf16 %v2894_v39 }
 0x40a   : >> { %v2542_v3 = vpack.c.bf16 %v2891_v59, %v2890_v60 }
 0x40b   : >> { %v2899_v38 = vpop.permute.xlu0 %2898  ;;  %v2545_v5 = vpack.c.bf16 %v2896_v0, %v2895_v1 }
 0x40c   : >> { %v2901_v44 = vunpack.i.h.bf16 %v2899_v38  ;;  %v2900_v45 = vunpack.i.l.bf16 %v2899_v38  ;;  %2531 = vmatpush3.bf16.msra.mxu0 %v2530_v36  ;;  %v2904_v55 = vpop.permute.xlu1 %2903 }
 0x40d   : >> { %2532 = vmatprep.subr.bf16.mxu0 %v2981_v53  ;;  %v2906_v11 = vunpack.i.h.bf16 %v2904_v55  ;;  %v2905_v12 = vunpack.i.l.bf16 %v2904_v55 }
 0x40e   : >> { %v2503_v47 = vpack.c.bf16 %v2901_v44, %v2900_v45 }
 0x40f   : >> { %v2909_v48 = vpop.permute.xlu0 %2908  ;;  %2289 = vmatmul.mubr.msk.f32.vlgmr.msra.gmra.mrb[0].mxu0 %vm1471_vm7, %v2156_v46  ;;  %v2548_v15 = vpack.c.bf16 %v2906_v11, %v2905_v12 }
 0x410   : >> { %v2911_v52 = vunpack.i.h.bf16 %v2909_v48  ;;  %v2910_v54 = vunpack.i.l.bf16 %v2909_v48  ;;  %2504 = vmatpush3.bf16.msra.mxu1 %v2503_v47  ;;  %2534 = vmatpush3.bf16.msra.mxu0 %v2533_v37  ;;  %v2914_v2 = vpop.permute.xlu1 %2913 }
 0x411   : >> { %2505 = vmatprep.subr.bf16.mxu1 %v2981_v53  ;;  %2535 = vmatprep.subr.bf16.mxu0 %v2981_v53  ;;  %v2916_v16 = vunpack.i.h.bf16 %v2914_v2  ;;  %v2915_v17 = vunpack.i.l.bf16 %v2914_v2 }
 0x412   : >> { %v2506_v56 = vpack.c.bf16 %v2911_v52, %v2910_v54  ;;  %2311 = vmatprep.mubr.msk.f32.mxu0 %vm2984_vm6, %v2985_v9 }
 0x413   : >> { %v2919_v58 = vpop.permute.xlu0 %2918  ;;  %v2551_v21 = vpack.c.bf16 %v2916_v16, %v2915_v17 }
 0x414   : >> { %v2921_v7 = vunpack.i.h.bf16 %v2919_v58  ;;  %v2920_v61 = vunpack.i.l.bf16 %v2919_v58  ;;  %2507 = vmatpush3.bf16.msra.mxu1 %v2506_v56  ;;  %2537 = vmatpush3.bf16.msra.mxu0 %v2536_v51  ;;  %v2924_v13 = vpop.permute.xlu1 %2923 }
 0x415   : >> { %2508 = vmatprep.subr.bf16.mxu1 %v2981_v53  ;;  %2538 = vmatprep.subr.bf16.mxu0 %v2981_v53  ;;  %v2926_v22 = vunpack.i.h.bf16 %v2924_v13  ;;  %v2925_v23 = vunpack.i.l.bf16 %v2924_v13 }
 0x416   : >> { %v2509_v62 = vpack.c.bf16 %v2921_v7, %v2920_v61 }
 0x417   : >> { %v2929_v63 = vpop.permute.xlu0 %2928  ;;  %v2554_v24 = vpack.c.bf16 %v2926_v22, %v2925_v23 }
 0x418   : >> { %v2931_v4 = vunpack.i.h.bf16 %v2929_v63  ;;  %v2930_v6 = vunpack.i.l.bf16 %v2929_v63  ;;  %2510 = vmatpush3.bf16.msra.mxu1 %v2509_v62  ;;  %2540 = vmatpush3.bf16.msra.mxu0 %v2539_v57  ;;  %v2934_v20 = vpop.permute.xlu1 %2933 }
 0x419   : >> { %2511 = vmatprep.subr.bf16.mxu1 %v2981_v53  ;;  %2541 = vmatprep.subr.bf16.mxu0 %v2981_v53  ;;  %v2936_v25 = vunpack.i.h.bf16 %v2934_v20  ;;  %v2935_v26 = vunpack.i.l.bf16 %v2934_v20 }
 0x41a   : >> { %v2512_v8 = vpack.c.bf16 %v2931_v4, %v2930_v6 }
 0x41b   : >> { %v2939_v40 = vpop.permute.xlu0 %2938  ;;  %v2557_v28 = vpack.c.bf16 %v2936_v25, %v2935_v26 }
 0x41c   : >> { %v2941_v41 = vunpack.i.h.bf16 %v2939_v40  ;;  %v2940_v10 = vunpack.i.l.bf16 %v2939_v40  ;;  %2513 = vmatpush3.bf16.msra.mxu1 %v2512_v8  ;;  %2543 = vmatpush3.bf16.msra.mxu0 %v2542_v3  ;;  %v2944_v27 = vpop.permute.xlu1 %2943 }
 0x41d   : >> { %2514 = vmatprep.subr.bf16.mxu1 %v2981_v53  ;;  %2544 = vmatprep.subr.bf16.mxu0 %v2981_v53  ;;  %v2946_v29 = vunpack.i.h.bf16 %v2944_v27  ;;  %v2945_v31 = vunpack.i.l.bf16 %v2944_v27 }
 0x41e   : >> { %v2515_v14 = vpack.c.bf16 %v2941_v41, %v2940_v10 }
 0x41f   : >> { %v2560_v32 = vpack.c.bf16 %v2946_v29, %v2945_v31 }
 0x420   : >> { %2516 = vmatpush3.bf16.msra.mxu1 %v2515_v14  ;;  %2546 = vmatpush3.bf16.msra.mxu0 %v2545_v5 }
 0x421   : >> { %2547 = vmatprep.subr.bf16.mxu0 %v2981_v53 }
 0x423   : >> { %2266 = vmatmul.mubr.msk.f32.vlgmr.msra.gmra.mrb[0].mxu1 %vm1471_vm7, %v2154_v18  ;;  %2312 = vmatmul.mubr.msk.f32.vlgmr.msra.gmra.mrb[0].mxu0 %vm1471_vm7, %v2158_v19 }
 0x424   : >> { %2549 = vmatpush3.bf16.msra.mxu0 %v2548_v15  ;;  %2334 = vmatprep.mubr.msk.f32.mxu0 %vm2984_vm6, %v2985_v9  ;;  %v2160_v9 = vld [vmem:[%s3753_s3 + $0x20] sm:$0xff] }
 0x425   : >> { %2550 = vmatprep.subr.bf16.mxu0 %v2981_v53 }
 0x428   : >> { %2552 = vmatpush3.bf16.msra.mxu0 %v2551_v21 }
 0x429   : >> { %2553 = vmatprep.subr.bf16.mxu0 %v2981_v53 }
 0x42c   : >> { %2555 = vmatpush3.bf16.msra.mxu0 %v2554_v24 }
 0x42d   : >> { %2556 = vmatprep.subr.bf16.mxu0 %v2981_v53 }
 0x430   : >> { %2558 = vmatpush3.bf16.msra.mxu0 %v2557_v28 }
 0x431   : >> { %2559 = vmatprep.subr.bf16.mxu0 %v2981_v53 }
 0x434   : >> { %2561 = vmatpush3.bf16.msra.mxu0 %v2560_v32 }
 0x437   : >> { %2335 = vmatmul.mubr.msk.f32.vlgmr.msra.gmra.mrb[0].mxu0 %vm1471_vm7, %v2160_v9 }
 0x4f6   : >> { %v1657_v33 = vpop.f32.mrb[0].mxu1 }
 0x4f7   : >> { %v2267_v34 = vpop.f32.mrb[1].mxu1  ;;  %v2597_v35 = vadd.f32 %v1657_v33, %v3657_v30 }
 0x50a   : >> { %v1975_v36 = vpop.f32.mrb[0].mxu0 }
 0x50b   : >> { %v2598_v37 = vadd.f32 %v2597_v35, %v1975_v36  ;;  %v2336_v38 = vpop.f32.mrb[1].mxu0 }
 0x50d   : >> { %2947 = vtanh.f32 %v2598_v37 }
 0x512   : > { %1444 = sbr.rel (!%p1442_p6) target bundleno = 892 (0x37c), region = 121 }
 0x517   : >> { %v2948_v39 = vpop.eup %2947 }
 0x518   : >> { %1984 = vst.msk [vmem:[%s1982_s13] sm:$0xff] %vm1983_vm8, %v2948_v39 }
 0x519 PF: > { %s15_s18 = sadd.s32 1, %s2963_s18  }
 0x51a   : > { %p12_p7 = scmp.ge.s32.totalorder %s15_s18, 4  }
 0x51c   :  { %14 = sbr.rel (!%p12_p7) target bundleno = 1 (0x1), region = 132 }

</bundles_post_ra>
